<compile_context>
chip_gen: v7x
topology: tpu7x:2x2x1
jax: 0.10.0
libtpu: 0.0.40
codegen_flags: <defaults>
</compile_context>

<pallas_src>
import jax
import jax.numpy as jnp
from jax.experimental import pallas as pl
from jax.experimental.pallas import tpu as pltpu

N_SPLIT = 4
HIDDEN = 512
NEG_SLOPE = 0.2


# ---------------------------------------------------------------------------
# Pallas kernel: one grid step == one GlowStep layer on the whole (C, B*T) slab
# ---------------------------------------------------------------------------
def glow_fused_kernel(x_ref, aux_ref, m_ref, w1_ref, w2_ref, b2_ref,
                      w3_ref, b3_ref, y_ref, ld_ref):
    C, BT = y_ref.shape
    half = C // 2
    layer = pl.program_id(0)

    # Layer 0: seed the running state and zero the logdet accumulator.
    @pl.when(layer == 0)
    def _():
        y_ref[...] = x_ref[...]
        ld_ref[...] = jnp.zeros_like(ld_ref)

    x = y_ref[...]                      # (C, BT) current layer input (f32)

    # Layer-invariant aux rows (precomputed in the wrapper, resident in VMEM).
    mask = aux_ref[0:1, :]              # (1, BT) x_mask
    maskod = aux_ref[1:2, :]            # mask / sum(mask)
    msq = aux_ref[2:3, :]               # mask * mask
    nf = aux_ref[3:4, :]                # 1 where t-1 stays in the same segment
    nl = aux_ref[4:5, :]                # 1 where t+1 stays in the same segment
    one_zero = aux_ref[5:7, :]          # [ones; zeros] rows for the bias fold

    # ---- ActNorm data-dependent init (first-forward semantics) -------------
    xm = x * maskod
    mean = jnp.sum(xm, axis=-1, keepdims=True)                  # (C, 1)
    mean_sq = jnp.sum(xm * x, axis=-1, keepdims=True)           # (C, 1)
    var = mean_sq - mean * mean
    an_logs = -0.5 * jnp.log(jnp.maximum(var, 1e-6))            # (C, 1)
    an_scale = jnp.exp(an_logs)
    an_bias = -mean * an_scale

    # ---- ActNorm apply + InvCov channel mix (bf16 MXU, f32 accumulate) ------
    # The channel mix is per-column, so the reference's two mask multiplies
    # (ActNorm then InvCov) collapse into one mask^2 after the matmul.
    y0 = an_bias + an_scale * x
    y1 = jnp.dot(m_ref[0], y0.astype(jnp.bfloat16),
                 preferred_element_type=jnp.float32) * msq

    xa = y1[:half, :]
    xb = y1[half:, :]

    # ---- Conv1d(C/2 -> H, k=3, pad=1): tiny input shift-stack + bias fold ---
    # x3 rows: [t-1 taps | t taps | t+1 taps | ones (bias) | zeros (K pad)]
    xb_prev = pltpu.roll(xb, shift=1, axis=1) * nf
    xb_next = pltpu.roll(xb, shift=BT - 1, axis=1) * nl
    x3 = jnp.concatenate([xb_prev, xb, xb_next, one_zero],
                         axis=0).astype(jnp.bfloat16)           # (3*half+2, BT)
    z1 = jnp.dot(w1_ref[0], x3, preferred_element_type=jnp.float32)
    h1 = jnp.maximum(z1, NEG_SLOPE * z1)                        # LeakyReLU(0.2)

    # ---- Conv1d(H -> H, k=1) ------------------------------------------------
    z2 = jnp.dot(w2_ref[0], h1.astype(jnp.bfloat16),
                 preferred_element_type=jnp.float32) + b2_ref[0]
    h2 = jnp.maximum(z2, NEG_SLOPE * z2)

    # ---- Conv1d(H -> C, k=3, pad=1): three matmuls, halo on the output side -
    # W_k @ roll(h2) (masked) == roll(W_k @ h2) (masked), so the rolls / halo
    # masks act on (C, BT) results instead of (H, BT) inputs.
    h2b = h2.astype(jnp.bfloat16)                               # single cast
    pp = jnp.dot(w3_ref[0, 0], h2b, preferred_element_type=jnp.float32)
    pc = jnp.dot(w3_ref[0, 1], h2b, preferred_element_type=jnp.float32)
    pn = jnp.dot(w3_ref[0, 2], h2b, preferred_element_type=jnp.float32)
    out = (pc
           + pltpu.roll(pp, shift=1, axis=1) * nf
           + pltpu.roll(pn, shift=BT - 1, axis=1) * nl
           + b3_ref[0])

    # ---- Affine coupling ----------------------------------------------------
    logs_c = out[:half, :]
    t_c = out[half:, :]
    s = jax.nn.sigmoid(logs_c + 2.0)

    y_ref[:half, :] = s * xa + t_c
    y_ref[half:, :] = xb

    # Per-column logdet: coupling sum_c log(s) (unmasked, like the reference)
    # + ActNorm sum(logs) * mask (wrapper sum per batch segment => * x_len).
    ld_ref[...] += (jnp.sum(jnp.log(s), axis=0, keepdims=True)
                    + jnp.sum(an_logs) * mask)


def make_glow_fused(num_layers, C, BT, H=HIDDEN):
    half = C // 2
    k1 = 3 * half + 2                                      # taps + bias + pad
    in_specs = [
        pl.BlockSpec((C, BT), lambda l: (0, 0)),           # x (resident)
        pl.BlockSpec((8, BT), lambda l: (0, 0)),           # aux rows (resident)
        pl.BlockSpec((1, C, C), lambda l: (l, 0, 0)),      # invcov mix (bf16)
        pl.BlockSpec((1, H, k1), lambda l: (l, 0, 0)),     # conv1 w+bias (bf16)
        pl.BlockSpec((1, H, H), lambda l: (l, 0, 0)),      # conv2 w (bf16)
        pl.BlockSpec((1, H, 1), lambda l: (l, 0, 0)),      # conv2 b (f32)
        pl.BlockSpec((1, 3, C, H), lambda l: (l, 0, 0, 0)),  # conv3 taps (bf16)
        pl.BlockSpec((1, C, 1), lambda l: (l, 0, 0)),      # conv3 b (f32)
    ]
    out_specs = [
        pl.BlockSpec((C, BT), lambda l: (0, 0)),           # y (resident)
        pl.BlockSpec((1, BT), lambda l: (0, 0)),           # logdet columns
    ]
    out_shape = (
        jax.ShapeDtypeStruct((C, BT), jnp.float32),
        jax.ShapeDtypeStruct((1, BT), jnp.float32),
    )
    return pl.pallas_call(
        glow_fused_kernel,
        out_shape=out_shape,
        grid_spec=pltpu.PrefetchScalarGridSpec(
            num_scalar_prefetch=0,
            grid=(num_layers,),
            in_specs=in_specs,
            out_specs=out_specs,
        ),
        input_output_aliases={0: 0},     # activation slab updated in place
        compiler_params=pltpu.CompilerParams(
            dimension_semantics=("arbitrary",),
            vmem_limit_bytes=32 * 1024 * 1024),
    )


# ---------------------------------------------------------------------------
# Parameter setup (deterministic, synthetic, matching the torch module layout)
# ---------------------------------------------------------------------------
def build_mix_matrix(w, c, n_split):
    """C x C channel-mixing matrix equivalent to InvCov's view/permute/conv2d."""
    half = n_split // 2
    groups = c // n_split
    m = jnp.zeros((c, c), jnp.float32)
    for a in range(2):
        for k in range(half):
            for a2 in range(2):
                for k2 in range(half):
                    for j in range(groups):
                        row = a * (c // 2) + j * half + k
                        colu = a2 * (c // 2) + j * half + k2
                        m = m.at[row, colu].set(w[a * half + k, a2 * half + k2])
    return m


def init_params(key, num_layer, C, H=HIDDEN):
    half = C // 2
    Ms, lds = [], []
    w1s, w2s, b2s, w3s, b3s = [], [], [], [], []
    for _ in range(num_layer):
        key, k0, k1, k2, k3, k4, k5, k6 = jax.random.split(key, 8)
        # InvCov orthogonal weight (QR of normal, det forced positive).
        wn = jax.random.normal(k0, (N_SPLIT, N_SPLIT), jnp.float32)
        q, _ = jnp.linalg.qr(wn)
        q_flipped = q.at[:, 0].multiply(-1.0)
        q = jnp.where(jnp.linalg.det(q) < 0, q_flipped, q)
        _, logabsdet = jnp.linalg.slogdet(q)

        def uinit(k, shape, fan_in):
            bound = 1.0 / float(fan_in) ** 0.5
            return jax.random.uniform(k, shape, jnp.float32, -bound, bound)

        w1 = uinit(k1, (H, half, 3), half * 3)   # Conv1d layout (out, in, k)
        b1 = uinit(k2, (H,), half * 3)
        w2 = uinit(k3, (H, H, 1), H)
        b2 = uinit(k4, (H,), H)
        w3 = uinit(k5, (C, H, 3), H * 3)
        b3 = uinit(k6, (C,), H * 3)

        Ms.append(build_mix_matrix(q, C, N_SPLIT).astype(jnp.bfloat16))
        lds.append(logabsdet)
        # Conv1 weight in shift-stack layout [k=0 | k=1 | k=2] blocks, with the
        # bias folded in as an extra K column and one zero pad column.
        w1_base = jnp.transpose(w1, (0, 2, 1)).reshape(H, 3 * half)
        w1_aug = jnp.concatenate(
            [w1_base, b1.reshape(H, 1), jnp.zeros((H, 1), jnp.float32)], axis=1)
        w1s.append(w1_aug.astype(jnp.bfloat16))
        w2s.append(w2[:, :, 0].astype(jnp.bfloat16))
        b2s.append(b2.reshape(H, 1))
        # Conv3 split into per-tap (C, H) matrices: tap 0 = t-1, 1 = t, 2 = t+1.
        w3s.append(jnp.transpose(w3, (2, 0, 1)).astype(jnp.bfloat16))
        b3s.append(b3.reshape(C, 1))

    return dict(
        M=jnp.stack(Ms), logdet_w=jnp.stack(lds),
        w1=jnp.stack(w1s),
        w2=jnp.stack(w2s), b2=jnp.stack(b2s),
        w3=jnp.stack(w3s), b3=jnp.stack(b3s),
    )


# ---------------------------------------------------------------------------
# Glow forward (first-call semantics: ActNorm data-dependent init per layer)
# ---------------------------------------------------------------------------
def glow_forward(x, x_mask, params):
    B, C, T = x.shape
    L, H = params["w2"].shape[0], params["w2"].shape[1]
    if x_mask is None:
        x_mask = jnp.ones((B, 1, T), x.dtype)
    x_len = jnp.sum(x_mask, axis=(1, 2))                        # (B,)
    BT = B * T

    # Fold batch into the lane (time) axis: (B, C, T) -> (C, B*T).
    x2 = jnp.transpose(x, (1, 0, 2)).reshape(C, BT)
    mask2 = jnp.transpose(x_mask, (1, 0, 2)).reshape(1, BT).astype(jnp.float32)

    # Layer-invariant aux rows, computed ONCE (hoisted out of the layer grid):
    # [mask, mask/denom, mask^2, not_first, not_last, ones, zeros, zeros]
    denom = jnp.sum(mask2)
    pos = jax.lax.broadcasted_iota(jnp.int32, (1, BT), 1) % T
    nf = (pos != 0).astype(jnp.float32)
    nl = (pos != (T - 1)).astype(jnp.float32)
    aux = jnp.concatenate(
        [mask2, mask2 / denom, mask2 * mask2, nf, nl,
         jnp.ones((1, BT), jnp.float32), jnp.zeros((2, BT), jnp.float32)],
        axis=0)                                                 # (8, BT)

    fused = make_glow_fused(L, C, BT, H)
    y2, ld_cols = fused(x2, aux, params["M"], params["w1"],
                        params["w2"], params["b2"],
                        params["w3"], params["b3"])

    y = jnp.transpose(y2.reshape(C, B, T), (1, 0, 2))           # (B, C, T)
    # ActNorm + coupling logdets come out of the per-column accumulator;
    # InvCov logdet only needs the 4x4 slogdet (precomputed) and x_len.
    ld02 = jnp.sum(ld_cols.reshape(B, T), axis=-1)
    ld1 = jnp.sum(params["logdet_w"]) * (C / N_SPLIT) * x_len
    return y, ld02 + ld1


# ---------------------------------------------------------------------------
if __name__ == "__main__":
    key = jax.random.PRNGKey(0)
    k_x, k_p = jax.random.split(key)

    B, C, T = 2, 16, 128       # B*T = 256 -> fills the 256-wide MXU N dim
    NUM_LAYER = 4              # Glow(feature_dim=16, num_layer=4)

    x = jax.random.normal(k_x, (B, C, T), jnp.float32)
    params = init_params(k_p, NUM_LAYER, C)

    fwd = jax.jit(glow_forward)
    y, log_det = fwd(x, None, params)
    jax.block_until_ready((y, log_det))

    assert y.shape == (B, C, T)
    assert log_det.shape == (B,)
    assert bool(jnp.all(jnp.isfinite(y)))
    assert bool(jnp.all(jnp.isfinite(log_det)))
    print("KERNEL_OK")
</pallas_src>

<mosaic_0001>
module attributes {stable_mosaic.version = 11 : i64} {
  func.func @glow_fused_kernel(%arg0: i32, %arg1: memref<16x256xf32, #tpu.memory_space<vmem>>, %arg2: memref<8x256xf32, #tpu.memory_space<vmem>>, %arg3: memref<1x16x16xbf16, #tpu.memory_space<vmem>>, %arg4: memref<1x512x26xbf16, #tpu.memory_space<vmem>>, %arg5: memref<1x512x512xbf16, #tpu.memory_space<vmem>>, %arg6: memref<1x512x1xf32, #tpu.memory_space<vmem>>, %arg7: memref<1x3x16x512xbf16, #tpu.memory_space<vmem>>, %arg8: memref<1x16x1xf32, #tpu.memory_space<vmem>>, %arg9: memref<16x256xf32, #tpu.memory_space<vmem>>, %arg10: memref<1x256xf32, #tpu.memory_space<vmem>>) attributes {dimension_semantics = [#tpu.dimension_semantics<arbitrary>], iteration_bounds = array<i64: 4>, scalar_prefetch = 0 : i64, scratch_operands = 0 : i64, tpu.core_type = #tpu.core_type<tc>, window_params = [{pipeline_mode = #tpu.pipeline_mode<synchronous>, transform_indices = @transform_0, window_bounds = array<i64: 16, 256>}, {pipeline_mode = #tpu.pipeline_mode<synchronous>, transform_indices = @transform_1, window_bounds = array<i64: 8, 256>}, {transform_indices = @transform_2, window_bounds = array<i64: 1, 16, 16>}, {transform_indices = @transform_3, window_bounds = array<i64: 1, 512, 26>}, {transform_indices = @transform_4, window_bounds = array<i64: 1, 512, 512>}, {transform_indices = @transform_5, window_bounds = array<i64: 1, 512, 1>}, {transform_indices = @transform_6, window_bounds = array<i64: 1, 3, 16, 512>}, {transform_indices = @transform_7, window_bounds = array<i64: 1, 16, 1>}, {pipeline_mode = #tpu.pipeline_mode<synchronous>, transform_indices = @transform_8, window_bounds = array<i64: 16, 256>}, {pipeline_mode = #tpu.pipeline_mode<synchronous>, transform_indices = @transform_9, window_bounds = array<i64: 1, 256>}]} {
    %c0_i32 = arith.constant 0 : i32
    %0 = arith.cmpi eq, %arg0, %c0_i32 : i32
    %1 = arith.extui %0 : i1 to i32
    %c0_i32_0 = arith.constant 0 : i32
    %2 = arith.cmpi ne, %1, %c0_i32_0 : i32
    scf.if %2 {
      %c0_61 = arith.constant 0 : index
      %c0_62 = arith.constant 0 : index
      %113 = vector.load %arg1[%c0_61, %c0_62] : memref<16x256xf32, #tpu.memory_space<vmem>>, vector<16x256xf32>
      %c0_63 = arith.constant 0 : index
      %c0_64 = arith.constant 0 : index
      %114 = vector.load %arg9[%c0_63, %c0_64] : memref<16x256xf32, #tpu.memory_space<vmem>>, vector<16x256xf32>
      tpu.vector_store %arg9[%c0_63, %c0_64], %113 {strides = array<i32>} : memref<16x256xf32, #tpu.memory_space<vmem>>, vector<16x256xf32>,
      %cst_65 = arith.constant 0.000000e+00 : f32
      %115 = vector.broadcast %cst_65 : f32 to vector<1x256xf32>
      %c0_66 = arith.constant 0 : index
      %c0_67 = arith.constant 0 : index
      %116 = vector.load %arg10[%c0_66, %c0_67] : memref<1x256xf32, #tpu.memory_space<vmem>>, vector<1x256xf32>
      tpu.vector_store %arg10[%c0_66, %c0_67], %115 {strides = array<i32>} : memref<1x256xf32, #tpu.memory_space<vmem>>, vector<1x256xf32>,
    } else {
    }
    %c0 = arith.constant 0 : index
    %c0_1 = arith.constant 0 : index
    %3 = vector.load %arg9[%c0, %c0_1] : memref<16x256xf32, #tpu.memory_space<vmem>>, vector<16x256xf32>
    %c0_2 = arith.constant 0 : index
    %c0_3 = arith.constant 0 : index
    %4 = vector.load %arg2[%c0_2, %c0_3] : memref<8x256xf32, #tpu.memory_space<vmem>>, vector<1x256xf32>
    %c1 = arith.constant 1 : index
    %c0_4 = arith.constant 0 : index
    %5 = vector.load %arg2[%c1, %c0_4] : memref<8x256xf32, #tpu.memory_space<vmem>>, vector<1x256xf32>
    %c2 = arith.constant 2 : index
    %c0_5 = arith.constant 0 : index
    %6 = vector.load %arg2[%c2, %c0_5] : memref<8x256xf32, #tpu.memory_space<vmem>>, vector<1x256xf32>
    %c3 = arith.constant 3 : index
    %c0_6 = arith.constant 0 : index
    %7 = vector.load %arg2[%c3, %c0_6] : memref<8x256xf32, #tpu.memory_space<vmem>>, vector<1x256xf32>
    %c4 = arith.constant 4 : index
    %c0_7 = arith.constant 0 : index
    %8 = vector.load %arg2[%c4, %c0_7] : memref<8x256xf32, #tpu.memory_space<vmem>>, vector<1x256xf32>
    %c5 = arith.constant 5 : index
    %c0_8 = arith.constant 0 : index
    %9 = vector.load %arg2[%c5, %c0_8] : memref<8x256xf32, #tpu.memory_space<vmem>>, vector<2x256xf32>
    %10 = vector.broadcast %5 : vector<1x256xf32> to vector<16x256xf32>
    %11 = arith.mulf %3, %10 : vector<16x256xf32>
    %cst = arith.constant dense<0.000000e+00> : vector<16xf32>
    %12 = vector.multi_reduction <add>, %11, %cst [1] : vector<16x256xf32> to vector<16xf32>
    %13 = vector.shape_cast %12 : vector<16xf32> to vector<16x1xf32>
    %14 = arith.mulf %11, %3 : vector<16x256xf32>
    %cst_9 = arith.constant dense<0.000000e+00> : vector<16xf32>
    %15 = vector.multi_reduction <add>, %14, %cst_9 [1] : vector<16x256xf32> to vector<16xf32>
    %16 = vector.shape_cast %15 : vector<16xf32> to vector<16x1xf32>
    %17 = arith.mulf %13, %13 : vector<16x1xf32>
    %18 = arith.subf %16, %17 : vector<16x1xf32>
    %cst_10 = arith.constant 9.99999997E-7 : f32
    %19 = vector.broadcast %cst_10 : f32 to vector<16x1xf32>
    %20 = arith.maximumf %18, %19 : vector<16x1xf32>
    %21 = math.log %20 : vector<16x1xf32>
    %cst_11 = arith.constant -5.000000e-01 : f32
    %22 = vector.broadcast %cst_11 : f32 to vector<16x1xf32>
    %23 = arith.mulf %22, %21 : vector<16x1xf32>
    %24 = math.exp %23 : vector<16x1xf32>
    %cst_12 = arith.constant 0.000000e+00 : f32
    %25 = vector.broadcast %cst_12 : f32 to vector<16x1xf32>
    %26 = arith.subf %25, %13 : vector<16x1xf32>
    %27 = arith.mulf %26, %24 : vector<16x1xf32>
    %28 = vector.broadcast %24 : vector<16x1xf32> to vector<16x256xf32>
    %29 = arith.mulf %28, %3 : vector<16x256xf32>
    %30 = vector.broadcast %27 : vector<16x1xf32> to vector<16x256xf32>
    %31 = arith.addf %30, %29 : vector<16x256xf32>
    %c0_13 = arith.constant 0 : index
    %c0_14 = arith.constant 0 : index
    %c0_15 = arith.constant 0 : index
    %32 = vector.load %arg3[%c0_13, %c0_14, %c0_15] : memref<1x16x16xbf16, #tpu.memory_space<vmem>>, vector<1x16x16xbf16>
    %33 = vector.shape_cast %32 : vector<1x16x16xbf16> to vector<16x16xbf16>
    %34 = arith.truncf %31 : vector<16x256xf32> to vector<16x256xbf16>
    %cst_16 = arith.constant dense<0.000000e+00> : vector<16x256xf32>
    %35 = tpu.matmul %33, %34, %cst_16 {dimension_numbers = #tpu.dot_dimension_numbers<[1], [0], [0], [1], [0, 0, 1, 1], [], []>} : vector<16x16xbf16>, vector<16x256xbf16>, vector<16x256xf32> -> vector<16x256xf32>
    %36 = vector.broadcast %6 : vector<1x256xf32> to vector<16x256xf32>
    %37 = arith.mulf %35, %36 : vector<16x256xf32>
    %38 = vector.extract_strided_slice %37 {offsets = [0, 0], sizes = [8, 256], strides = [1, 1]} : vector<16x256xf32> to vector<8x256xf32>
    %39 = vector.extract_strided_slice %37 {offsets = [8, 0], sizes = [8, 256], strides = [1, 1]} : vector<16x256xf32> to vector<8x256xf32>
    %c1_i32 = arith.constant 1 : i32
    %40 = tpu.dynamic_rotate %39 by %c1_i32 dim 1 : vector<8x256xf32>, i32 -> vector<8x256xf32>
    %41 = vector.broadcast %7 : vector<1x256xf32> to vector<8x256xf32>
    %42 = arith.mulf %40, %41 : vector<8x256xf32>
    %c255_i32 = arith.constant 255 : i32
    %43 = tpu.dynamic_rotate %39 by %c255_i32 dim 1 : vector<8x256xf32>, i32 -> vector<8x256xf32>
    %44 = vector.broadcast %8 : vector<1x256xf32> to vector<8x256xf32>
    %45 = arith.mulf %43, %44 : vector<8x256xf32>
    %46 = tpu.concatenate %42, %39, %45, %9 in 0 : vector<8x256xf32>, vector<8x256xf32>, vector<8x256xf32>, vector<2x256xf32> -> vector<26x256xf32>
    %47 = arith.truncf %46 : vector<26x256xf32> to vector<26x256xbf16>
    %c0_17 = arith.constant 0 : index
    %c0_18 = arith.constant 0 : index
    %c0_19 = arith.constant 0 : index
    %48 = vector.load %arg4[%c0_17, %c0_18, %c0_19] : memref<1x512x26xbf16, #tpu.memory_space<vmem>>, vector<1x512x26xbf16>
    %49 = vector.shape_cast %48 : vector<1x512x26xbf16> to vector<512x26xbf16>
    %cst_20 = arith.constant dense<0.000000e+00> : vector<512x256xf32>
    %50 = tpu.matmul %49, %47, %cst_20 {dimension_numbers = #tpu.dot_dimension_numbers<[1], [0], [0], [1], [0, 0, 1, 1], [], []>} : vector<512x26xbf16>, vector<26x256xbf16>, vector<512x256xf32> -> vector<512x256xf32>
    %cst_21 = arith.constant 2.000000e-01 : f32
    %51 = vector.broadcast %cst_21 : f32 to vector<512x256xf32>
    %52 = arith.mulf %51, %50 : vector<512x256xf32>
    %53 = arith.maximumf %50, %52 : vector<512x256xf32>
    %c0_22 = arith.constant 0 : index
    %c0_23 = arith.constant 0 : index
    %c0_24 = arith.constant 0 : index
    %54 = vector.load %arg5[%c0_22, %c0_23, %c0_24] : memref<1x512x512xbf16, #tpu.memory_space<vmem>>, vector<1x512x512xbf16>
    %55 = vector.shape_cast %54 : vector<1x512x512xbf16> to vector<512x512xbf16>
    %56 = arith.truncf %53 : vector<512x256xf32> to vector<512x256xbf16>
    %cst_25 = arith.constant dense<0.000000e+00> : vector<512x256xf32>
    %57 = tpu.matmul %55, %56, %cst_25 {dimension_numbers = #tpu.dot_dimension_numbers<[1], [0], [0], [1], [0, 0, 1, 1], [], []>} : vector<512x512xbf16>, vector<512x256xbf16>, vector<512x256xf32> -> vector<512x256xf32>
    %c0_26 = arith.constant 0 : index
    %c0_27 = arith.constant 0 : index
    %c0_28 = arith.constant 0 : index
    %58 = vector.load %arg6[%c0_26, %c0_27, %c0_28] : memref<1x512x1xf32, #tpu.memory_space<vmem>>, vector<1x512x1xf32>
    %59 = vector.shape_cast %58 : vector<1x512x1xf32> to vector<512x1xf32>
    %60 = vector.broadcast %59 : vector<512x1xf32> to vector<512x256xf32>
    %61 = arith.addf %57, %60 : vector<512x256xf32>
    %cst_29 = arith.constant 2.000000e-01 : f32
    %62 = vector.broadcast %cst_29 : f32 to vector<512x256xf32>
    %63 = arith.mulf %62, %61 : vector<512x256xf32>
    %64 = arith.maximumf %61, %63 : vector<512x256xf32>
    %65 = arith.truncf %64 : vector<512x256xf32> to vector<512x256xbf16>
    %c0_30 = arith.constant 0 : index
    %c0_31 = arith.constant 0 : index
    %c0_32 = arith.constant 0 : index
    %c0_33 = arith.constant 0 : index
    %66 = vector.load %arg7[%c0_30, %c0_31, %c0_32, %c0_33] : memref<1x3x16x512xbf16, #tpu.memory_space<vmem>>, vector<1x1x16x512xbf16>
    %67 = vector.shape_cast %66 : vector<1x1x16x512xbf16> to vector<16x512xbf16>
    %cst_34 = arith.constant dense<0.000000e+00> : vector<16x256xf32>
    %68 = tpu.matmul %67, %65, %cst_34 {dimension_numbers = #tpu.dot_dimension_numbers<[1], [0], [0], [1], [0, 0, 1, 1], [], []>} : vector<16x512xbf16>, vector<512x256xbf16>, vector<16x256xf32> -> vector<16x256xf32>
    %c0_35 = arith.constant 0 : index
    %c1_36 = arith.constant 1 : index
    %c0_37 = arith.constant 0 : index
    %c0_38 = arith.constant 0 : index
    %69 = vector.load %arg7[%c0_35, %c1_36, %c0_37, %c0_38] : memref<1x3x16x512xbf16, #tpu.memory_space<vmem>>, vector<1x1x16x512xbf16>
    %70 = vector.shape_cast %69 : vector<1x1x16x512xbf16> to vector<16x512xbf16>
    %cst_39 = arith.constant dense<0.000000e+00> : vector<16x256xf32>
    %71 = tpu.matmul %70, %65, %cst_39 {dimension_numbers = #tpu.dot_dimension_numbers<[1], [0], [0], [1], [0, 0, 1, 1], [], []>} : vector<16x512xbf16>, vector<512x256xbf16>, vector<16x256xf32> -> vector<16x256xf32>
    %c0_40 = arith.constant 0 : index
    %c2_41 = arith.constant 2 : index
    %c0_42 = arith.constant 0 : index
    %c0_43 = arith.constant 0 : index
    %72 = vector.load %arg7[%c0_40, %c2_41, %c0_42, %c0_43] : memref<1x3x16x512xbf16, #tpu.memory_space<vmem>>, vector<1x1x16x512xbf16>
    %73 = vector.shape_cast %72 : vector<1x1x16x512xbf16> to vector<16x512xbf16>
    %cst_44 = arith.constant dense<0.000000e+00> : vector<16x256xf32>
    %74 = tpu.matmul %73, %65, %cst_44 {dimension_numbers = #tpu.dot_dimension_numbers<[1], [0], [0], [1], [0, 0, 1, 1], [], []>} : vector<16x512xbf16>, vector<512x256xbf16>, vector<16x256xf32> -> vector<16x256xf32>
    %c1_i32_45 = arith.constant 1 : i32
    %75 = tpu.dynamic_rotate %68 by %c1_i32_45 dim 1 : vector<16x256xf32>, i32 -> vector<16x256xf32>
    %76 = vector.broadcast %7 : vector<1x256xf32> to vector<16x256xf32>
    %77 = arith.mulf %75, %76 : vector<16x256xf32>
    %78 = arith.addf %71, %77 : vector<16x256xf32>
    %c255_i32_46 = arith.constant 255 : i32
    %79 = tpu.dynamic_rotate %74 by %c255_i32_46 dim 1 : vector<16x256xf32>, i32 -> vector<16x256xf32>
    %80 = vector.broadcast %8 : vector<1x256xf32> to vector<16x256xf32>
    %81 = arith.mulf %79, %80 : vector<16x256xf32>
    %82 = arith.addf %78, %81 : vector<16x256xf32>
    %c0_47 = arith.constant 0 : index
    %c0_48 = arith.constant 0 : index
    %c0_49 = arith.constant 0 : index
    %83 = vector.load %arg8[%c0_47, %c0_48, %c0_49] : memref<1x16x1xf32, #tpu.memory_space<vmem>>, vector<1x16x1xf32>
    %84 = vector.shape_cast %83 : vector<1x16x1xf32> to vector<16x1xf32>
    %85 = vector.broadcast %84 : vector<16x1xf32> to vector<16x256xf32>
    %86 = arith.addf %82, %85 : vector<16x256xf32>
    %87 = vector.extract_strided_slice %86 {offsets = [0, 0], sizes = [8, 256], strides = [1, 1]} : vector<16x256xf32> to vector<8x256xf32>
    %88 = vector.extract_strided_slice %86 {offsets = [8, 0], sizes = [8, 256], strides = [1, 1]} : vector<16x256xf32> to vector<8x256xf32>
    %cst_50 = arith.constant 2.000000e+00 : f32
    %89 = vector.broadcast %cst_50 : f32 to vector<8x256xf32>
    %90 = arith.addf %87, %89 : vector<8x256xf32>
    %91 = arith.negf %90 : vector<8x256xf32>
    %92 = math.exp %91 : vector<8x256xf32>
    %cst_51 = arith.constant 1.000000e+00 : f32
    %93 = vector.broadcast %cst_51 : f32 to vector<8x256xf32>
    %94 = arith.addf %93, %92 : vector<8x256xf32>
    %95 = arith.divf %93, %94 : vector<8x256xf32>
    %96 = arith.mulf %95, %38 : vector<8x256xf32>
    %97 = arith.addf %96, %88 : vector<8x256xf32>
    %c0_52 = arith.constant 0 : index
    %c0_53 = arith.constant 0 : index
    %98 = vector.load %arg9[%c0_52, %c0_53] : memref<16x256xf32, #tpu.memory_space<vmem>>, vector<8x256xf32>
    tpu.vector_store %arg9[%c0_52, %c0_53], %97 {strides = array<i32>} : memref<16x256xf32, #tpu.memory_space<vmem>>, vector<8x256xf32>,
    %c8 = arith.constant 8 : index
    %c0_54 = arith.constant 0 : index
    %99 = vector.load %arg9[%c8, %c0_54] : memref<16x256xf32, #tpu.memory_space<vmem>>, vector<8x256xf32>
    tpu.vector_store %arg9[%c8, %c0_54], %39 {strides = array<i32>} : memref<16x256xf32, #tpu.memory_space<vmem>>, vector<8x256xf32>,
    %c0_55 = arith.constant 0 : index
    %c0_56 = arith.constant 0 : index
    %100 = vector.load %arg10[%c0_55, %c0_56] : memref<1x256xf32, #tpu.memory_space<vmem>>, vector<1x256xf32>
    %101 = math.log %95 : vector<8x256xf32>
    %cst_57 = arith.constant dense<0.000000e+00> : vector<256xf32>
    %102 = vector.multi_reduction <add>, %101, %cst_57 [0] : vector<8x256xf32> to vector<256xf32>
    %103 = vector.shape_cast %102 : vector<256xf32> to vector<1x256xf32>
    %104 = vector.shape_cast %23 : vector<16x1xf32> to vector<1x16x1xf32>
    %cst_58 = arith.constant dense<0.000000e+00> : vector<1xf32>
    %105 = vector.multi_reduction <add>, %104, %cst_58 [1, 2] : vector<1x16x1xf32> to vector<1xf32>
    %106 = vector.shape_cast %105 : vector<1xf32> to vector<1x1x1xf32>
    %107 = vector.extract %106[0, 0, 0] : f32 from vector<1x1x1xf32>
    %108 = vector.broadcast %107 : f32 to vector<1x256xf32>
    %109 = arith.mulf %108, %4 : vector<1x256xf32>
    %110 = arith.addf %103, %109 : vector<1x256xf32>
    %111 = arith.addf %100, %110 : vector<1x256xf32>
    %c0_59 = arith.constant 0 : index
    %c0_60 = arith.constant 0 : index
    %112 = vector.load %arg10[%c0_59, %c0_60] : memref<1x256xf32, #tpu.memory_space<vmem>>, vector<1x256xf32>
    tpu.vector_store %arg10[%c0_59, %c0_60], %111 {strides = array<i32>} : memref<1x256xf32, #tpu.memory_space<vmem>>, vector<1x256xf32>,
    return
  }
  func.func @transform_0(%arg0: i32) -> (i32, i32) {
    %c0_i32 = arith.constant 0 : i32
    %c0_i32_0 = arith.constant 0 : i32
    %c0_i32_1 = arith.constant 0 : i32
    return %c0_i32, %c0_i32_0 : i32, i32
  }
  func.func @transform_1(%arg0: i32) -> (i32, i32) {
    %c0_i32 = arith.constant 0 : i32
    %c0_i32_0 = arith.constant 0 : i32
    %c0_i32_1 = arith.constant 0 : i32
    return %c0_i32, %c0_i32_0 : i32, i32
  }
  func.func @transform_2(%arg0: i32) -> (i32, i32, i32) {
    %c0_i32 = arith.constant 0 : i32
    %c0_i32_0 = arith.constant 0 : i32
    %c0_i32_1 = arith.constant 0 : i32
    return %arg0, %c0_i32, %c0_i32_0 : i32, i32, i32
  }
  func.func @transform_3(%arg0: i32) -> (i32, i32, i32) {
    %c0_i32 = arith.constant 0 : i32
    %c0_i32_0 = arith.constant 0 : i32
    %c0_i32_1 = arith.constant 0 : i32
    return %arg0, %c0_i32, %c0_i32_0 : i32, i32, i32
  }
  func.func @transform_4(%arg0: i32) -> (i32, i32, i32) {
    %c0_i32 = arith.constant 0 : i32
    %c0_i32_0 = arith.constant 0 : i32
    %c0_i32_1 = arith.constant 0 : i32
    return %arg0, %c0_i32, %c0_i32_0 : i32, i32, i32
  }
  func.func @transform_5(%arg0: i32) -> (i32, i32, i32) {
    %c0_i32 = arith.constant 0 : i32
    %c0_i32_0 = arith.constant 0 : i32
    %c0_i32_1 = arith.constant 0 : i32
    return %arg0, %c0_i32, %c0_i32_0 : i32, i32, i32
  }
  func.func @transform_6(%arg0: i32) -> (i32, i32, i32, i32) {
    %c0_i32 = arith.constant 0 : i32
    %c0_i32_0 = arith.constant 0 : i32
    %c0_i32_1 = arith.constant 0 : i32
    %c0_i32_2 = arith.constant 0 : i32
    return %arg0, %c0_i32, %c0_i32_0, %c0_i32_1 : i32, i32, i32, i32
  }
  func.func @transform_7(%arg0: i32) -> (i32, i32, i32) {
    %c0_i32 = arith.constant 0 : i32
    %c0_i32_0 = arith.constant 0 : i32
    %c0_i32_1 = arith.constant 0 : i32
    return %arg0, %c0_i32, %c0_i32_0 : i32, i32, i32
  }
  func.func @transform_8(%arg0: i32) -> (i32, i32) {
    %c0_i32 = arith.constant 0 : i32
    %c0_i32_0 = arith.constant 0 : i32
    %c0_i32_1 = arith.constant 0 : i32
    return %c0_i32, %c0_i32_0 : i32, i32
  }
  func.func @transform_9(%arg0: i32) -> (i32, i32) {
    %c0_i32 = arith.constant 0 : i32
    %c0_i32_0 = arith.constant 0 : i32
    %c0_i32_1 = arith.constant 0 : i32
    return %c0_i32, %c0_i32_0 : i32, i32
  }
}

</mosaic_0001>

<bundles_post_ra>
// kernel: glow_forward.1
= control target key start
LH: loop header
LB: loop body
LE: loop exit
PB: predicated region body
PF: predicated region fallthrough
CT: control target
= control target key end

     0   :  { %s6729_s0 = inlined_call_operand.vmem [shape: f32[16,256], index: 0, kind: input, shape index: {}, may-alias: {0,8}]   ;;  %s6730_s1 = inlined_call_operand.vmem [shape: f32[8,256], index: 1, kind: input, shape index: {}]   ;;  %s6731_s2 = inlined_call_operand.hbm [shape: bf16[4,16,16], index: 2, kind: input, shape index: {}]   ;;  %s6732_s3 = inlined_call_operand.vmem [shape: bf16[4,512,26], index: 3, kind: input, shape index: {}]   ;;  %s6733_s4 = inlined_call_operand.hbm [shape: bf16[4,512,512], index: 4, kind: input, shape index: {}]   ;;  %s6734_s5 = inlined_call_operand.vmem [shape: f32[4,512,1], index: 5, kind: input, shape index: {}]   ;;  %s6735_s6 = inlined_call_operand.hbm [shape: bf16[4,3,16,512], index: 6, kind: input, shape index: {}]   ;;  %s6736_s7 = inlined_call_operand.vmem [shape: f32[4,16,1], index: 7, kind: input, shape index: {}]   ;;  %s6737_s8 = inlined_call_operand.vmem [shape: f32[16,256], index: 8, kind: output, shape index: {0}, may-alias: {0,8}]   ;;  %s6738_s9 = inlined_call_operand.vmem [shape: f32[1,256], index: 9, kind: output, shape index: {1}]  }
   0x1   :  { %6809 = sst [smem:[#allocation50_spill]] %s6731_s2 }
   0x2   :  { %6810 = sst [smem:[#allocation51_spill]] %s6733_s4 }
   0x3   :  { %15 = vsyncpa [#allocation3], 0 }
   0x4   :  { %17 = vsyncpa [#allocation3 + $0x1], 0 }
   0x5   :  { %18 = vsyncpa [#allocation5], 0 }
   0x6   :  { %20 = vsyncpa [#allocation5 + $0x1], 0  ;;  %s5506_s30 = smov 0   ;;  %s5508_s10 = smov 0  }
   0x7   :  { %s5510_s11 = smov 0   ;;  %s5512_s12 = smov 0  }
   0x8 LB: > { %6811 = sst [smem:[#allocation9_spill]] %s5438_s11  ;;  %s5525_s13 = sadd.s32 4294967295, %s5442_s12   ;;  %s5442_s12 = sphi %s5512_s12, %s6913_s12   ;;  %s5438_s11 = sphi %s5510_s11, %s6910_s11   ;;  %s5434_s10 = sphi %s5508_s10, %s6912_s10   ;;  %s5430_s30 = sphi %s5506_s30, %s6911_s30  }
   0x9   : > { %s5528_s14 = sadd.s32 1, %s5442_s12   ;;  %s75_s16 = sadd.s32 1, %s5438_s11 }
   0xa   : > { %s72_s15 = ssub.s32 %s5442_s12, %s5528_s14  ;;  %p82_p1 = scmp.ne.s32.totalorder %s5438_s11, %s5434_s10 }
   0xb   : > { %p73_p0 = scmp.eq.s32.totalorder %s72_s15, 0  ;;  %p83_p2 = scmp.eq.s32.totalorder %s5442_s12, 0 }
   0xc   : > { %p88_p3 = scmp.ne.s32.totalorder %s5434_s10, %s5430_s30  ;;  %p89_p5 = scmp.eq.s32.totalorder %s5525_s13, 0 }
   0xd   : > { %s5538_s17 = scalar_select %p73_p0, %s5438_s11, %s75_s16  }
   0xe   : > { %p84_p4 = por %p83_p2, %p82_p1  ;;  %p5007_p6 = scmp.lt.s32.totalorder %s5442_s12, 4 }
   0xf   : > { %6812 = sst [smem:[#allocation10_spill]] %s5538_s17  ;;  %p5542_p7 = por %p89_p5, %p88_p3 }
  0x10   : > { %s5547_s19 = sand.u32 1, %s5438_s11   ;;  %p5549_p8 = pnand %p5007_p6, %p84_p4 }
  0x11   : > { %s6813_s18 = scalar_select %p5542_p7, 1, 0 }
  0x12   : > { %s319_s21 = sand.u32 1, %s5442_s12   ;;  %s4472_s22 = sshll.u32 %s5547_s19, 10 }
  0x13   : > { %s4710_s23 = sshll.u32 %s5442_s12, 14  ;;  %s323_s24 = scalar_lea.vmem [#allocation4], %s4472_s22 }
  0x14   : > { %s330_s25 = sshll.u32 %s323_s24, 4  ;;  %s6815_s4 = sld [smem:[#allocation51_spill]]  ;;  %s5561_s25 = int_to_ptr.vmem [resolvable:$true] %s330_s25 }
  0x15   : > { %s5563_s29 = scalar_lea.sflag [#allocation5], %s319_s21  ;;  %p5569_p10 = pneg %p5549_p8 }
  0x1a   : > { %s5559_s28 = scalar_lea.hbm %s6815_s4, %s4710_s23  ;;  %s5319_s23 = scalar_lea.hbm %s6815_s4, 65536 }
  0x1b   : > { %s5314_s30 = scalar_lea.hbm %s5559_s28, 16384  ;;  %p5320_p13 = scmp.lt.u32.totalorder %s5559_s28, %s6815_s4 }
  0x1c   : > { %p5315_p9 = scmp.ne.s32.totalorder %s5559_s28, %s5314_s30  ;;  %p5321_p0 = scmp.lt.u32.totalorder %s5319_s23, %s5314_s30 }
  0x1d   : > { %p5323_p2 = scmp.lt.u32.totalorder %s5314_s30, %s5559_s28 }
  0x1e   : > { %p5317_p11 = pnand %p5569_p10, %p5315_p9  ;;  %p5322_p1 = por %p5321_p0, %p5320_p13 }
  0x20   : > { %p5318_p12 = pneg %p5317_p11  ;;  %p5324_p3 = por %p5323_p2, %p5322_p1 }
  0x22   : > { %p5325_p4 = pnand %p5324_p3, %p5318_p12 }
  0x24   : > { %5328 = shalt.err (!%p5325_p4)
}
  0x25   : > { %s5329_s21 = scalar_lea.vmem %s5561_s25, 16384  ;;  %s5444_s27 = smov [#allocation4]  }
  0x26   : > { %p5330_p5 = scmp.ne.s32.totalorder %s5561_s25, %s5329_s21  ;;  %s5334_s16 = sshll.u32 %s5444_s27, 4  ;;  %s5335_s16 = int_to_ptr.vmem [resolvable:$false] %s5334_s16 }
  0x27   : > { %s5336_s22 = scalar_lea.vmem %s5335_s16, 32768  ;;  %p5337_p11 = scmp.lt.s32.totalorder %s5561_s25, %s5335_s16 }
  0x28   : > { %p5332_p6 = pnand %p5330_p5, %p5569_p10  ;;  %p5338_p7 = scmp.lt.s32.totalorder %s5336_s22, %s5329_s21 }
  0x2a   : > { %p5333_p9 = pneg %p5332_p6  ;;  %p5339_p13 = por %p5338_p7, %p5337_p11 }
  0x2c   : > { %p5340_p0 = pnand %p5339_p13, %p5333_p9 }
  0x2e   : > { %5343 = shalt.err (!%p5340_p0)
}
  0x2f   : > { %s6740_s30 = smov 256   ;;  %s6741_s23 = smov 16  }
  0x30   : > { %5003 = dma.hbm_to_vmem [thread:$0]  (!%p5549_p8), %s5559_s28, 16384, %s5561_s25, %s5563_s29, %s6740_s30, %s6740_s30, %s6741_s23  }
  0x31   : > { %p4476_p7 = scmp.ge.s32.totalorder %s5442_s12, 1  ;;  %p375_p12 = scmp.lt.s32.totalorder %s5442_s12, 5 }
  0x32   : > { %s4469_s24 = sshll.u32 %s5547_s19, 3  ;;  %s4709_s21 = sshll.u32 %s5442_s12, 7 }
  0x33   : > { %p5599_p1 = pnand %p4476_p7, %p375_p12  ;;  %s294_s27 = scalar_lea.vmem [#allocation2], %s4469_s24 }
  0x34   : > { %s301_s16 = sshll.u32 %s294_s27, 4  ;;  %s6818_s2 = sld [smem:[#allocation50_spill]]  ;;  %s5609_s16 = int_to_ptr.vmem [resolvable:$true] %s301_s16 }
  0x35   : > { %s6817_s26 = scalar_select %p5599_p1, 1, 0 }
  0x36   : > { %s291_s25 = scalar_lea.sflag [#allocation3], %s5547_s19 }
  0x3a   : > { %s5607_s17 = scalar_lea.hbm %s6818_s2, %s4709_s21  ;;  %s5349_s27 = scalar_lea.hbm %s6818_s2, 512 }
  0x3b   : > { %s5344_s28 = scalar_lea.hbm %s5607_s17, 128  ;;  %p5350_p5 = scmp.lt.u32.totalorder %s5607_s17, %s6818_s2 }
  0x3c   : > { %p5345_p2 = scmp.ne.s32.totalorder %s5607_s17, %s5344_s28  ;;  %p5351_p6 = scmp.lt.u32.totalorder %s5349_s27, %s5344_s28 }
  0x3d   : > { %p5353_p11 = scmp.lt.u32.totalorder %s5344_s28, %s5607_s17 }
  0x3e   : > { %p5347_p3 = pnand %p5345_p2, %p5569_p10  ;;  %p5352_p9 = por %p5351_p6, %p5350_p5 }
  0x40   : > { %p5348_p4 = pneg %p5347_p3  ;;  %p5354_p13 = por %p5353_p11, %p5352_p9 }
  0x42   : > { %p5355_p0 = pnand %p5354_p13, %p5348_p4 }
  0x44   : > { %5358 = shalt.err (!%p5355_p0)
}
  0x45   : > { %s5359_s21 = scalar_lea.vmem %s5609_s16, 128  ;;  %s5447_s30 = smov [#allocation2]  }
  0x46   : > { %p5360_p7 = scmp.ne.s32.totalorder %s5609_s16, %s5359_s21  ;;  %s5364_s22 = sshll.u32 %s5447_s30, 4  ;;  %s5365_s22 = int_to_ptr.vmem [resolvable:$false] %s5364_s22 }
  0x47   : > { %s5366_s23 = scalar_lea.vmem %s5365_s22, 256  ;;  %p5367_p3 = scmp.lt.s32.totalorder %s5609_s16, %s5365_s22 }
  0x48   : > { %p5362_p12 = pnand %p5360_p7, %p5569_p10  ;;  %p5368_p1 = scmp.lt.s32.totalorder %s5366_s23, %s5359_s21 }
  0x4a   : > { %p5363_p2 = pneg %p5362_p12  ;;  %p5369_p5 = por %p5368_p1, %p5367_p3 }
  0x4c   : > { %p5370_p6 = pnand %p5369_p5, %p5363_p2 }
  0x4e   : > { %5373 = shalt.err (!%p5370_p6)
}
  0x4f   : > { %s5448_s28 = smov 64   ;;  %s5449_s24 = smov 4  }
  0x50   : > { %5000 = dma.hbm_to_vmem [thread:$0]  (!%p5549_p8), %s5607_s17, 128, %s5609_s16, %s291_s25, %s5448_s28, %s5448_s28, %s5449_s24  }
  0x51   : > { %s4986_s27 = smul.u32 96, %s5547_s19  ;;  %s5379_s19 = scalar_lea.hbm %s6735_s6, 6144 }
  0x52   : > { %s4987_s4 = smul.u32 1536, %s5442_s12 }
  0x53   : > { %s352_s23 = scalar_lea.vmem [#allocation6], %s4986_s27 }
  0x54   : > { %s5640_s21 = scalar_lea.hbm %s6735_s6, %s4987_s4  ;;  %s359_s2 = sshll.u32 %s352_s23, 4  ;;  %s5642_s2 = int_to_ptr.vmem [resolvable:$true] %s359_s2 }
  0x55   : > { %s5374_s11 = scalar_lea.hbm %s5640_s21, 1536  ;;  %p5380_p11 = scmp.lt.u32.totalorder %s5640_s21, %s6735_s6 }
  0x56   : > { %p5375_p1 = scmp.ne.s32.totalorder %s5640_s21, %s5374_s11  ;;  %p5381_p13 = scmp.lt.u32.totalorder %s5379_s19, %s5374_s11 }
  0x57   : > { %p5383_p7 = scmp.lt.u32.totalorder %s5374_s11, %s5640_s21 }
  0x58   : > { %p5377_p4 = pnand %p5375_p1, %p5569_p10  ;;  %p5382_p0 = por %p5381_p13, %p5380_p11 }
  0x5a   : > { %p5378_p9 = pneg %p5377_p4  ;;  %p5384_p12 = por %p5383_p7, %p5382_p0 }
  0x5c   : > { %p5385_p2 = pnand %p5384_p12, %p5378_p9 }
  0x5e   : > { %5388 = shalt.err (!%p5385_p2)
}
  0x5f   : > { %s5389_s28 = scalar_lea.vmem %s5642_s2, 1536  ;;  %s5450_s24 = smov [#allocation6]  }
  0x60   : > { %p5390_p3 = scmp.ne.s32.totalorder %s5642_s2, %s5389_s28  ;;  %s5394_s27 = sshll.u32 %s5450_s24, 4  ;;  %s5395_s27 = int_to_ptr.vmem [resolvable:$false] %s5394_s27 }
  0x61   : > { %s5396_s4 = scalar_lea.vmem %s5395_s27, 3072  ;;  %p5397_p1 = scmp.lt.s32.totalorder %s5642_s2, %s5395_s27 }
  0x62   : > { %p5392_p5 = pnand %p5390_p3, %p5569_p10  ;;  %p5398_p4 = scmp.lt.s32.totalorder %s5396_s4, %s5389_s28 }
  0x64   : > { %p5393_p6 = pneg %p5392_p5  ;;  %p5399_p11 = por %p5398_p4, %p5397_p1 }
  0x66   : > { %p5400_p13 = pnand %p5399_p11, %p5393_p6 }
  0x68   : > { %5403 = shalt.err (!%p5400_p13)
}
  0x69   : > { %s6819_s11 = smov 16   ;;  %s6820_s30 = smov 256  }
  0x6a   : > { %5006 = dma.hbm_to_vmem [thread:$0]  (!%p5549_p8), %s5640_s21, 1536, %s5642_s2, %s5563_s29, %s6820_s30, %s6820_s30, %s6819_s11  }
  0x6b   : > { %p6821_p10 = scmp.ne.s32.totalorder %s6817_s26, 0 }
  0x6d   : > { %379 = sbr.rel (%p6821_p10) target bundleno = 2302 (0x8fe), region = 52 }
  0x74   : > { %s381_s15 = sand.u32 1, %s5434_s10   ;;  %p6822_p9 = scmp.ne.s32.totalorder %s6813_s18, 0 }
  0x75   : > { %s4477_s22 = sshll.u32 %s381_s15, 3  ;;  %s382_s23 = scalar_lea.sflag [#allocation3], %s381_s15 }
  0x76   : > { %s5672_s17 = scalar_lea.vmem [#allocation2], %s4477_s22 }
  0x77   : > { %5421 = dma.done.wait (%p6822_p9), %s382_s23, 128  }
  0x78   : > { %5423 = vsyncadd (%p6822_p9), %s382_s23, 4294967168  ;;  %s390_s20 = sand.u32 1, %s5525_s13   ;;  %s4478_s12 = sshll.u32 %s381_s15, 10 }
  0x79   : > { %s391_s2 = scalar_lea.sflag [#allocation5], %s390_s20  ;;  %s5679_s29 = scalar_lea.vmem [#allocation4], %s4478_s12 }
  0x7a   : > { %5425 = dma.done.wait (%p6822_p9), %s391_s2, 17920  }
  0x7b   : > { %5427 = vsyncadd (%p6822_p9), %s391_s2, 4294949376  ;;  %s4988_s26 = smul.u32 96, %s381_s15  ;;  %p458_p8 = scmp.lt.s32.totalorder %s5525_s13, 3 }
  0x7c   : > { %p4485_p0 = scmp.ne.s32.totalorder %s5525_s13, 0 }
  0x7d   : > { %s459_s21 = scalar_select %p458_p8, %s5525_s13, 3 }
  0x7e   : > { %s5702_s15 = scalar_lea.vmem [#allocation6], %s4988_s26  ;;  %477 = sbr.rel (%p4485_p0) target bundleno = 137 (0x89), region = 68  ;;  %v478_v0 = vld [vmem:[%s6729_s0] sm:$0xff] (!%p4485_p0)  ;;  %v479_v1 = vld [vmem:[%s6729_s0 + $0x8] sm:$0xff] (!%p4485_p0)  ;;  %v480_v2 = vld [vmem:[%s6729_s0 + $0x10] sm:$0xff] (!%p4485_p0)  ;;  %v486_v3 = vlaneseq (!%p4485_p0)  ;;  %v5451_v5 = vmov (!%p4485_p0), 0.0  }
  0x7f   : > { %s4711_s19 = sshll.u32 %s459_s21, 8  ;;  %s4712_s16 = sshll.u32 %s459_s21, 9  ;;  %482 = vst [vmem:[%s6737_s8] sm:$0xff] (!%p4485_p0), %v478_v0  ;;  %483 = vst [vmem:[%s6737_s8 + $0x8] sm:$0xff] (!%p4485_p0), %v479_v1 }
  0x80   : > { %s5690_s24 = scalar_lea.vmem %s6732_s3, %s4711_s19  ;;  %s5695_s11 = scalar_lea.vmem %s6734_s5, %s4712_s16  ;;  %484 = vst [vmem:[%s6737_s8 + $0x10] sm:$0xff] (!%p4485_p0), %v480_v2  ;;  %vm488_vm0 = vcmp.lt.s32.totalorder (!%p4485_p0), %v486_v3, 256 }
  0x81   : > { %s4713_s30 = sshll.u32 %s459_s21, 4  ;;  %490 = vst.msk [vmem:[%s6738_s9] sm:$0x3] (!%p4485_p0), %vm488_vm0, %v5451_v5 }
  0x82   : > { %s5700_s23 = scalar_lea.vmem %s6736_s7, %s4713_s30 }
  0x87   : > { %v481_v4 = vld [vmem:[%s6729_s0 + $0x18] sm:$0xff] }
  0x88   : > { %485 = vst [vmem:[%s6737_s8 + $0x18] sm:$0xff] %v481_v4 }
  0x89 PF: > { %v6743_v6 = vlaneseq  ;;  %v4486_v7 = vld [vmem:[%s6730_s1 + $0x1] ss:$8 sm:$0x3]  ;;  %v5452_v29 = vmov 0   ;;  %vm4290_vm1 = vcmask 7168   ;;  %vm574_vm2 = vcmask 130048  }
  0x8a   : > { %v491_v9 = vld [vmem:[%s6737_s8] sm:$0xff]  ;;  %v492_v10 = vld [vmem:[%s6737_s8 + $0x8] sm:$0xff]  ;;  %610 = vmatprep.mubr.bf16.mxu1 %v5452_v29  ;;  %5050 = vset.pattern.permute.xlu1 %v5452_v29  ;;  %s5453_s12 = smov 127   ;;  %s5454_s2 = smov 1   ;;  %vm1009_vm5 = vcmask 1044480   ;;  %vm912_vm6 = vcmask 211968  }
  0x8b   : > { %v5736_v8 = vshrl.u32 %v6743_v6, 7  ;;  %v493_v11 = vld [vmem:[%s6737_s8 + $0x10] sm:$0xff]  ;;  %5049 = vset.pattern.permute.xlu0 %v5452_v29  ;;  %v5051_v3 = vld [vmem:[%s5672_s17] sm:$0xff]  }
  0x8c   : > { %v4487_v4 = vld [vmem:[%s6730_s1 + $0x2] ss:$8 sm:$0x3] }
  0x8d   : > { %6823 = vst [vmem:[#allocation11_spill] sm:$0xff] %v5736_v8  ;;  %v5751_v13 = vsub.s32 0, %v5736_v8  ;;  %v5754_v14 = vsub.s32 1, %v5736_v8 }
  0x8f   : > { %v494_v12 = vld [vmem:[%s6737_s8 + $0x18] sm:$0xff]  ;;  %6824 = vst [vmem:[#allocation12_spill] sm:$0xff] %v5751_v13  ;;  %6825 = vst [vmem:[#allocation13_spill] sm:$0xff] %v5754_v14  ;;  %v510_v15 = vrot.slane %v4486_v7, %v5751_v13  ;;  %v514_v16 = vrot.slane %v4486_v7, %v5754_v14  ;;  %v625_v5 = vrot.slane %v4487_v4, %v5751_v13 }
  0x90   : > { %v629_v7 = vrot.slane %v4487_v4, %v5754_v14 }
  0x91   : > { %v517_v17 = vmul.f32 %v510_v15, %v491_v9  ;;  %v518_v18 = vmul.f32 %v514_v16, %v492_v10  ;;  %v519_v19 = vmul.f32 %v510_v15, %v493_v11  ;;  %v520_v20 = vmul.f32 %v514_v16, %v494_v12 }
  0x93   : > { %v521_v21 = vadd.f32 %v518_v18, %v517_v17  ;;  %v527_v22 = vmul.f32 %v517_v17, %v491_v9  ;;  %v528_v23 = vmul.f32 %v518_v18, %v492_v10  ;;  %v529_v24 = vmul.f32 %v519_v19, %v493_v11 }
  0x94   : > { %v530_v25 = vmul.f32 %v520_v20, %v494_v12  ;;  %v524_v27 = vadd.f32 %v520_v20, %v519_v19  ;;  %v1850_v19 = vld [vmem:[%s5695_s11 + $0x108] sm:$0xff]  ;;  %v1851_v20 = vld [vmem:[%s5695_s11 + $0x110] sm:$0xff] }
  0x95   : > { %522 = vadd.xlane.f32.xlu0 %v521_v21  ;;  %v531_v26 = vadd.f32 %v528_v23, %v527_v22  ;;  %v1853_v21 = vld [vmem:[%s5695_s11 + $0x120] sm:$0xff]  ;;  %v1855_v22 = vld [vmem:[%s5695_s11 + $0x130] sm:$0xff] }
  0x96   : > { %v534_v28 = vadd.f32 %v530_v25, %v529_v24  ;;  %v1857_v23 = vld [vmem:[%s5695_s11 + $0x140] sm:$0xff]  ;;  %v1859_v24 = vld [vmem:[%s5695_s11 + $0x150] sm:$0xff] }
  0x97   : > { %532 = vadd.xlane.f32.xlu1 %v531_v26  ;;  %v1861_v25 = vld [vmem:[%s5695_s11 + $0x160] sm:$0xff]  ;;  %v1863_v26 = vld [vmem:[%s5695_s11 + $0x170] sm:$0xff] }
  0x99   : > { %525 = vadd.xlane.f32.xlu0 %v524_v27  ;;  %v1865_v27 = vld [vmem:[%s5695_s11 + $0x180] sm:$0xff] }
  0x9b   : > { %535 = vadd.xlane.f32.xlu1 %v534_v28  ;;  %v1867_v28 = vld [vmem:[%s5695_s11 + $0x190] sm:$0xff] }
 0x122   : > { %v523_v30 = vpop.xlane.xlu0 %522 }
 0x123   : > { %v537_v31 = vmul.f32 %v523_v30, %v523_v30  ;;  %v553_v52 = vsub.f32 0.0, %v523_v30  ;;  %v1869_v30 = vld [vmem:[%s5695_s11 + $0x1a0] sm:$0xff] }
 0x124   : > { %v533_v32 = vpop.xlane.xlu1 %532 }
 0x125   : > { %v539_v33 = vsub.f32 %v533_v32, %v537_v31  ;;  %v1871_v31 = vld [vmem:[%s5695_s11 + $0x1b0] sm:$0xff]  ;;  %v1873_v32 = vld [vmem:[%s5695_s11 + $0x1c0] sm:$0xff] }
 0x126   : > { %v526_v34 = vpop.xlane.xlu0 %525 }
 0x127   : > { %v541_v35 = vmax.f32 %v539_v33, 1e-06  ;;  %v538_v36 = vmul.f32 %v526_v34, %v526_v34  ;;  %v554_v53 = vsub.f32 0.0, %v526_v34  ;;  %v1875_v33 = vld [vmem:[%s5695_s11 + $0x1d0] sm:$0xff]  ;;  %v1877_v34 = vld [vmem:[%s5695_s11 + $0x1e0] sm:$0xff] }
 0x128   : > { %v536_v37 = vpop.xlane.xlu1 %535 }
 0x129   : > { %5294 = vlog2.f32 %v541_v35  ;;  %v540_v38 = vsub.f32 %v536_v37, %v538_v36  ;;  %v1879_v35 = vld [vmem:[%s5695_s11 + $0x1f0] sm:$0xff]  ;;  %v1817_v36 = vld [vmem:[%s5695_s11] sm:$0xff] }
 0x12a   : > { %v1819_v37 = vld [vmem:[%s5695_s11 + $0x10] sm:$0xff] }
 0x12b   : > { %v542_v39 = vmax.f32 %v540_v38, 1e-06  ;;  %v1821_v38 = vld [vmem:[%s5695_s11 + $0x20] sm:$0xff] }
 0x12d   : > { %5296 = vlog2.f32 %v542_v39  ;;  %v1823_v39 = vld [vmem:[%s5695_s11 + $0x30] sm:$0xff] }
 0x133   : > { %v5295_v40 = vpop.eup %5294 }
 0x134   : > { %v544_v41 = vmul.f32 0.6931472, %v5295_v40  ;;  %v1825_v40 = vld [vmem:[%s5695_s11 + $0x40] sm:$0xff] }
 0x136   : > { %v547_v42 = vmul.f32 -0.5, %v544_v41  ;;  %v1827_v41 = vld [vmem:[%s5695_s11 + $0x50] sm:$0xff] }
 0x137   : > { %v5297_v43 = vpop.eup %5296 }
 0x138   : > { %v549_v44 = vmul.f32 1.442695, %v547_v42  ;;  %v546_v45 = vmul.f32 0.6931472, %v5297_v43  ;;  %v4291_v48 = vsel %vm4290_vm1, %v547_v42, 0.0  ;;  %v1829_v42 = vld [vmem:[%s5695_s11 + $0x60] sm:$0xff] }
 0x139   : > { %v1831_v43 = vld [vmem:[%s5695_s11 + $0x70] sm:$0xff] }
 0x13a   : > { %5298 = vpow2.f32 %v549_v44  ;;  %v548_v46 = vmul.f32 -0.5, %v546_v45  ;;  %v1833_v44 = vld [vmem:[%s5695_s11 + $0x80] sm:$0xff]  ;;  %v1835_v45 = vld [vmem:[%s5695_s11 + $0x90] sm:$0xff] }
 0x13c   : > { %v551_v47 = vmul.f32 1.442695, %v548_v46  ;;  %v4292_v49 = vsel %vm4290_vm1, %v548_v46, 0.0  ;;  %v5821_v46 = vand.u32 127, %v6743_v6 }
 0x13d   : > { %v5761_v50 = vadd.f32 %v4292_v49, %v4291_v48  ;;  %v4488_v48 = vld [vmem:[%s6730_s1 + $0x3] ss:$8 sm:$0x3] }
 0x13e   : > { %5300 = vpow2.f32 %v551_v47  ;;  %6828 = vst [vmem:[#allocation16_spill] sm:$0xff] %v5821_v46  ;;  %v1837_v47 = vld [vmem:[%s5695_s11 + $0xa0] sm:$0xff]  ;;  %vm642_vm3 = vcmp.lt.s32.totalorder %v5821_v46, 1  ;;  %vm662_vm4 = vcmp.lt.s32.totalorder %v5821_v46, 127 }
 0x144   : > { %v5299_v51 = vpop.eup %5298 }
 0x145   : > { %v555_v54 = vmul.f32 %v5299_v51, %v553_v52  ;;  %v558_v55 = vmul.f32 %v5299_v51, %v492_v10  ;;  %v557_v56 = vmul.f32 %v5299_v51, %v491_v9  ;;  %v5829_v51 = vrot.slane %v4488_v48, %v5751_v13 }
 0x146   : > { %v5832_v52 = vrot.slane %v4488_v48, %v5754_v14 }
 0x147   : > { %v562_v61 = vadd.f32 %v558_v55, %v555_v54  ;;  %v561_v63 = vadd.f32 %v557_v56, %v555_v54  ;;  %6829 = vst [vmem:[#allocation17_spill] sm:$0xff] %v5829_v51  ;;  %v4489_v54 = vld [vmem:[%s6730_s1 + $0x4] ss:$8 sm:$0x3] }
 0x148   : > { %v5301_v57 = vpop.eup %5300  ;;  %6830 = vst [vmem:[#allocation18_spill] sm:$0xff] %v5832_v52 }
 0x149   : > { %v556_v58 = vmul.f32 %v5301_v57, %v554_v53  ;;  %v560_v59 = vmul.f32 %v5301_v57, %v494_v12  ;;  %v559_v60 = vmul.f32 %v5301_v57, %v493_v11  ;;  %v1839_v53 = vld [vmem:[%s5695_s11 + $0xb0] sm:$0xff] }
 0x14b   : > { %v564_v62 = vadd.f32 %v560_v59, %v556_v58  ;;  %v563_v0 = vadd.f32 %v559_v60, %v556_v58  ;;  %v504_v59 = vld [vmem:[%s6730_s1] sm:$0x60]  ;;  %v505_v60 = vld [vmem:[%s6730_s1 + $0x8] sm:$0x60] }
 0x14c   : > { %v681_v4 = vrot.slane %v505_v60, 5 }
 0x14d   : > { %v568_v1 = vpack.c.bf16 %v564_v62, %v562_v61  ;;  %v567_v2 = vpack.c.bf16 %v563_v0, %v561_v63  ;;  %v5852_v63 = vrot.slane %v4489_v54, %v5751_v13  ;;  %v5855_v0 = vrot.slane %v4489_v54, %v5754_v14  ;;  %v5063_v54 = vld [vmem:[%s5690_s24 + $0x58] sm:$0xff]  }
 0x14f   : > { %578 = vmatprep.subr.bf16.mxu1 %v568_v1  ;;  %6831 = vst [vmem:[#allocation19_spill] sm:$0xff] %v5852_v63  ;;  %6832 = vst [vmem:[#allocation20_spill] sm:$0xff] %v5855_v0  ;;  %v1841_v1 = vld [vmem:[%s5695_s11 + $0xc0] sm:$0xff] }
 0x150   : > { %579 = vmatpush1.bf16.msra.mxu1 %v567_v2 }
 0x153   : > { %4491 = vmatmul.mubr.msk.bf16.vlgmr.msra.gmra.mrb[0].mxu1 %vm574_vm2, %v5051_v3  ;;  %v680_v3 = vrot.slane %v504_v59, 5  ;;  %v5065_v59 = vld [vmem:[%s5690_s24 + $0x68] sm:$0xff]  }
 0x154   : > { %1048 = vmatprep.mubr.bf16.mxu1 %v5452_v29 }
 0x226   : > { %v612_v9 = vpop.f32.mrb[0].mxu1 }
 0x227   : > { %v5770_v10 = vmul.f32 %v625_v5, %v612_v9  ;;  %v614_v11 = vpop.f32.mrb[1].mxu1 }
 0x228   : > { %v5772_v12 = vmul.f32 %v629_v7, %v614_v11  ;;  %v616_v15 = vpop.f32.mrb[2].mxu1 }
 0x229   : > { %6826 = vst [vmem:[#allocation14_spill] sm:$0xff] %v5770_v10  ;;  %v5774_v16 = vmul.f32 %v625_v5, %v616_v15  ;;  %v618_v17 = vpop.f32.mrb[3].mxu1 }
 0x22a   : > { %6827 = vst [vmem:[#allocation15_spill] sm:$0xff] %v5772_v12  ;;  %v5776_v18 = vmul.f32 %v629_v7, %v618_v17 }
 0x22b   : > { %4271 = vst [vmem:[%s6737_s8 + $0x10] sm:$0xff] %v5774_v16  ;;  %658 = vrot.lane.b32.xlu1 %v5774_v16, %s5453_s12  ;;  %636 = vrot.lane.b32.xlu0 %v5774_v16, %s5454_s2 }
 0x22c   : > { %4272 = vst [vmem:[%s6737_s8 + $0x18] sm:$0xff] %v5776_v18 }
 0x22f   : > { %638 = vrot.lane.b32.xlu1 %v5776_v18, %s5454_s2 }
 0x233   : > { %660 = vrot.lane.b32.xlu1 %v5776_v18, %s5453_s12 }
 0x237   : > { %2048 = vperm.xlu1 %5050, %v1850_v19  }
 0x23b   : > { %2053 = vperm.xlu1 %5050, %v1851_v20  }
 0x23f   : > { %2063 = vperm.xlu1 %5050, %v1853_v21   ;;  %v5052_v21 = vld [vmem:[%s5690_s24] sm:$0xff]  }
 0x243   : > { %2073 = vperm.xlu1 %5050, %v1855_v22   ;;  %v1845_v22 = vld [vmem:[%s5695_s11 + $0xe0] sm:$0xff] }
 0x247   : > { %2083 = vperm.xlu1 %5050, %v1857_v23   ;;  %v1847_v23 = vld [vmem:[%s5695_s11 + $0xf0] sm:$0xff] }
 0x24b   : > { %2093 = vperm.xlu1 %5050, %v1859_v24   ;;  %v5053_v24 = vld [vmem:[%s5690_s24 + $0x8] sm:$0xff]  }
 0x24f   : > { %2103 = vperm.xlu1 %5050, %v1861_v25  }
 0x253   : > { %2113 = vperm.xlu1 %5050, %v1863_v26  }
 0x257   : > { %2123 = vperm.xlu1 %5050, %v1865_v27   ;;  %v5054_v27 = vld [vmem:[%s5690_s24 + $0x10] sm:$0xff]  }
 0x25b   : > { %2133 = vperm.xlu1 %5050, %v1867_v28  }
 0x25f   : > { %2143 = vperm.xlu1 %5050, %v1869_v30  }
 0x263   : > { %2153 = vperm.xlu1 %5050, %v1871_v31   ;;  %v5055_v31 = vld [vmem:[%s5690_s24 + $0x18] sm:$0xff]  }
 0x267   : > { %2163 = vperm.xlu1 %5050, %v1873_v32  }
 0x26b   : > { %2173 = vperm.xlu1 %5050, %v1875_v33  }
 0x26f   : > { %2183 = vperm.xlu1 %5050, %v1877_v34   ;;  %v5056_v34 = vld [vmem:[%s5690_s24 + $0x20] sm:$0xff]  }
 0x273   : > { %2193 = vperm.xlu1 %5050, %v1879_v35  }
 0x277   : > { %1883 = vperm.xlu1 %5050, %v1817_v36  }
 0x27b   : > { %1893 = vperm.xlu1 %5050, %v1819_v37   ;;  %v5057_v37 = vld [vmem:[%s5690_s24 + $0x28] sm:$0xff]  }
 0x27f   : > { %1903 = vperm.xlu1 %5050, %v1821_v38  }
 0x283   : > { %1913 = vperm.xlu1 %5050, %v1823_v39  }
 0x287   : > { %1923 = vperm.xlu1 %5050, %v1825_v40   ;;  %v5058_v40 = vld [vmem:[%s5690_s24 + $0x30] sm:$0xff]  }
 0x28b   : > { %1933 = vperm.xlu1 %5050, %v1827_v41  }
 0x28f   : > { %1943 = vperm.xlu1 %5050, %v1829_v42   ;;  %v5059_v42 = vld [vmem:[%s5690_s24 + $0x38] sm:$0xff]  }
 0x293   : > { %1953 = vperm.xlu1 %5050, %v1831_v43  }
 0x297   : > { %1963 = vperm.xlu1 %5050, %v1833_v44  }
 0x29b   : > { %1973 = vperm.xlu1 %5050, %v1835_v45  }
 0x29d   : > { %v659_v49 = vpop.permute.xlu1 %658  ;;  %v637_v55 = vpop.permute.xlu0 %636 }
 0x29f   : > { %1983 = vperm.xlu1 %5050, %v1837_v47   ;;  %v5061_v47 = vld [vmem:[%s5690_s24 + $0x48] sm:$0xff]  }
 0x2a1   : > { %v639_v56 = vpop.permute.xlu1 %638 }
 0x2a2   : > { %v643_v57 = vsel %vm642_vm3, %v637_v55, %v639_v56  ;;  %v644_v58 = vsel %vm642_vm3, %v639_v56, %v637_v55 }
 0x2a3   : > { %v656_v61 = vmul.f32 %v5829_v51, %v644_v58  ;;  %v657_v62 = vmul.f32 %v5832_v52, %v643_v57  ;;  %1993 = vperm.xlu1 %5050, %v1839_v53   ;;  %v5064_v57 = vld [vmem:[%s5690_s24 + $0x60] sm:$0xff]  }
 0x2a5   : > { %v684_v2 = vpack.c.bf16 %v5774_v16, %v656_v61  ;;  %v661_v5 = vpop.permute.xlu1 %660  ;;  %v685_v7 = vpack.c.bf16 %v5776_v18, %v657_v62  ;;  %v1843_v16 = vld [vmem:[%s5695_s11 + $0xd0] sm:$0xff] }
 0x2a6   : > { %v663_v9 = vsel %vm662_vm4, %v659_v49, %v661_v5  ;;  %v664_v11 = vsel %vm662_vm4, %v661_v5, %v659_v49  ;;  %v5062_v49 = vld [vmem:[%s5690_s24 + $0x50] sm:$0xff]  }
 0x2a7   : > { %v676_v15 = vmul.f32 %v5852_v63, %v663_v9  ;;  %v677_v17 = vmul.f32 %v5855_v0, %v664_v11  ;;  %2003 = vperm.xlu1 %5050, %v1841_v1   ;;  %1016 = vmatprep.subr.bf16.mxu1 %v685_v7  ;;  %v5066_v61 = vld [vmem:[%s5690_s24 + $0x70] sm:$0xff]   ;;  %v5069_v7 = vld [vmem:[%s5690_s24 + $0x88] sm:$0xff]  }
 0x2a8   : > { %1017 = vmatpush1.bf16.msra.mxu1 %v684_v2  ;;  %v5067_v2 = vld [vmem:[%s5690_s24 + $0x78] sm:$0xff]  }
 0x2a9   : > { %v686_v19 = vpack.c.bf16 %v680_v3, %v676_v15  ;;  %v687_v18 = vpack.c.bf16 %v681_v4, %v677_v17  ;;  %v5068_v4 = vld [vmem:[%s5690_s24 + $0x80] sm:$0xff]   ;;  %v5070_v15 = vld [vmem:[%s5690_s24 + $0x90] sm:$0xff]   ;;  %v5264_v0 = vld [vmem:[%s5679_s29 + $0x38c] ss:$16 sps:$4 sm:$0xff]  }
 0x2ab   : > { %2013 = vperm.xlu1 %5050, %v1843_v16   ;;  %4524 = vmatprep.subr.msk.bf16.mxu1 %vm1009_vm5, %v687_v18  ;;  %v1011_v20 = vsel %vm1009_vm5, %v686_v19, 0  ;;  %v5071_v16 = vld [vmem:[%s5690_s24 + $0x98] sm:$0xff]   ;;  %v5072_v18 = vld [vmem:[%s5690_s24 + $0xa0] sm:$0xff]  }
 0x2ac   : > { %1019 = vmatpush1.bf16.msra.mxu1 %v1011_v20 }
 0x2af   : > { %2023 = vperm.xlu1 %5050, %v1845_v22   ;;  %4525 = vmatmul.mubr.msk.bf16.vlgmr.msra.gmra.mrb[4].mxu1 %vm912_vm6, %v5052_v21  ;;  %v5073_v22 = vld [vmem:[%s5690_s24 + $0xa8] sm:$0xff]  }
 0x2b0   : > { %1058 = vmatprep.mubr.bf16.mxu1 %v5452_v29 }
 0x2b3   : > { %2033 = vperm.xlu1 %5050, %v1847_v23  }
 0x2b6   : > { %v5873_v25 = vpop.permute.xlu1 %2048 }
 0x2b7   : > { %4526 = vmatmul.mubr.msk.bf16.gmra.mrb[8].mxu1 %vm912_vm6, %v5053_v24  ;;  %v5074_v24 = vld [vmem:[%s5690_s24 + $0xb0] sm:$0xff]  }
 0x2b8   : > { %1068 = vmatprep.mubr.bf16.mxu1 %v5452_v29 }
 0x2ba   : > { %v5877_v26 = vpop.permute.xlu1 %2053 }
 0x2be   : > { %v5880_v28 = vpop.permute.xlu1 %2063 }
 0x2bf   : > { %4527 = vmatmul.mubr.msk.bf16.gmra.mrb[12].mxu1 %vm912_vm6, %v5054_v27 }
 0x2c0   : > { %1078 = vmatprep.mubr.bf16.mxu1 %v5452_v29 }
 0x2c2   : > { %v5884_v30 = vpop.permute.xlu1 %2073 }
 0x2c6   : > { %v5887_v32 = vpop.permute.xlu1 %2083 }
 0x2c7   : > { %4528 = vmatmul.mubr.msk.bf16.gmra.mrb[16].mxu1 %vm912_vm6, %v5055_v31  ;;  %v5075_v31 = vld [vmem:[%s5690_s24 + $0xb8] sm:$0xff]  }
 0x2c8   : > { %1088 = vmatprep.mubr.bf16.mxu1 %v5452_v29 }
 0x2ca   : > { %v5891_v33 = vpop.permute.xlu1 %2093 }
 0x2ce   : > { %v5894_v35 = vpop.permute.xlu1 %2103 }
 0x2cf   : > { %4529 = vmatmul.mubr.msk.bf16.gmra.mrb[20].mxu1 %vm912_vm6, %v5056_v34 }
 0x2d0   : > { %1098 = vmatprep.mubr.bf16.mxu1 %v5452_v29 }
 0x2d2   : > { %v5898_v36 = vpop.permute.xlu1 %2113 }
 0x2d6   : > { %v5901_v38 = vpop.permute.xlu1 %2123 }
 0x2d7   : > { %4294 = vadd.xlane.f32.xlu1 %v5761_v50  ;;  %4530 = vmatmul.mubr.msk.bf16.gmra.mrb[24].mxu1 %vm912_vm6, %v5057_v37  ;;  %v5060_v50 = vld [vmem:[%s5690_s24 + $0x40] sm:$0xff]  }
 0x2d8   : > { %1108 = vmatprep.mubr.bf16.mxu1 %v5452_v29 }
 0x2da   : > { %v5906_v39 = vpop.permute.xlu1 %2133 }
 0x2de   : > { %v5911_v41 = vpop.permute.xlu1 %2143 }
 0x2df   : > { %4531 = vmatmul.mubr.msk.bf16.gmra.mrb[28].mxu1 %vm912_vm6, %v5058_v40 }
 0x2e0   : > { %1118 = vmatprep.mubr.bf16.mxu1 %v5452_v29 }
 0x2e2   : > { %v5914_v43 = vpop.permute.xlu1 %2153 }
 0x2e6   : > { %v5919_v44 = vpop.permute.xlu1 %2163 }
 0x2e7   : > { %4532 = vmatmul.mubr.msk.bf16.gmra.mrb[32].mxu1 %vm912_vm6, %v5059_v42 }
 0x2e8   : > { %1128 = vmatprep.mubr.bf16.mxu1 %v5452_v29 }
 0x2ea   : > { %v5923_v45 = vpop.permute.xlu1 %2173 }
 0x2eb   : > { %6833 = vst [vmem:[#allocation21_spill] sm:$0xff] %v5923_v45 }
 0x2ee   : > { %v5928_v48 = vpop.permute.xlu1 %2183 }
 0x2ef   : > { %4533 = vmatmul.mubr.msk.bf16.gmra.mrb[36].mxu1 %vm912_vm6, %v5060_v50  ;;  %6834 = vst [vmem:[#allocation22_spill] sm:$0xff] %v5928_v48 }
 0x2f0   : > { %1138 = vmatprep.mubr.bf16.mxu1 %v5452_v29 }
 0x2f2   : > { %v5931_v53 = vpop.permute.xlu1 %2193 }
 0x2f3   : > { %6835 = vst [vmem:[#allocation23_spill] sm:$0xff] %v5931_v53 }
 0x2f6   : > { %v5936_v55 = vpop.permute.xlu1 %1883 }
 0x2f7   : > { %4534 = vmatmul.mubr.msk.bf16.gmra.mrb[40].mxu1 %vm912_vm6, %v5061_v47  ;;  %v5076_v47 = vld [vmem:[%s5690_s24 + $0xc0] sm:$0xff]  }
 0x2f8   : > { %1148 = vmatprep.mubr.bf16.mxu1 %v5452_v29 }
 0x2fa   : > { %v5940_v56 = vpop.permute.xlu1 %1893 }
 0x2fe   : > { %v5945_v58 = vpop.permute.xlu1 %1903 }
 0x2ff   : > { %4535 = vmatmul.mubr.msk.bf16.gmra.mrb[44].mxu1 %vm912_vm6, %v5062_v49 }
 0x300   : > { %1158 = vmatprep.mubr.bf16.mxu1 %v5452_v29 }
 0x302   : > { %v5948_v60 = vpop.permute.xlu1 %1913 }
 0x306   : > { %v5953_v62 = vpop.permute.xlu1 %1923 }
 0x307   : > { %4536 = vmatmul.mubr.msk.bf16.gmra.mrb[48].mxu1 %vm912_vm6, %v5063_v54 }
 0x308   : > { %1168 = vmatprep.mubr.bf16.mxu1 %v5452_v29 }
 0x30a   : > { %v5957_v1 = vpop.permute.xlu1 %1933 }
 0x30e   : > { %v5961_v3 = vpop.permute.xlu1 %1943 }
 0x30f   : > { %4537 = vmatmul.mubr.msk.bf16.gmra.mrb[52].mxu1 %vm912_vm6, %v5064_v57  ;;  %v5077_v57 = vld [vmem:[%s5690_s24 + $0xc8] sm:$0xff]  }
 0x310   : > { %1178 = vmatprep.mubr.bf16.mxu1 %v5452_v29 }
 0x312   : > { %v5965_v5 = vpop.permute.xlu1 %1953 }
 0x316   : > { %v5970_v9 = vpop.permute.xlu1 %1963 }
 0x317   : > { %4538 = vmatmul.mubr.msk.bf16.gmra.mrb[56].mxu1 %vm912_vm6, %v5065_v59  ;;  %v5078_v59 = vld [vmem:[%s5690_s24 + $0xd0] sm:$0xff]  }
 0x318   : > { %1188 = vmatprep.mubr.bf16.mxu1 %v5452_v29 }
 0x31a   : > { %v5974_v11 = vpop.permute.xlu1 %1973 }
 0x31e   : > { %v5978_v17 = vpop.permute.xlu1 %1983 }
 0x31f   : > { %4539 = vmatmul.mubr.msk.bf16.gmra.mrb[60].mxu1 %vm912_vm6, %v5066_v61 }
 0x320   : > { %1198 = vmatprep.mubr.bf16.mxu1 %v5452_v29 }
 0x322   : > { %v5982_v19 = vpop.permute.xlu1 %1993 }
 0x326   : > { %v5987_v20 = vpop.permute.xlu1 %2003 }
 0x327   : > { %4540 = vmatmul.mubr.msk.bf16.gmra.mrb[64].mxu1 %vm912_vm6, %v5067_v2 }
 0x328   : > { %1208 = vmatprep.mubr.bf16.mxu1 %v5452_v29 }
 0x32a   : > { %v5991_v21 = vpop.permute.xlu1 %2013 }
 0x32e   : > { %v5995_v23 = vpop.permute.xlu1 %2023 }
 0x32f   : > { %4541 = vmatmul.mubr.msk.bf16.gmra.mrb[68].mxu1 %vm912_vm6, %v5068_v4 }
 0x330   : > { %1218 = vmatprep.mubr.bf16.mxu1 %v5452_v29 }
 0x332   : > { %v5999_v27 = vpop.permute.xlu1 %2033 }
 0x337   : > { %4542 = vmatmul.mubr.msk.bf16.gmra.mrb[72].mxu1 %vm912_vm6, %v5069_v7  ;;  %v5079_v7 = vld [vmem:[%s5690_s24 + $0xd8] sm:$0xff]  }
 0x338   : > { %1228 = vmatprep.mubr.bf16.mxu1 %v5452_v29 }
 0x33f   : > { %4543 = vmatmul.mubr.msk.bf16.gmra.mrb[76].mxu1 %vm912_vm6, %v5070_v15 }
 0x340   : > { %1238 = vmatprep.mubr.bf16.mxu1 %v5452_v29 }
 0x347   : > { %4544 = vmatmul.mubr.msk.bf16.gmra.mrb[80].mxu1 %vm912_vm6, %v5071_v16 }
 0x348   : > { %1248 = vmatprep.mubr.bf16.mxu1 %v5452_v29 }
 0x34f   : > { %4545 = vmatmul.mubr.msk.bf16.gmra.mrb[84].mxu1 %vm912_vm6, %v5072_v18 }
 0x350   : > { %1258 = vmatprep.mubr.bf16.mxu1 %v5452_v29 }
 0x357   : > { %4546 = vmatmul.mubr.msk.bf16.gmra.mrb[88].mxu1 %vm912_vm6, %v5073_v22 }
 0x358   : > { %1268 = vmatprep.mubr.bf16.mxu1 %v5452_v29 }
 0x35f   : > { %4547 = vmatmul.mubr.msk.bf16.gmra.mrb[92].mxu1 %vm912_vm6, %v5074_v24 }
 0x360   : > { %1278 = vmatprep.mubr.bf16.mxu1 %v5452_v29 }
 0x364   : > { %v4295_v34 = vpop.xlane.xlu1 %4294 }
 0x365   : > { %v4296_v37 = vrot.slane %v4295_v34, 4 }
 0x367   : > { %v4297_v40 = vadd.f32 %v4296_v37, %v4295_v34  ;;  %4548 = vmatmul.mubr.msk.bf16.gmra.mrb[96].mxu1 %vm912_vm6, %v5075_v31  ;;  %v5082_v31 = vld [vmem:[%s5679_s29 + $0x4] ss:$16 sps:$4 sm:$0xff]  }
 0x368   : > { %1288 = vmatprep.mubr.bf16.mxu1 %v5452_v29  ;;  %2873 = vmatprep.mubr.bf16.mxu0 %v5082_v31 }
 0x369   : > { %v4298_v42 = vrot.slane %v4297_v40, 2 }
 0x36b   : > { %v4299_v50 = vadd.f32 %v4298_v42, %v4297_v40 }
 0x36d   : > { %v4300_v49 = vrot.slane %v4299_v50, 1 }
 0x36f   : > { %v4301_v54 = vadd.f32 %v4300_v49, %v4299_v50  ;;  %4549 = vmatmul.mubr.msk.bf16.gmra.mrb[100].mxu1 %vm912_vm6, %v5076_v47 }
 0x370   : > { %1298 = vmatprep.mubr.bf16.mxu1 %v5452_v29 }
 0x371   : > { %4989 = vpush %v4301_v54 }
 0x377   : > { %4550 = vmatmul.mubr.msk.bf16.gmra.mrb[104].mxu1 %vm912_vm6, %v5077_v57 }
 0x378   : > { %1308 = vmatprep.mubr.bf16.mxu1 %v5452_v29 }
 0x37f   : > { %4551 = vmatmul.mubr.msk.bf16.gmra.mrb[108].mxu1 %vm912_vm6, %v5078_v59  ;;  %v5083_v59 = vld [vmem:[%s5690_s24 + $0xe0] sm:$0xff]  }
 0x380   : > { %1318 = vmatprep.mubr.bf16.mxu1 %v5452_v29 }
 0x382   : > { %v1050_v61 = vpop.f32.mrb[4].mxu1 }
 0x383   : > { %v1369_v2 = vmul.f32 0.2, %v1050_v61  ;;  %v1052_v4 = vpop.f32.mrb[5].mxu1 }
 0x384   : > { %v1370_v15 = vmul.f32 0.2, %v1052_v4  ;;  %v1054_v16 = vpop.f32.mrb[6].mxu1 }
 0x385   : > { %v1371_v18 = vmul.f32 0.2, %v1054_v16  ;;  %v1056_v22 = vpop.f32.mrb[7].mxu1  ;;  %v1497_v34 = vmax.f32 %v1050_v61, %v1369_v2 }
 0x386   : > { %v1372_v24 = vmul.f32 0.2, %v1056_v22  ;;  %v1498_v40 = vmax.f32 %v1052_v4, %v1370_v15 }
 0x387   : > { %v1499_v37 = vmax.f32 %v1054_v16, %v1371_v18  ;;  %4552 = vmatmul.mubr.msk.bf16.gmra.mrb[112].mxu1 %vm912_vm6, %v5079_v7 }
 0x388   : > { %v1500_v42 = vmax.f32 %v1056_v22, %v1372_v24  ;;  %1328 = vmatprep.mubr.bf16.mxu1 %v5452_v29 }
 0x389   : > { %v1753_v50 = vpack.c.bf16 %v1499_v37, %v1497_v34  ;;  %v5087_v37 = vld [vmem:[%s5690_s24 + $0xe8] sm:$0xff]  }
 0x38a   : > { %v1060_v47 = vpop.f32.mrb[8].mxu1  ;;  %v1754_v49 = vpack.c.bf16 %v1500_v42, %v1498_v40 }
 0x38b   : > { %v1373_v54 = vmul.f32 0.2, %v1060_v47  ;;  %v1062_v57 = vpop.f32.mrb[9].mxu1 }
 0x38c   : > { %v1374_v6 = vmul.f32 0.2, %v1062_v57  ;;  %v1064_v8 = vpop.f32.mrb[10].mxu1  ;;  %2841 = vmatprep.subr.bf16.mxu0 %v1754_v49 }
 0x38d   : > { %v1375_v14 = vmul.f32 0.2, %v1064_v8  ;;  %v1066_v61 = vpop.f32.mrb[11].mxu1  ;;  %2842 = vmatpush1.bf16.msra.mxu0 %v1753_v50  ;;  %v1501_v7 = vmax.f32 %v1060_v47, %v1373_v54 }
 0x38e   : > { %v1376_v2 = vmul.f32 0.2, %v1066_v61  ;;  %v1502_v15 = vmax.f32 %v1062_v57, %v1374_v6 }
 0x38f   : > { %v1503_v4 = vmax.f32 %v1064_v8, %v1375_v14  ;;  %4553 = vmatmul.mubr.msk.bf16.gmra.mrb[116].mxu1 %vm912_vm6, %v5083_v59 }
 0x390   : > { %v1504_v16 = vmax.f32 %v1066_v61, %v1376_v2  ;;  %1338 = vmatprep.mubr.bf16.mxu1 %v5452_v29 }
 0x391   : > { %v1755_v18 = vpack.c.bf16 %v1503_v4, %v1501_v7  ;;  %v5091_v4 = vld [vmem:[%s5690_s24 + $0xf0] sm:$0xff]  }
 0x392   : > { %v1756_v22 = vpack.c.bf16 %v1504_v16, %v1502_v15  ;;  %v1070_v24 = vpop.f32.mrb[12].mxu1 }
 0x393   : > { %v1377_v31 = vmul.f32 0.2, %v1070_v24  ;;  %v1072_v34 = vpop.f32.mrb[13].mxu1 }
 0x394   : > { %v1378_v40 = vmul.f32 0.2, %v1072_v34  ;;  %v1074_v42 = vpop.f32.mrb[14].mxu1  ;;  %2843 = vmatprep.subr.bf16.mxu0 %v1756_v22 }
 0x395   : > { %v1379_v50 = vmul.f32 0.2, %v1074_v42  ;;  %v1076_v49 = vpop.f32.mrb[15].mxu1  ;;  %2844 = vmatpush1.bf16.msra.mxu0 %v1755_v18  ;;  %v1505_v14 = vmax.f32 %v1070_v24, %v1377_v31 }
 0x396   : > { %v1380_v8 = vmul.f32 0.2, %v1076_v49  ;;  %v1506_v6 = vmax.f32 %v1072_v34, %v1378_v40 }
 0x397   : > { %v1507_v47 = vmax.f32 %v1074_v42, %v1379_v50  ;;  %4554 = vmatmul.mubr.msk.bf16.gmra.mrb[120].mxu1 %vm912_vm6, %v5087_v37 }
 0x398   : > { %v1508_v54 = vmax.f32 %v1076_v49, %v1380_v8  ;;  %1348 = vmatprep.mubr.bf16.mxu1 %v5452_v29 }
 0x399   : > { %v1757_v57 = vpack.c.bf16 %v1507_v47, %v1505_v14  ;;  %v5095_v47 = vld [vmem:[%s5690_s24 + $0xf8] sm:$0xff]  }
 0x39a   : > { %v1758_v59 = vpack.c.bf16 %v1508_v54, %v1506_v6  ;;  %v1080_v61 = vpop.f32.mrb[16].mxu1 }
 0x39b   : > { %v1381_v2 = vmul.f32 0.2, %v1080_v61  ;;  %v1082_v7 = vpop.f32.mrb[17].mxu1 }
 0x39c   : > { %v1382_v15 = vmul.f32 0.2, %v1082_v7  ;;  %v1084_v16 = vpop.f32.mrb[18].mxu1  ;;  %2845 = vmatprep.subr.bf16.mxu0 %v1758_v59 }
 0x39d   : > { %v1383_v18 = vmul.f32 0.2, %v1084_v16  ;;  %v1086_v22 = vpop.f32.mrb[19].mxu1  ;;  %2846 = vmatpush1.bf16.msra.mxu0 %v1757_v57  ;;  %v1509_v31 = vmax.f32 %v1080_v61, %v1381_v2 }
 0x39e   : > { %v1384_v24 = vmul.f32 0.2, %v1086_v22  ;;  %v1510_v34 = vmax.f32 %v1082_v7, %v1382_v15 }
 0x39f   : > { %v1511_v37 = vmax.f32 %v1084_v16, %v1383_v18  ;;  %4555 = vmatmul.mubr.msk.bf16.gmra.mrb[124].mxu1 %vm912_vm6, %v5091_v4 }
 0x3a0   : > { %v1512_v40 = vmax.f32 %v1086_v22, %v1384_v24  ;;  %1358 = vmatprep.mubr.bf16.mxu1 %v5452_v29 }
 0x3a1   : > { %v1759_v42 = vpack.c.bf16 %v1511_v37, %v1509_v31 }
 0x3a2   : > { %v1760_v50 = vpack.c.bf16 %v1512_v40, %v1510_v34  ;;  %v1090_v49 = vpop.f32.mrb[20].mxu1 }
 0x3a3   : > { %v1385_v8 = vmul.f32 0.2, %v1090_v49  ;;  %v1092_v14 = vpop.f32.mrb[21].mxu1 }
 0x3a4   : > { %v1386_v6 = vmul.f32 0.2, %v1092_v14  ;;  %v1094_v54 = vpop.f32.mrb[22].mxu1  ;;  %2847 = vmatprep.subr.bf16.mxu0 %v1760_v50 }
 0x3a5   : > { %v1387_v59 = vmul.f32 0.2, %v1094_v54  ;;  %v1096_v57 = vpop.f32.mrb[23].mxu1  ;;  %2848 = vmatpush1.bf16.msra.mxu0 %v1759_v42  ;;  %v1513_v2 = vmax.f32 %v1090_v49, %v1385_v8 }
 0x3a6   : > { %v1388_v61 = vmul.f32 0.2, %v1096_v57  ;;  %v1514_v7 = vmax.f32 %v1092_v14, %v1386_v6 }
 0x3a7   : > { %v1515_v16 = vmax.f32 %v1094_v54, %v1387_v59  ;;  %4556 = vmatmul.mubr.msk.bf16.gmra.mrb[128].mxu1 %vm912_vm6, %v5095_v47 }
 0x3a8   : > { %v1516_v4 = vmax.f32 %v1096_v57, %v1388_v61 }
 0x3a9   : > { %v1761_v29 = vpack.c.bf16 %v1515_v16, %v1513_v2 }
 0x3aa   : > { %v1762_v15 = vpack.c.bf16 %v1516_v4, %v1514_v7  ;;  %v1100_v18 = vpop.f32.mrb[24].mxu1 }
 0x3ab   : > { %v1389_v22 = vmul.f32 0.2, %v1100_v18  ;;  %v1102_v24 = vpop.f32.mrb[25].mxu1 }
 0x3ac   : > { %v1390_v31 = vmul.f32 0.2, %v1102_v24  ;;  %v1104_v37 = vpop.f32.mrb[26].mxu1  ;;  %2849 = vmatprep.subr.bf16.mxu0 %v1762_v15 }
 0x3ad   : > { %v1391_v34 = vmul.f32 0.2, %v1104_v37  ;;  %v1106_v40 = vpop.f32.mrb[27].mxu1  ;;  %2850 = vmatpush1.bf16.msra.mxu0 %v1761_v29  ;;  %v1517_v42 = vmax.f32 %v1100_v18, %v1389_v22 }
 0x3ae   : > { %v1392_v50 = vmul.f32 0.2, %v1106_v40  ;;  %v1518_v49 = vmax.f32 %v1102_v24, %v1390_v31 }
 0x3af   : > { %v1519_v13 = vmax.f32 %v1104_v37, %v1391_v34 }
 0x3b0   : > { %v1520_v8 = vmax.f32 %v1106_v40, %v1392_v50 }
 0x3b1   : > { %v1763_v54 = vpack.c.bf16 %v1519_v13, %v1517_v42 }
 0x3b2   : > { %v1764_v47 = vpack.c.bf16 %v1520_v8, %v1518_v49  ;;  %v1110_v14 = vpop.f32.mrb[28].mxu1 }
 0x3b3   : > { %v1393_v6 = vmul.f32 0.2, %v1110_v14  ;;  %v1112_v59 = vpop.f32.mrb[29].mxu1 }
 0x3b4   : > { %v1394_v57 = vmul.f32 0.2, %v1112_v59  ;;  %v1114_v61 = vpop.f32.mrb[30].mxu1  ;;  %2851 = vmatprep.subr.bf16.mxu0 %v1764_v47 }
 0x3b5   : > { %v1395_v2 = vmul.f32 0.2, %v1114_v61  ;;  %v1116_v16 = vpop.f32.mrb[31].mxu1  ;;  %2852 = vmatpush1.bf16.msra.mxu0 %v1763_v54  ;;  %v1521_v4 = vmax.f32 %v1110_v14, %v1393_v6 }
 0x3b6   : > { %v1396_v7 = vmul.f32 0.2, %v1116_v16  ;;  %v1522_v29 = vmax.f32 %v1112_v59, %v1394_v57 }
 0x3b7   : > { %v1523_v15 = vmax.f32 %v1114_v61, %v1395_v2 }
 0x3b8   : > { %v1524_v12 = vmax.f32 %v1116_v16, %v1396_v7 }
 0x3b9   : > { %v1765_v18 = vpack.c.bf16 %v1523_v15, %v1521_v4 }
 0x3ba   : > { %v1766_v22 = vpack.c.bf16 %v1524_v12, %v1522_v29  ;;  %v1120_v24 = vpop.f32.mrb[32].mxu1 }
 0x3bb   : > { %v1397_v31 = vmul.f32 0.2, %v1120_v24  ;;  %v1122_v13 = vpop.f32.mrb[33].mxu1 }
 0x3bc   : > { %v1398_v37 = vmul.f32 0.2, %v1122_v13  ;;  %v1124_v34 = vpop.f32.mrb[34].mxu1  ;;  %2853 = vmatprep.subr.bf16.mxu0 %v1766_v22 }
 0x3bd   : > { %v1399_v40 = vmul.f32 0.2, %v1124_v34  ;;  %v1126_v50 = vpop.f32.mrb[35].mxu1  ;;  %2854 = vmatpush1.bf16.msra.mxu0 %v1765_v18  ;;  %v1525_v49 = vmax.f32 %v1120_v24, %v1397_v31 }
 0x3be   : > { %v1400_v42 = vmul.f32 0.2, %v1126_v50  ;;  %v1526_v54 = vmax.f32 %v1122_v13, %v1398_v37 }
 0x3bf   : > { %v1527_v8 = vmax.f32 %v1124_v34, %v1399_v40 }
 0x3c0   : > { %v1528_v47 = vmax.f32 %v1126_v50, %v1400_v42 }
 0x3c1   : > { %v1767_v14 = vpack.c.bf16 %v1527_v8, %v1525_v49 }
 0x3c2   : > { %v1768_v6 = vpack.c.bf16 %v1528_v47, %v1526_v54  ;;  %v1130_v59 = vpop.f32.mrb[36].mxu1 }
 0x3c3   : > { %v1401_v57 = vmul.f32 0.2, %v1130_v59  ;;  %v1132_v61 = vpop.f32.mrb[37].mxu1 }
 0x3c4   : > { %v1402_v12 = vmul.f32 0.2, %v1132_v61  ;;  %v1134_v2 = vpop.f32.mrb[38].mxu1  ;;  %2855 = vmatprep.subr.bf16.mxu0 %v1768_v6 }
 0x3c5   : > { %v1403_v16 = vmul.f32 0.2, %v1134_v2  ;;  %v1136_v7 = vpop.f32.mrb[39].mxu1  ;;  %2856 = vmatpush1.bf16.msra.mxu0 %v1767_v14  ;;  %v1529_v15 = vmax.f32 %v1130_v59, %v1401_v57 }
 0x3c6   : > { %v1404_v4 = vmul.f32 0.2, %v1136_v7  ;;  %v1530_v18 = vmax.f32 %v1132_v61, %v1402_v12 }
 0x3c7   : > { %v1531_v29 = vmax.f32 %v1134_v2, %v1403_v16 }
 0x3c8   : > { %v1532_v22 = vmax.f32 %v1136_v7, %v1404_v4 }
 0x3c9   : > { %v1769_v24 = vpack.c.bf16 %v1531_v29, %v1529_v15 }
 0x3ca   : > { %v1770_v31 = vpack.c.bf16 %v1532_v22, %v1530_v18  ;;  %v1140_v13 = vpop.f32.mrb[40].mxu1 }
 0x3cb   : > { %v1405_v37 = vmul.f32 0.2, %v1140_v13  ;;  %v1142_v34 = vpop.f32.mrb[41].mxu1 }
 0x3cc   : > { %v1406_v40 = vmul.f32 0.2, %v1142_v34  ;;  %v1144_v50 = vpop.f32.mrb[42].mxu1  ;;  %2857 = vmatprep.subr.bf16.mxu0 %v1770_v31 }
 0x3cd   : > { %v1407_v42 = vmul.f32 0.2, %v1144_v50  ;;  %v1146_v49 = vpop.f32.mrb[43].mxu1  ;;  %2858 = vmatpush1.bf16.msra.mxu0 %v1769_v24  ;;  %v1533_v54 = vmax.f32 %v1140_v13, %v1405_v37 }
 0x3ce   : > { %v1408_v8 = vmul.f32 0.2, %v1146_v49  ;;  %v1534_v14 = vmax.f32 %v1142_v34, %v1406_v40 }
 0x3cf   : > { %v1535_v47 = vmax.f32 %v1144_v50, %v1407_v42 }
 0x3d0   : > { %v1536_v6 = vmax.f32 %v1146_v49, %v1408_v8 }
 0x3d1   : > { %v1771_v59 = vpack.c.bf16 %v1535_v47, %v1533_v54 }
 0x3d2   : > { %v1772_v57 = vpack.c.bf16 %v1536_v6, %v1534_v14  ;;  %v1150_v61 = vpop.f32.mrb[44].mxu1 }
 0x3d3   : > { %v1409_v12 = vmul.f32 0.2, %v1150_v61  ;;  %v1152_v2 = vpop.f32.mrb[45].mxu1 }
 0x3d4   : > { %v1410_v16 = vmul.f32 0.2, %v1152_v2  ;;  %v1154_v7 = vpop.f32.mrb[46].mxu1  ;;  %2859 = vmatprep.subr.bf16.mxu0 %v1772_v57 }
 0x3d5   : > { %v1411_v4 = vmul.f32 0.2, %v1154_v7  ;;  %v1156_v15 = vpop.f32.mrb[47].mxu1  ;;  %2860 = vmatpush1.bf16.msra.mxu0 %v1771_v59  ;;  %v1537_v18 = vmax.f32 %v1150_v61, %v1409_v12 }
 0x3d6   : > { %v1412_v29 = vmul.f32 0.2, %v1156_v15  ;;  %v1538_v24 = vmax.f32 %v1152_v2, %v1410_v16 }
 0x3d7   : > { %v1539_v22 = vmax.f32 %v1154_v7, %v1411_v4 }
 0x3d8   : > { %v1540_v31 = vmax.f32 %v1156_v15, %v1412_v29 }
 0x3d9   : > { %v1773_v13 = vpack.c.bf16 %v1539_v22, %v1537_v18 }
 0x3da   : > { %v1774_v37 = vpack.c.bf16 %v1540_v31, %v1538_v24  ;;  %v1160_v34 = vpop.f32.mrb[48].mxu1 }
 0x3db   : > { %v1413_v40 = vmul.f32 0.2, %v1160_v34  ;;  %v1162_v50 = vpop.f32.mrb[49].mxu1 }
 0x3dc   : > { %v1414_v42 = vmul.f32 0.2, %v1162_v50  ;;  %v1164_v49 = vpop.f32.mrb[50].mxu1  ;;  %2861 = vmatprep.subr.bf16.mxu0 %v1774_v37 }
 0x3dd   : > { %v1415_v8 = vmul.f32 0.2, %v1164_v49  ;;  %v1166_v54 = vpop.f32.mrb[51].mxu1  ;;  %2862 = vmatpush1.bf16.msra.mxu0 %v1773_v13  ;;  %v1541_v14 = vmax.f32 %v1160_v34, %v1413_v40 }
 0x3de   : > { %v1416_v47 = vmul.f32 0.2, %v1166_v54  ;;  %v1542_v59 = vmax.f32 %v1162_v50, %v1414_v42 }
 0x3df   : > { %v1543_v6 = vmax.f32 %v1164_v49, %v1415_v8 }
 0x3e0   : > { %v1544_v57 = vmax.f32 %v1166_v54, %v1416_v47 }
 0x3e1   : > { %v1775_v61 = vpack.c.bf16 %v1543_v6, %v1541_v14 }
 0x3e2   : > { %v1776_v12 = vpack.c.bf16 %v1544_v57, %v1542_v59  ;;  %v1170_v2 = vpop.f32.mrb[52].mxu1 }
 0x3e3   : > { %v1417_v16 = vmul.f32 0.2, %v1170_v2  ;;  %v1172_v7 = vpop.f32.mrb[53].mxu1 }
 0x3e4   : > { %v1418_v4 = vmul.f32 0.2, %v1172_v7  ;;  %v1174_v15 = vpop.f32.mrb[54].mxu1  ;;  %2863 = vmatprep.subr.bf16.mxu0 %v1776_v12 }
 0x3e5   : > { %v1419_v29 = vmul.f32 0.2, %v1174_v15  ;;  %v1176_v18 = vpop.f32.mrb[55].mxu1  ;;  %2864 = vmatpush1.bf16.msra.mxu0 %v1775_v61  ;;  %v1545_v24 = vmax.f32 %v1170_v2, %v1417_v16 }
 0x3e6   : > { %v1420_v22 = vmul.f32 0.2, %v1176_v18  ;;  %v1546_v13 = vmax.f32 %v1172_v7, %v1418_v4 }
 0x3e7   : > { %v1547_v31 = vmax.f32 %v1174_v15, %v1419_v29 }
 0x3e8   : > { %v1548_v37 = vmax.f32 %v1176_v18, %v1420_v22 }
 0x3e9   : > { %v1777_v34 = vpack.c.bf16 %v1547_v31, %v1545_v24 }
 0x3ea   : > { %v1778_v40 = vpack.c.bf16 %v1548_v37, %v1546_v13  ;;  %v1180_v50 = vpop.f32.mrb[56].mxu1 }
 0x3eb   : > { %v1421_v42 = vmul.f32 0.2, %v1180_v50  ;;  %v1182_v49 = vpop.f32.mrb[57].mxu1 }
 0x3ec   : > { %v1422_v8 = vmul.f32 0.2, %v1182_v49  ;;  %v1184_v54 = vpop.f32.mrb[58].mxu1  ;;  %2865 = vmatprep.subr.bf16.mxu0 %v1778_v40 }
 0x3ed   : > { %v1423_v47 = vmul.f32 0.2, %v1184_v54  ;;  %v1186_v14 = vpop.f32.mrb[59].mxu1  ;;  %2866 = vmatpush1.bf16.msra.mxu0 %v1777_v34  ;;  %v1549_v59 = vmax.f32 %v1180_v50, %v1421_v42 }
 0x3ee   : > { %v1424_v6 = vmul.f32 0.2, %v1186_v14  ;;  %v1550_v61 = vmax.f32 %v1182_v49, %v1422_v8 }
 0x3ef   : > { %v1551_v57 = vmax.f32 %v1184_v54, %v1423_v47 }
 0x3f0   : > { %v1552_v12 = vmax.f32 %v1186_v14, %v1424_v6 }
 0x3f1   : > { %v1779_v2 = vpack.c.bf16 %v1551_v57, %v1549_v59 }
 0x3f2   : > { %v1780_v16 = vpack.c.bf16 %v1552_v12, %v1550_v61  ;;  %v1190_v7 = vpop.f32.mrb[60].mxu1 }
 0x3f3   : > { %v1425_v4 = vmul.f32 0.2, %v1190_v7  ;;  %v1192_v15 = vpop.f32.mrb[61].mxu1 }
 0x3f4   : > { %v1426_v29 = vmul.f32 0.2, %v1192_v15  ;;  %v1194_v18 = vpop.f32.mrb[62].mxu1  ;;  %2867 = vmatprep.subr.bf16.mxu0 %v1780_v16 }
 0x3f5   : > { %v1427_v22 = vmul.f32 0.2, %v1194_v18  ;;  %v1196_v24 = vpop.f32.mrb[63].mxu1  ;;  %2868 = vmatpush1.bf16.msra.mxu0 %v1779_v2  ;;  %v1553_v13 = vmax.f32 %v1190_v7, %v1425_v4 }
 0x3f6   : > { %v1428_v31 = vmul.f32 0.2, %v1196_v24  ;;  %v1554_v34 = vmax.f32 %v1192_v15, %v1426_v29 }
 0x3f7   : > { %v1555_v37 = vmax.f32 %v1194_v18, %v1427_v22  ;;  %v5080_v22 = vld [vmem:[%s5679_s29] ss:$16 sps:$4 sm:$0xff]  }
 0x3f8   : > { %v1556_v40 = vmax.f32 %v1196_v24, %v1428_v31 }
 0x3f9   : > { %v1781_v50 = vpack.c.bf16 %v1555_v37, %v1553_v13  ;;  %v5084_v13 = vld [vmem:[%s5679_s29 + $0x24] ss:$16 sps:$4 sm:$0xff]  }
 0x3fa   : > { %v1782_v42 = vpack.c.bf16 %v1556_v40, %v1554_v34  ;;  %v1200_v49 = vpop.f32.mrb[64].mxu1 }
 0x3fb   : > { %v1429_v8 = vmul.f32 0.2, %v1200_v49  ;;  %v1202_v54 = vpop.f32.mrb[65].mxu1 }
 0x3fc   : > { %v1430_v47 = vmul.f32 0.2, %v1202_v54  ;;  %v1204_v14 = vpop.f32.mrb[66].mxu1  ;;  %2869 = vmatprep.subr.bf16.mxu0 %v1782_v42 }
 0x3fd   : > { %v1431_v6 = vmul.f32 0.2, %v1204_v14  ;;  %v1206_v59 = vpop.f32.mrb[67].mxu1  ;;  %2870 = vmatpush1.bf16.msra.mxu0 %v1781_v50  ;;  %v1557_v61 = vmax.f32 %v1200_v49, %v1429_v8 }
 0x3fe   : > { %v1432_v57 = vmul.f32 0.2, %v1206_v59  ;;  %v1558_v2 = vmax.f32 %v1202_v54, %v1430_v47 }
 0x3ff   : > { %v1559_v12 = vmax.f32 %v1204_v14, %v1431_v6 }
 0x400   : > { %v1560_v16 = vmax.f32 %v1206_v59, %v1432_v57  ;;  %v5086_v57 = vld [vmem:[%s5679_s29 + $0x20] ss:$16 sps:$4 sm:$0xff]  }
 0x401   : > { %v1783_v7 = vpack.c.bf16 %v1559_v12, %v1557_v61 }
 0x402   : > { %v1784_v4 = vpack.c.bf16 %v1560_v16, %v1558_v2  ;;  %v1210_v15 = vpop.f32.mrb[68].mxu1  ;;  %v5088_v2 = vld [vmem:[%s5679_s29 + $0x44] ss:$16 sps:$4 sm:$0xff]  }
 0x403   : > { %v1433_v29 = vmul.f32 0.2, %v1210_v15  ;;  %v1212_v18 = vpop.f32.mrb[69].mxu1 }
 0x404   : > { %2871 = vmatprep.subr.bf16.mxu0 %v1784_v4  ;;  %v1434_v24 = vmul.f32 0.2, %v1212_v18  ;;  %v1214_v31 = vpop.f32.mrb[70].mxu1 }
 0x405   : > { %2872 = vmatpush1.bf16.msra.mxu0 %v1783_v7  ;;  %v1561_v37 = vmax.f32 %v1210_v15, %v1433_v29  ;;  %v1435_v34 = vmul.f32 0.2, %v1214_v31  ;;  %v1216_v40 = vpop.f32.mrb[71].mxu1 }
 0x406   : > { %v1562_v50 = vmax.f32 %v1212_v18, %v1434_v24  ;;  %v1436_v42 = vmul.f32 0.2, %v1216_v40 }
 0x407   : > { %v1563_v49 = vmax.f32 %v1214_v31, %v1435_v34 }
 0x408   : > { %2874 = vmatmul.mubr.bf16.vlgmr.msra.gmra.mrb[0].mxu0 %v5080_v22  ;;  %v1564_v8 = vmax.f32 %v1216_v40, %v1436_v42  ;;  %v5090_v40 = vld [vmem:[%s5679_s29 + $0x40] ss:$16 sps:$4 sm:$0xff]  }
 0x409   : > { %2883 = vmatprep.mubr.bf16.mxu0 %v5084_v13  ;;  %v1785_v54 = vpack.c.bf16 %v1563_v49, %v1561_v37  ;;  %v5092_v49 = vld [vmem:[%s5679_s29 + $0x64] ss:$16 sps:$4 sm:$0xff]  }
 0x40a   : > { %v1786_v47 = vpack.c.bf16 %v1564_v8, %v1562_v50  ;;  %v1220_v14 = vpop.f32.mrb[72].mxu1 }
 0x40b   : > { %v1437_v6 = vmul.f32 0.2, %v1220_v14  ;;  %v1222_v59 = vpop.f32.mrb[73].mxu1 }
 0x40c   : > { %v1438_v61 = vmul.f32 0.2, %v1222_v59  ;;  %3194 = vmatprep.subr.bf16.mxu0 %v1786_v47  ;;  %v1224_v12 = vpop.f32.mrb[74].mxu1 }
 0x40d   : > { %v1565_v16 = vmax.f32 %v1220_v14, %v1437_v6  ;;  %v1439_v7 = vmul.f32 0.2, %v1224_v12  ;;  %3195 = vmatpush1.bf16.msra.mxu0 %v1785_v54  ;;  %v1226_v4 = vpop.f32.mrb[75].mxu1 }
 0x40e   : > { %v1566_v15 = vmax.f32 %v1222_v59, %v1438_v61  ;;  %v1440_v29 = vmul.f32 0.2, %v1226_v4 }
 0x40f   : > { %v1567_v18 = vmax.f32 %v1224_v12, %v1439_v7 }
 0x410   : > { %2884 = vmatmul.mubr.bf16.gmra.mrb[4].mxu0 %v5086_v57  ;;  %v1568_v22 = vmax.f32 %v1226_v4, %v1440_v29  ;;  %v5094_v4 = vld [vmem:[%s5679_s29 + $0x60] ss:$16 sps:$4 sm:$0xff]  }
 0x411   : > { %2893 = vmatprep.mubr.bf16.mxu0 %v5088_v2  ;;  %v1787_v24 = vpack.c.bf16 %v1567_v18, %v1565_v16  ;;  %v5096_v18 = vld [vmem:[%s5679_s29 + $0x84] ss:$16 sps:$4 sm:$0xff]  }
 0x412   : > { %v1788_v31 = vpack.c.bf16 %v1568_v22, %v1566_v15  ;;  %v1230_v13 = vpop.f32.mrb[76].mxu1 }
 0x413   : > { %v1441_v37 = vmul.f32 0.2, %v1230_v13  ;;  %v1232_v34 = vpop.f32.mrb[77].mxu1 }
 0x414   : > { %v1442_v50 = vmul.f32 0.2, %v1232_v34  ;;  %v1234_v42 = vpop.f32.mrb[78].mxu1  ;;  %3196 = vmatprep.subr.bf16.mxu0 %v1788_v31 }
 0x415   : > { %v1569_v8 = vmax.f32 %v1230_v13, %v1441_v37  ;;  %v1443_v54 = vmul.f32 0.2, %v1234_v42  ;;  %v1236_v47 = vpop.f32.mrb[79].mxu1  ;;  %3197 = vmatpush1.bf16.msra.mxu0 %v1787_v24 }
 0x416   : > { %v1570_v14 = vmax.f32 %v1232_v34, %v1442_v50  ;;  %v1444_v6 = vmul.f32 0.2, %v1236_v47 }
 0x417   : > { %v1571_v59 = vmax.f32 %v1234_v42, %v1443_v54 }
 0x418   : > { %2894 = vmatmul.mubr.bf16.gmra.mrb[8].mxu0 %v5090_v40  ;;  %v1572_v57 = vmax.f32 %v1236_v47, %v1444_v6  ;;  %v5098_v47 = vld [vmem:[%s5679_s29 + $0x80] ss:$16 sps:$4 sm:$0xff]  }
 0x419   : > { %2903 = vmatprep.mubr.bf16.mxu0 %v5092_v49  ;;  %v1789_v61 = vpack.c.bf16 %v1571_v59, %v1569_v8  ;;  %v5099_v59 = vld [vmem:[%s5679_s29 + $0xa4] ss:$16 sps:$4 sm:$0xff]  }
 0x41a   : > { %v1790_v12 = vpack.c.bf16 %v1572_v57, %v1570_v14  ;;  %v1240_v2 = vpop.f32.mrb[80].mxu1 }
 0x41b   : > { %v1445_v16 = vmul.f32 0.2, %v1240_v2  ;;  %v1242_v7 = vpop.f32.mrb[81].mxu1 }
 0x41c   : > { %v1446_v15 = vmul.f32 0.2, %v1242_v7  ;;  %v1244_v29 = vpop.f32.mrb[82].mxu1  ;;  %3198 = vmatprep.subr.bf16.mxu0 %v1790_v12 }
 0x41d   : > { %v1573_v22 = vmax.f32 %v1240_v2, %v1445_v16  ;;  %v1447_v24 = vmul.f32 0.2, %v1244_v29  ;;  %v1246_v31 = vpop.f32.mrb[83].mxu1  ;;  %3199 = vmatpush1.bf16.msra.mxu0 %v1789_v61 }
 0x41e   : > { %v1574_v13 = vmax.f32 %v1242_v7, %v1446_v15  ;;  %v1448_v37 = vmul.f32 0.2, %v1246_v31 }
 0x41f   : > { %v1575_v34 = vmax.f32 %v1244_v29, %v1447_v24 }
 0x420   : > { %2904 = vmatmul.mubr.bf16.gmra.mrb[12].mxu0 %v5094_v4  ;;  %v1576_v40 = vmax.f32 %v1246_v31, %v1448_v37  ;;  %v5101_v31 = vld [vmem:[%s5679_s29 + $0xa0] ss:$16 sps:$4 sm:$0xff]  }
 0x421   : > { %2913 = vmatprep.mubr.bf16.mxu0 %v5096_v18  ;;  %v1791_v50 = vpack.c.bf16 %v1575_v34, %v1573_v22  ;;  %v5102_v34 = vld [vmem:[%s5679_s29 + $0xc4] ss:$16 sps:$4 sm:$0xff]  }
 0x422   : > { %v1792_v42 = vpack.c.bf16 %v1576_v40, %v1574_v13  ;;  %v1250_v49 = vpop.f32.mrb[84].mxu1 }
 0x423   : > { %v1449_v8 = vmul.f32 0.2, %v1250_v49  ;;  %v1252_v54 = vpop.f32.mrb[85].mxu1 }
 0x424   : > { %v1450_v14 = vmul.f32 0.2, %v1252_v54  ;;  %v1254_v6 = vpop.f32.mrb[86].mxu1  ;;  %3200 = vmatprep.subr.bf16.mxu0 %v1792_v42 }
 0x425   : > { %v1577_v57 = vmax.f32 %v1250_v49, %v1449_v8  ;;  %v1451_v61 = vmul.f32 0.2, %v1254_v6  ;;  %v1256_v12 = vpop.f32.mrb[87].mxu1  ;;  %3201 = vmatpush1.bf16.msra.mxu0 %v1791_v50 }
 0x426   : > { %v1578_v2 = vmax.f32 %v1252_v54, %v1450_v14  ;;  %v1452_v16 = vmul.f32 0.2, %v1256_v12 }
 0x427   : > { %v1579_v7 = vmax.f32 %v1254_v6, %v1451_v61 }
 0x428   : > { %2914 = vmatmul.mubr.bf16.gmra.mrb[16].mxu0 %v5098_v47  ;;  %v1580_v4 = vmax.f32 %v1256_v12, %v1452_v16  ;;  %v5104_v12 = vld [vmem:[%s5679_s29 + $0xc0] ss:$16 sps:$4 sm:$0xff]  }
 0x429   : > { %2923 = vmatprep.mubr.bf16.mxu0 %v5099_v59  ;;  %v1793_v15 = vpack.c.bf16 %v1579_v7, %v1577_v57  ;;  %v5105_v7 = vld [vmem:[%s5679_s29 + $0xe4] ss:$16 sps:$4 sm:$0xff]  }
 0x42a   : > { %v1794_v29 = vpack.c.bf16 %v1580_v4, %v1578_v2  ;;  %v1260_v18 = vpop.f32.mrb[88].mxu1 }
 0x42b   : > { %v1453_v22 = vmul.f32 0.2, %v1260_v18  ;;  %v1262_v24 = vpop.f32.mrb[89].mxu1 }
 0x42c   : > { %v1454_v13 = vmul.f32 0.2, %v1262_v24  ;;  %v1264_v37 = vpop.f32.mrb[90].mxu1  ;;  %3202 = vmatprep.subr.bf16.mxu0 %v1794_v29 }
 0x42d   : > { %v1581_v40 = vmax.f32 %v1260_v18, %v1453_v22  ;;  %v1455_v50 = vmul.f32 0.2, %v1264_v37  ;;  %v1266_v42 = vpop.f32.mrb[91].mxu1  ;;  %3203 = vmatpush1.bf16.msra.mxu0 %v1793_v15 }
 0x42e   : > { %v1582_v49 = vmax.f32 %v1262_v24, %v1454_v13  ;;  %v1456_v8 = vmul.f32 0.2, %v1266_v42 }
 0x42f   : > { %v1583_v54 = vmax.f32 %v1264_v37, %v1455_v50 }
 0x430   : > { %2924 = vmatmul.mubr.bf16.gmra.mrb[20].mxu0 %v5101_v31  ;;  %v1584_v47 = vmax.f32 %v1266_v42, %v1456_v8  ;;  %v5107_v42 = vld [vmem:[%s5679_s29 + $0xe0] ss:$16 sps:$4 sm:$0xff]  }
 0x431   : > { %2933 = vmatprep.mubr.bf16.mxu0 %v5102_v34  ;;  %v1795_v14 = vpack.c.bf16 %v1583_v54, %v1581_v40  ;;  %v5108_v54 = vld [vmem:[%s5679_s29 + $0x104] ss:$16 sps:$4 sm:$0xff]  }
 0x432   : > { %v1796_v6 = vpack.c.bf16 %v1584_v47, %v1582_v49  ;;  %v1270_v59 = vpop.f32.mrb[92].mxu1 }
 0x433   : > { %v1457_v57 = vmul.f32 0.2, %v1270_v59  ;;  %v1272_v61 = vpop.f32.mrb[93].mxu1 }
 0x434   : > { %v1458_v2 = vmul.f32 0.2, %v1272_v61  ;;  %v1274_v16 = vpop.f32.mrb[94].mxu1  ;;  %3204 = vmatprep.subr.bf16.mxu0 %v1796_v6 }
 0x435   : > { %v1585_v4 = vmax.f32 %v1270_v59, %v1457_v57  ;;  %v1459_v15 = vmul.f32 0.2, %v1274_v16  ;;  %v1276_v29 = vpop.f32.mrb[95].mxu1  ;;  %3205 = vmatpush1.bf16.msra.mxu0 %v1795_v14 }
 0x436   : > { %v1586_v18 = vmax.f32 %v1272_v61, %v1458_v2  ;;  %v1460_v22 = vmul.f32 0.2, %v1276_v29 }
 0x437   : > { %v1587_v24 = vmax.f32 %v1274_v16, %v1459_v15 }
 0x438   : > { %2934 = vmatmul.mubr.bf16.gmra.mrb[24].mxu0 %v5104_v12  ;;  %v1588_v31 = vmax.f32 %v1276_v29, %v1460_v22  ;;  %v5110_v29 = vld [vmem:[%s5679_s29 + $0x100] ss:$16 sps:$4 sm:$0xff]  }
 0x439   : > { %2943 = vmatprep.mubr.bf16.mxu0 %v5105_v7  ;;  %v1797_v13 = vpack.c.bf16 %v1587_v24, %v1585_v4  ;;  %v5111_v24 = vld [vmem:[%s5679_s29 + $0x124] ss:$16 sps:$4 sm:$0xff]  }
 0x43a   : > { %v1798_v37 = vpack.c.bf16 %v1588_v31, %v1586_v18  ;;  %v1280_v34 = vpop.f32.mrb[96].mxu1 }
 0x43b   : > { %v1461_v40 = vmul.f32 0.2, %v1280_v34  ;;  %v1282_v50 = vpop.f32.mrb[97].mxu1 }
 0x43c   : > { %v1462_v49 = vmul.f32 0.2, %v1282_v50  ;;  %v1284_v8 = vpop.f32.mrb[98].mxu1  ;;  %3206 = vmatprep.subr.bf16.mxu0 %v1798_v37 }
 0x43d   : > { %v1589_v47 = vmax.f32 %v1280_v34, %v1461_v40  ;;  %v1463_v14 = vmul.f32 0.2, %v1284_v8  ;;  %v1286_v6 = vpop.f32.mrb[99].mxu1  ;;  %3207 = vmatpush1.bf16.msra.mxu0 %v1797_v13 }
 0x43e   : > { %v1590_v59 = vmax.f32 %v1282_v50, %v1462_v49  ;;  %v1464_v57 = vmul.f32 0.2, %v1286_v6 }
 0x43f   : > { %v1591_v61 = vmax.f32 %v1284_v8, %v1463_v14 }
 0x440   : > { %2944 = vmatmul.mubr.bf16.gmra.mrb[28].mxu0 %v5107_v42  ;;  %v1592_v12 = vmax.f32 %v1286_v6, %v1464_v57  ;;  %v5113_v6 = vld [vmem:[%s5679_s29 + $0x120] ss:$16 sps:$4 sm:$0xff]  }
 0x441   : > { %2953 = vmatprep.mubr.bf16.mxu0 %v5108_v54  ;;  %v1799_v2 = vpack.c.bf16 %v1591_v61, %v1589_v47  ;;  %v5114_v61 = vld [vmem:[%s5679_s29 + $0x144] ss:$16 sps:$4 sm:$0xff]  }
 0x442   : > { %v1800_v16 = vpack.c.bf16 %v1592_v12, %v1590_v59  ;;  %v1290_v7 = vpop.f32.mrb[100].mxu1 }
 0x443   : > { %v1465_v4 = vmul.f32 0.2, %v1290_v7  ;;  %v1292_v15 = vpop.f32.mrb[101].mxu1 }
 0x444   : > { %v1466_v18 = vmul.f32 0.2, %v1292_v15  ;;  %v1294_v22 = vpop.f32.mrb[102].mxu1  ;;  %3208 = vmatprep.subr.bf16.mxu0 %v1800_v16 }
 0x445   : > { %v1593_v31 = vmax.f32 %v1290_v7, %v1465_v4  ;;  %v1467_v13 = vmul.f32 0.2, %v1294_v22  ;;  %v1296_v37 = vpop.f32.mrb[103].mxu1  ;;  %3209 = vmatpush1.bf16.msra.mxu0 %v1799_v2 }
 0x446   : > { %v1594_v34 = vmax.f32 %v1292_v15, %v1466_v18  ;;  %v1468_v40 = vmul.f32 0.2, %v1296_v37 }
 0x447   : > { %v1595_v50 = vmax.f32 %v1294_v22, %v1467_v13 }
 0x448   : > { %2954 = vmatmul.mubr.bf16.gmra.mrb[32].mxu0 %v5110_v29  ;;  %v1596_v42 = vmax.f32 %v1296_v37, %v1468_v40  ;;  %v5116_v37 = vld [vmem:[%s5679_s29 + $0x140] ss:$16 sps:$4 sm:$0xff]  }
 0x449   : > { %2963 = vmatprep.mubr.bf16.mxu0 %v5111_v24  ;;  %v1801_v49 = vpack.c.bf16 %v1595_v50, %v1593_v31  ;;  %v5117_v50 = vld [vmem:[%s5679_s29 + $0x164] ss:$16 sps:$4 sm:$0xff]  }
 0x44a   : > { %v1802_v8 = vpack.c.bf16 %v1596_v42, %v1594_v34  ;;  %v1300_v54 = vpop.f32.mrb[104].mxu1 }
 0x44b   : > { %v1469_v47 = vmul.f32 0.2, %v1300_v54  ;;  %v1302_v14 = vpop.f32.mrb[105].mxu1 }
 0x44c   : > { %v1470_v59 = vmul.f32 0.2, %v1302_v14  ;;  %v1304_v57 = vpop.f32.mrb[106].mxu1  ;;  %3210 = vmatprep.subr.bf16.mxu0 %v1802_v8 }
 0x44d   : > { %v1597_v12 = vmax.f32 %v1300_v54, %v1469_v47  ;;  %v1471_v2 = vmul.f32 0.2, %v1304_v57  ;;  %v1306_v16 = vpop.f32.mrb[107].mxu1  ;;  %3211 = vmatpush1.bf16.msra.mxu0 %v1801_v49 }
 0x44e   : > { %v1598_v7 = vmax.f32 %v1302_v14, %v1470_v59  ;;  %v1472_v4 = vmul.f32 0.2, %v1306_v16 }
 0x44f   : > { %v1599_v15 = vmax.f32 %v1304_v57, %v1471_v2 }
 0x450   : > { %2964 = vmatmul.mubr.bf16.gmra.mrb[36].mxu0 %v5113_v6  ;;  %v1600_v29 = vmax.f32 %v1306_v16, %v1472_v4  ;;  %v5119_v16 = vld [vmem:[%s5679_s29 + $0x160] ss:$16 sps:$4 sm:$0xff]  }
 0x451   : > { %2973 = vmatprep.mubr.bf16.mxu0 %v5114_v61  ;;  %v1803_v18 = vpack.c.bf16 %v1599_v15, %v1597_v12  ;;  %v5120_v15 = vld [vmem:[%s5679_s29 + $0x184] ss:$16 sps:$4 sm:$0xff]  }
 0x452   : > { %v1804_v22 = vpack.c.bf16 %v1600_v29, %v1598_v7  ;;  %v1310_v24 = vpop.f32.mrb[108].mxu1 }
 0x453   : > { %v1473_v31 = vmul.f32 0.2, %v1310_v24  ;;  %v1312_v13 = vpop.f32.mrb[109].mxu1 }
 0x454   : > { %v1474_v34 = vmul.f32 0.2, %v1312_v13  ;;  %v1314_v40 = vpop.f32.mrb[110].mxu1  ;;  %3212 = vmatprep.subr.bf16.mxu0 %v1804_v22 }
 0x455   : > { %v1601_v42 = vmax.f32 %v1310_v24, %v1473_v31  ;;  %v1475_v49 = vmul.f32 0.2, %v1314_v40  ;;  %v1316_v8 = vpop.f32.mrb[111].mxu1  ;;  %3213 = vmatpush1.bf16.msra.mxu0 %v1803_v18 }
 0x456   : > { %v1602_v54 = vmax.f32 %v1312_v13, %v1474_v34  ;;  %v1476_v47 = vmul.f32 0.2, %v1316_v8 }
 0x457   : > { %v1603_v14 = vmax.f32 %v1314_v40, %v1475_v49 }
 0x458   : > { %2974 = vmatmul.mubr.bf16.gmra.mrb[40].mxu0 %v5116_v37  ;;  %v1604_v6 = vmax.f32 %v1316_v8, %v1476_v47  ;;  %v5122_v8 = vld [vmem:[%s5679_s29 + $0x180] ss:$16 sps:$4 sm:$0xff]  }
 0x459   : > { %2983 = vmatprep.mubr.bf16.mxu0 %v5117_v50  ;;  %v1805_v59 = vpack.c.bf16 %v1603_v14, %v1601_v42  ;;  %v5123_v14 = vld [vmem:[%s5679_s29 + $0x1a4] ss:$16 sps:$4 sm:$0xff]  }
 0x45a   : > { %v1806_v57 = vpack.c.bf16 %v1604_v6, %v1602_v54  ;;  %v1320_v61 = vpop.f32.mrb[112].mxu1 }
 0x45b   : > { %v1477_v12 = vmul.f32 0.2, %v1320_v61  ;;  %v1322_v2 = vpop.f32.mrb[113].mxu1 }
 0x45c   : > { %v1478_v7 = vmul.f32 0.2, %v1322_v2  ;;  %v1324_v4 = vpop.f32.mrb[114].mxu1  ;;  %3214 = vmatprep.subr.bf16.mxu0 %v1806_v57 }
 0x45d   : > { %v1605_v29 = vmax.f32 %v1320_v61, %v1477_v12  ;;  %v1479_v18 = vmul.f32 0.2, %v1324_v4  ;;  %v1326_v22 = vpop.f32.mrb[115].mxu1  ;;  %3215 = vmatpush1.bf16.msra.mxu0 %v1805_v59 }
 0x45e   : > { %v1606_v24 = vmax.f32 %v1322_v2, %v1478_v7  ;;  %v1480_v31 = vmul.f32 0.2, %v1326_v22 }
 0x45f   : > { %v1607_v13 = vmax.f32 %v1324_v4, %v1479_v18 }
 0x460   : > { %2984 = vmatmul.mubr.bf16.gmra.mrb[44].mxu0 %v5119_v16  ;;  %v1608_v37 = vmax.f32 %v1326_v22, %v1480_v31  ;;  %v5125_v22 = vld [vmem:[%s5679_s29 + $0x1a0] ss:$16 sps:$4 sm:$0xff]  }
 0x461   : > { %2993 = vmatprep.mubr.bf16.mxu0 %v5120_v15  ;;  %v1807_v34 = vpack.c.bf16 %v1607_v13, %v1605_v29  ;;  %v5126_v13 = vld [vmem:[%s5679_s29 + $0x1c4] ss:$16 sps:$4 sm:$0xff]  }
 0x462   : > { %v1808_v40 = vpack.c.bf16 %v1608_v37, %v1606_v24  ;;  %v1330_v50 = vpop.f32.mrb[116].mxu1 }
 0x463   : > { %v1481_v42 = vmul.f32 0.2, %v1330_v50  ;;  %v1332_v49 = vpop.f32.mrb[117].mxu1 }
 0x464   : > { %v1482_v54 = vmul.f32 0.2, %v1332_v49  ;;  %v1334_v47 = vpop.f32.mrb[118].mxu1  ;;  %3216 = vmatprep.subr.bf16.mxu0 %v1808_v40 }
 0x465   : > { %v1609_v6 = vmax.f32 %v1330_v50, %v1481_v42  ;;  %v1483_v59 = vmul.f32 0.2, %v1334_v47  ;;  %v1336_v57 = vpop.f32.mrb[119].mxu1  ;;  %3217 = vmatpush1.bf16.msra.mxu0 %v1807_v34 }
 0x466   : > { %v1610_v61 = vmax.f32 %v1332_v49, %v1482_v54  ;;  %v1484_v12 = vmul.f32 0.2, %v1336_v57 }
 0x467   : > { %v1611_v2 = vmax.f32 %v1334_v47, %v1483_v59 }
 0x468   : > { %2994 = vmatmul.mubr.bf16.gmra.mrb[48].mxu0 %v5122_v8  ;;  %v1612_v16 = vmax.f32 %v1336_v57, %v1484_v12  ;;  %v5128_v57 = vld [vmem:[%s5679_s29 + $0x1c0] ss:$16 sps:$4 sm:$0xff]  }
 0x469   : > { %3003 = vmatprep.mubr.bf16.mxu0 %v5123_v14  ;;  %v1809_v7 = vpack.c.bf16 %v1611_v2, %v1609_v6  ;;  %v5129_v2 = vld [vmem:[%s5679_s29 + $0x1e4] ss:$16 sps:$4 sm:$0xff]  }
 0x46a   : > { %v1810_v4 = vpack.c.bf16 %v1612_v16, %v1610_v61  ;;  %v1340_v15 = vpop.f32.mrb[120].mxu1 }
 0x46b   : > { %v1485_v29 = vmul.f32 0.2, %v1340_v15  ;;  %v1342_v18 = vpop.f32.mrb[121].mxu1 }
 0x46c   : > { %v1486_v24 = vmul.f32 0.2, %v1342_v18  ;;  %v1344_v31 = vpop.f32.mrb[122].mxu1  ;;  %3218 = vmatprep.subr.bf16.mxu0 %v1810_v4 }
 0x46d   : > { %v1613_v37 = vmax.f32 %v1340_v15, %v1485_v29  ;;  %v1487_v34 = vmul.f32 0.2, %v1344_v31  ;;  %v1346_v40 = vpop.f32.mrb[123].mxu1  ;;  %3219 = vmatpush1.bf16.msra.mxu0 %v1809_v7 }
 0x46e   : > { %v1614_v50 = vmax.f32 %v1342_v18, %v1486_v24  ;;  %v1488_v42 = vmul.f32 0.2, %v1346_v40 }
 0x46f   : > { %v1615_v49 = vmax.f32 %v1344_v31, %v1487_v34 }
 0x470   : > { %3004 = vmatmul.mubr.bf16.gmra.mrb[52].mxu0 %v5125_v22  ;;  %v1616_v8 = vmax.f32 %v1346_v40, %v1488_v42  ;;  %v5131_v40 = vld [vmem:[%s5679_s29 + $0x1e0] ss:$16 sps:$4 sm:$0xff]  }
 0x471   : > { %3013 = vmatprep.mubr.bf16.mxu0 %v5126_v13  ;;  %v1811_v54 = vpack.c.bf16 %v1615_v49, %v1613_v37  ;;  %v5132_v49 = vld [vmem:[%s5679_s29 + $0x204] ss:$16 sps:$4 sm:$0xff]  }
 0x472   : > { %v1812_v47 = vpack.c.bf16 %v1616_v8, %v1614_v50  ;;  %v1350_v14 = vpop.f32.mrb[124].mxu1 }
 0x473   : > { %v1489_v6 = vmul.f32 0.2, %v1350_v14  ;;  %v1352_v59 = vpop.f32.mrb[125].mxu1 }
 0x474   : > { %v1490_v61 = vmul.f32 0.2, %v1352_v59  ;;  %v1354_v12 = vpop.f32.mrb[126].mxu1  ;;  %3220 = vmatprep.subr.bf16.mxu0 %v1812_v47 }
 0x475   : > { %v1617_v16 = vmax.f32 %v1350_v14, %v1489_v6  ;;  %v1491_v7 = vmul.f32 0.2, %v1354_v12  ;;  %v1356_v4 = vpop.f32.mrb[127].mxu1  ;;  %3221 = vmatpush1.bf16.msra.mxu0 %v1811_v54 }
 0x476   : > { %v1618_v15 = vmax.f32 %v1352_v59, %v1490_v61  ;;  %v1492_v29 = vmul.f32 0.2, %v1356_v4 }
 0x477   : > { %v1619_v18 = vmax.f32 %v1354_v12, %v1491_v7  ;;  %v5137_v7 = vld [vmem:[%s5679_s29 + $0x220] ss:$16 sps:$4 sm:$0xff]  }
 0x478   : > { %3014 = vmatmul.mubr.bf16.gmra.mrb[56].mxu0 %v5128_v57  ;;  %v1620_v22 = vmax.f32 %v1356_v4, %v1492_v29  ;;  %v5138_v4 = vld [vmem:[%s5679_s29 + $0x244] ss:$16 sps:$4 sm:$0xff]  }
 0x479   : > { %3023 = vmatprep.mubr.bf16.mxu0 %v5129_v2  ;;  %v1813_v24 = vpack.c.bf16 %v1619_v18, %v1617_v16  ;;  %v5134_v2 = vld [vmem:[%s5679_s29 + $0x200] ss:$16 sps:$4 sm:$0xff]   ;;  %v5135_v16 = vld [vmem:[%s5679_s29 + $0x224] ss:$16 sps:$4 sm:$0xff]  }
 0x47a   : > { %v1814_v31 = vpack.c.bf16 %v1620_v22, %v1618_v15  ;;  %v1360_v13 = vpop.f32.mrb[128].mxu1  ;;  %v5140_v15 = vld [vmem:[%s5679_s29 + $0x240] ss:$16 sps:$4 sm:$0xff]   ;;  %v5141_v29 = vld [vmem:[%s5679_s29 + $0x264] ss:$16 sps:$4 sm:$0xff]  }
 0x47b   : > { %v1493_v37 = vmul.f32 0.2, %v1360_v13  ;;  %v1362_v34 = vpop.f32.mrb[129].mxu1  ;;  %v1849_v18 = vld [vmem:[%s5695_s11 + $0x100] sm:$0xff] }
 0x47c   : > { %v1494_v50 = vmul.f32 0.2, %v1362_v34  ;;  %v1364_v42 = vpop.f32.mrb[130].mxu1  ;;  %3222 = vmatprep.subr.bf16.mxu0 %v1814_v31  ;;  %2043 = vperm.xlu0 %5049, %v1849_v18   ;;  %v5143_v22 = vld [vmem:[%s5679_s29 + $0x260] ss:$16 sps:$4 sm:$0xff]   ;;  %v1852_v31 = vld [vmem:[%s5695_s11 + $0x118] sm:$0xff] }
 0x47d   : > { %v1621_v8 = vmax.f32 %v1360_v13, %v1493_v37  ;;  %v1495_v54 = vmul.f32 0.2, %v1364_v42  ;;  %v1366_v47 = vpop.f32.mrb[131].mxu1  ;;  %3223 = vmatpush1.bf16.msra.mxu0 %v1813_v24  ;;  %v5144_v24 = vld [vmem:[%s5679_s29 + $0x284] ss:$16 sps:$4 sm:$0xff]   ;;  %v1854_v13 = vld [vmem:[%s5695_s11 + $0x128] sm:$0xff] }
 0x47e   : > { %v1622_v14 = vmax.f32 %v1362_v34, %v1494_v50  ;;  %v1496_v6 = vmul.f32 0.2, %v1366_v47  ;;  %v5146_v37 = vld [vmem:[%s5679_s29 + $0x280] ss:$16 sps:$4 sm:$0xff]   ;;  %v5147_v34 = vld [vmem:[%s5679_s29 + $0x2a4] ss:$16 sps:$4 sm:$0xff]  }
 0x47f   : > { %v1623_v59 = vmax.f32 %v1364_v42, %v1495_v54  ;;  %v1858_v50 = vld [vmem:[%s5695_s11 + $0x148] sm:$0xff]  ;;  %v5149_v42 = vld [vmem:[%s5679_s29 + $0x2a0] ss:$16 sps:$4 sm:$0xff]   ;;  %v5162_v18 = vld [vmem:[%s5679_s29 + $0x344] ss:$16 sps:$4 sm:$0xff]  }
 0x480   : > { %3024 = vmatmul.mubr.bf16.gmra.mrb[60].mxu0 %v5131_v40  ;;  %v1624_v57 = vmax.f32 %v1366_v47, %v1496_v6  ;;  %2058 = vperm.xlu0 %5049, %v1852_v31   ;;  %v1856_v40 = vld [vmem:[%s5695_s11 + $0x138] sm:$0xff]  ;;  %v1862_v54 = vld [vmem:[%s5695_s11 + $0x168] sm:$0xff]  ;;  %v5152_v47 = vld [vmem:[%s5679_s29 + $0x2c0] ss:$16 sps:$4 sm:$0xff]  }
 0x481   : > { %3033 = vmatprep.mubr.bf16.mxu0 %v5132_v49  ;;  %v1815_v61 = vpack.c.bf16 %v1623_v59, %v1621_v8  ;;  %v5150_v49 = vld [vmem:[%s5679_s29 + $0x2c4] ss:$16 sps:$4 sm:$0xff]   ;;  %v1860_v8 = vld [vmem:[%s5695_s11 + $0x158] sm:$0xff]  ;;  %v1866_v59 = vld [vmem:[%s5695_s11 + $0x188] sm:$0xff] }
 0x482   : > { %v1816_v12 = vpack.c.bf16 %v1624_v57, %v1622_v14  ;;  %v5153_v14 = vld [vmem:[%s5679_s29 + $0x2e4] ss:$16 sps:$4 sm:$0xff]   ;;  %v1864_v6 = vld [vmem:[%s5695_s11 + $0x178] sm:$0xff]  ;;  %v5155_v57 = vld [vmem:[%s5679_s29 + $0x2e0] ss:$16 sps:$4 sm:$0xff]  }
 0x483   : > { %v5164_v31 = vld [vmem:[%s5679_s29 + $0x340] ss:$16 sps:$4 sm:$0xff]  }
 0x484   : > { %3224 = vmatprep.subr.bf16.mxu0 %v1816_v12  ;;  %2068 = vperm.xlu0 %5049, %v1854_v13   ;;  %v1868_v12 = vld [vmem:[%s5695_s11 + $0x198] sm:$0xff]  ;;  %v5165_v13 = vld [vmem:[%s5679_s29 + $0x364] ss:$16 sps:$4 sm:$0xff]  }
 0x485   : > { %3225 = vmatpush1.bf16.msra.mxu0 %v1815_v61  ;;  %v5156_v61 = vld [vmem:[%s5679_s29 + $0x304] ss:$16 sps:$4 sm:$0xff]  }
 0x488   : > { %3034 = vmatmul.mubr.bf16.gmra.mrb[64].mxu0 %v5134_v2  ;;  %2078 = vperm.xlu0 %5049, %v1856_v40   ;;  %v1870_v2 = vld [vmem:[%s5695_s11 + $0x1a8] sm:$0xff]  ;;  %v5167_v40 = vld [vmem:[%s5679_s29 + $0x360] ss:$16 sps:$4 sm:$0xff]  }
 0x489   : > { %3043 = vmatprep.mubr.bf16.mxu0 %v5135_v16  ;;  %v5158_v16 = vld [vmem:[%s5679_s29 + $0x300] ss:$16 sps:$4 sm:$0xff]  }
 0x48c   : > { %2088 = vperm.xlu0 %5049, %v1858_v50   ;;  %v5168_v50 = vld [vmem:[%s5679_s29 + $0x384] ss:$16 sps:$4 sm:$0xff]  }
 0x490   : > { %3044 = vmatmul.mubr.bf16.gmra.mrb[68].mxu0 %v5137_v7  ;;  %2098 = vperm.xlu0 %5049, %v1860_v8   ;;  %v5159_v7 = vld [vmem:[%s5679_s29 + $0x324] ss:$16 sps:$4 sm:$0xff]  }
 0x491   : > { %3053 = vmatprep.mubr.bf16.mxu0 %v5138_v4  ;;  %v1872_v4 = vld [vmem:[%s5695_s11 + $0x1b8] sm:$0xff]  ;;  %v5171_v8 = vld [vmem:[%s5679_s29 + $0x3a4] ss:$16 sps:$4 sm:$0xff]  }
 0x494   : > { %2108 = vperm.xlu0 %5049, %v1862_v54   ;;  %v1822_v54 = vld [vmem:[%s5695_s11 + $0x28] sm:$0xff] }
 0x498   : > { %3054 = vmatmul.mubr.bf16.gmra.mrb[72].mxu0 %v5140_v15  ;;  %2118 = vperm.xlu0 %5049, %v1864_v6   ;;  %v1874_v15 = vld [vmem:[%s5695_s11 + $0x1c8] sm:$0xff]  ;;  %v1824_v6 = vld [vmem:[%s5695_s11 + $0x38] sm:$0xff] }
 0x499   : > { %3063 = vmatprep.mubr.bf16.mxu0 %v5141_v29  ;;  %v5161_v29 = vld [vmem:[%s5679_s29 + $0x320] ss:$16 sps:$4 sm:$0xff]  }
 0x49c   : > { %2128 = vperm.xlu0 %5049, %v1866_v59   ;;  %v5176_v59 = vld [vmem:[%s5679_s29 + $0x3c0] ss:$16 sps:$4 sm:$0xff]  }
 0x4a0   : > { %3064 = vmatmul.mubr.bf16.gmra.mrb[76].mxu0 %v5143_v22  ;;  %2138 = vperm.xlu0 %5049, %v1868_v12   ;;  %v1876_v22 = vld [vmem:[%s5695_s11 + $0x1d8] sm:$0xff]  ;;  %v5179_v12 = vld [vmem:[%s5679_s29 + $0x3e0] ss:$16 sps:$4 sm:$0xff]  }
 0x4a1   : > { %3073 = vmatprep.mubr.bf16.mxu0 %v5144_v24  ;;  %v1878_v24 = vld [vmem:[%s5695_s11 + $0x1e8] sm:$0xff] }
 0x4a4   : > { %2148 = vperm.xlu0 %5049, %v1870_v2   ;;  %v5182_v2 = vld [vmem:[%s5679_s29 + $0xc] ss:$16 sps:$4 sm:$0xff]  }
 0x4a8   : > { %3074 = vmatmul.mubr.bf16.gmra.mrb[80].mxu0 %v5146_v37  ;;  %2158 = vperm.xlu0 %5049, %v1872_v4   ;;  %v1880_v37 = vld [vmem:[%s5695_s11 + $0x1f8] sm:$0xff] }
 0x4a9   : > { %3083 = vmatprep.mubr.bf16.mxu0 %v5147_v34  ;;  %v1818_v34 = vld [vmem:[%s5695_s11 + $0x8] sm:$0xff] }
 0x4aa   : > { %v5183_v4 = vld [vmem:[%s5679_s29 + $0x2c] ss:$16 sps:$4 sm:$0xff]  }
 0x4ac   : > { %2168 = vperm.xlu0 %5049, %v1874_v15   ;;  %v1830_v15 = vld [vmem:[%s5695_s11 + $0x68] sm:$0xff] }
 0x4b0   : > { %3084 = vmatmul.mubr.bf16.gmra.mrb[84].mxu0 %v5149_v42  ;;  %2178 = vperm.xlu0 %5049, %v1876_v22   ;;  %v1820_v42 = vld [vmem:[%s5695_s11 + $0x18] sm:$0xff] }
 0x4b1   : > { %3093 = vmatprep.mubr.bf16.mxu0 %v5150_v49  ;;  %v5170_v49 = vld [vmem:[%s5679_s29 + $0x380] ss:$16 sps:$4 sm:$0xff]   ;;  %v1832_v22 = vld [vmem:[%s5695_s11 + $0x78] sm:$0xff] }
 0x4b4   : > { %2188 = vperm.xlu0 %5049, %v1878_v24   ;;  %v5188_v24 = vld [vmem:[%s5679_s29 + $0x48] ss:$16 sps:$4 sm:$0xff]  }
 0x4b8   : > { %3094 = vmatmul.mubr.bf16.gmra.mrb[88].mxu0 %v5152_v47  ;;  %2198 = vperm.xlu0 %5049, %v1880_v37   ;;  %v5173_v47 = vld [vmem:[%s5679_s29 + $0x3a0] ss:$16 sps:$4 sm:$0xff]   ;;  %v5191_v37 = vld [vmem:[%s5679_s29 + $0x68] ss:$16 sps:$4 sm:$0xff]  }
 0x4b9   : > { %3103 = vmatprep.mubr.bf16.mxu0 %v5153_v14  ;;  %v5174_v14 = vld [vmem:[%s5679_s29 + $0x3c4] ss:$16 sps:$4 sm:$0xff]  }
 0x4bc   : > { %1888 = vperm.xlu0 %5049, %v1818_v34   ;;  %v5192_v34 = vld [vmem:[%s5679_s29 + $0x8c] ss:$16 sps:$4 sm:$0xff]  }
 0x4c0   : > { %3104 = vmatmul.mubr.bf16.gmra.mrb[92].mxu0 %v5155_v57  ;;  %1898 = vperm.xlu0 %5049, %v1820_v42   ;;  %v5177_v57 = vld [vmem:[%s5679_s29 + $0x3e4] ss:$16 sps:$4 sm:$0xff]   ;;  %v5195_v42 = vld [vmem:[%s5679_s29 + $0xac] ss:$16 sps:$4 sm:$0xff]  }
 0x4c1   : > { %3113 = vmatprep.mubr.bf16.mxu0 %v5156_v61  ;;  %v1826_v61 = vld [vmem:[%s5695_s11 + $0x48] sm:$0xff] }
 0x4c4   : > { %1908 = vperm.xlu0 %5049, %v1822_v54   ;;  %v5198_v54 = vld [vmem:[%s5679_s29 + $0xcc] ss:$16 sps:$4 sm:$0xff]  }
 0x4c8   : > { %3114 = vmatmul.mubr.bf16.gmra.mrb[96].mxu0 %v5158_v16  ;;  %1918 = vperm.xlu0 %5049, %v1824_v6   ;;  %v1828_v16 = vld [vmem:[%s5695_s11 + $0x58] sm:$0xff] }
 0x4c9   : > { %3123 = vmatprep.mubr.bf16.mxu0 %v5159_v7  ;;  %v5180_v7 = vld [vmem:[%s5679_s29 + $0x8] ss:$16 sps:$4 sm:$0xff]   ;;  %v5201_v6 = vld [vmem:[%s5679_s29 + $0xec] ss:$16 sps:$4 sm:$0xff]  }
 0x4cc   : > { %1928 = vperm.xlu0 %5049, %v1826_v61   ;;  %v5204_v61 = vld [vmem:[%s5679_s29 + $0x10c] ss:$16 sps:$4 sm:$0xff]  }
 0x4d0   : > { %3124 = vmatmul.mubr.bf16.gmra.mrb[100].mxu0 %v5161_v29  ;;  %1938 = vperm.xlu0 %5049, %v1828_v16   ;;  %v5185_v29 = vld [vmem:[%s5679_s29 + $0x28] ss:$16 sps:$4 sm:$0xff]   ;;  %v5207_v16 = vld [vmem:[%s5679_s29 + $0x12c] ss:$16 sps:$4 sm:$0xff]  }
 0x4d1   : > { %3133 = vmatprep.mubr.bf16.mxu0 %v5162_v18  ;;  %v5186_v18 = vld [vmem:[%s5679_s29 + $0x4c] ss:$16 sps:$4 sm:$0xff]  }
 0x4d4   : > { %1948 = vperm.xlu0 %5049, %v1830_v15   ;;  %v5210_v15 = vld [vmem:[%s5679_s29 + $0x14c] ss:$16 sps:$4 sm:$0xff]  }
 0x4d8   : > { %3134 = vmatmul.mubr.bf16.gmra.mrb[104].mxu0 %v5164_v31  ;;  %1958 = vperm.xlu0 %5049, %v1832_v22   ;;  %v5189_v31 = vld [vmem:[%s5679_s29 + $0x6c] ss:$16 sps:$4 sm:$0xff]  }
 0x4d9   : > { %3143 = vmatprep.mubr.bf16.mxu0 %v5165_v13  ;;  %v1834_v13 = vld [vmem:[%s5695_s11 + $0x88] sm:$0xff] }
 0x4da   : > { %v5213_v22 = vld [vmem:[%s5679_s29 + $0x16c] ss:$16 sps:$4 sm:$0xff]  }
 0x4dc   : > { %1968 = vperm.xlu0 %5049, %v1834_v13   ;;  %v5218_v13 = vld [vmem:[%s5679_s29 + $0x188] ss:$16 sps:$4 sm:$0xff]  }
 0x4e0   : > { %3144 = vmatmul.mubr.bf16.gmra.mrb[108].mxu0 %v5167_v40  ;;  %v1836_v40 = vld [vmem:[%s5695_s11 + $0x98] sm:$0xff] }
 0x4e1   : > { %3153 = vmatprep.mubr.bf16.mxu0 %v5168_v50  ;;  %1978 = vperm.xlu0 %5049, %v1836_v40   ;;  %v5194_v50 = vld [vmem:[%s5679_s29 + $0x88] ss:$16 sps:$4 sm:$0xff]  }
 0x4e2   : > { %v5221_v40 = vld [vmem:[%s5679_s29 + $0x1a8] ss:$16 sps:$4 sm:$0xff]  }
 0x4e8   : > { %3154 = vmatmul.mubr.bf16.gmra.mrb[112].mxu0 %v5170_v49  ;;  %v1838_v49 = vld [vmem:[%s5695_s11 + $0xa8] sm:$0xff] }
 0x4e9   : > { %3163 = vmatprep.mubr.bf16.mxu0 %v5171_v8  ;;  %1988 = vperm.xlu0 %5049, %v1838_v49   ;;  %v5197_v8 = vld [vmem:[%s5679_s29 + $0xa8] ss:$16 sps:$4 sm:$0xff]   ;;  %v5225_v49 = vld [vmem:[%s5679_s29 + $0x1ec] ss:$16 sps:$4 sm:$0xff]  }
 0x4f0   : > { %3164 = vmatmul.mubr.bf16.gmra.mrb[116].mxu0 %v5173_v47  ;;  %v1840_v47 = vld [vmem:[%s5695_s11 + $0xb8] sm:$0xff] }
 0x4f1   : > { %3173 = vmatprep.mubr.bf16.mxu0 %v5174_v14  ;;  %1998 = vperm.xlu0 %5049, %v1840_v47   ;;  %v5200_v14 = vld [vmem:[%s5679_s29 + $0xc8] ss:$16 sps:$4 sm:$0xff]   ;;  %v5228_v47 = vld [vmem:[%s5679_s29 + $0x20c] ss:$16 sps:$4 sm:$0xff]  }
 0x4f8   : > { %3174 = vmatmul.mubr.bf16.gmra.mrb[120].mxu0 %v5176_v59  ;;  %v1842_v59 = vld [vmem:[%s5695_s11 + $0xc8] sm:$0xff] }
 0x4f9   : > { %3183 = vmatprep.mubr.bf16.mxu0 %v5177_v57  ;;  %2008 = vperm.xlu0 %5049, %v1842_v59   ;;  %v5203_v57 = vld [vmem:[%s5679_s29 + $0xe8] ss:$16 sps:$4 sm:$0xff]   ;;  %v5231_v59 = vld [vmem:[%s5679_s29 + $0x22c] ss:$16 sps:$4 sm:$0xff]  }
 0x500   : > { %3184 = vmatmul.mubr.bf16.gmra.mrb[124].mxu0 %v5179_v12  ;;  %v1844_v12 = vld [vmem:[%s5695_s11 + $0xd8] sm:$0xff] }
 0x501   : > { %3226 = vmatprep.mubr.bf16.mxu0 %v5182_v2  ;;  %2018 = vperm.xlu0 %5049, %v1844_v12   ;;  %v5206_v2 = vld [vmem:[%s5679_s29 + $0x108] ss:$16 sps:$4 sm:$0xff]   ;;  %v5234_v12 = vld [vmem:[%s5679_s29 + $0x24c] ss:$16 sps:$4 sm:$0xff]  }
 0x508   : > { %3227 = vmatmul.mubr.bf16.vlgmr.msra.gmra.mrb[0].mxu0 %v5180_v7  ;;  %v1846_v7 = vld [vmem:[%s5695_s11 + $0xe8] sm:$0xff] }
 0x509   : > { %3236 = vmatprep.mubr.bf16.mxu0 %v5183_v4  ;;  %2028 = vperm.xlu0 %5049, %v1846_v7   ;;  %v5209_v4 = vld [vmem:[%s5679_s29 + $0x128] ss:$16 sps:$4 sm:$0xff]  }
 0x50a   : > { %v5236_v7 = vld [vmem:[%s5679_s29 + $0x248] ss:$16 sps:$4 sm:$0xff]  }
 0x510   : > { %3237 = vmatmul.mubr.bf16.gmra.mrb[4].mxu0 %v5185_v29  ;;  %v1848_v29 = vld [vmem:[%s5695_s11 + $0xf8] sm:$0xff] }
 0x511   : > { %3246 = vmatprep.mubr.bf16.mxu0 %v5186_v18  ;;  %2038 = vperm.xlu0 %5049, %v1848_v29   ;;  %v5212_v18 = vld [vmem:[%s5679_s29 + $0x148] ss:$16 sps:$4 sm:$0xff]  }
 0x512   : > { %v5239_v29 = vld [vmem:[%s5679_s29 + $0x268] ss:$16 sps:$4 sm:$0xff]  }
 0x518   : > { %3247 = vmatmul.mubr.bf16.gmra.mrb[8].mxu0 %v5188_v24  ;;  %v5215_v24 = vld [vmem:[%s5679_s29 + $0x168] ss:$16 sps:$4 sm:$0xff]  }
 0x519   : > { %3256 = vmatprep.mubr.bf16.mxu0 %v5189_v31  ;;  %v5216_v31 = vld [vmem:[%s5679_s29 + $0x18c] ss:$16 sps:$4 sm:$0xff]  }
 0x520   : > { %3257 = vmatmul.mubr.bf16.gmra.mrb[12].mxu0 %v5191_v37  ;;  %v4235_v37 = vld [vmem:[%s5700_s23] sm:$0xff] }
 0x521   : > { %3266 = vmatprep.mubr.bf16.mxu0 %v5192_v34  ;;  %v5219_v34 = vld [vmem:[%s5679_s29 + $0x1ac] ss:$16 sps:$4 sm:$0xff]   ;;  %4239 = vperm.xlu0 %5049, %v4235_v37  }
 0x528   : > { %3267 = vmatmul.mubr.bf16.gmra.mrb[16].mxu0 %v5194_v50  ;;  %v5222_v50 = vld [vmem:[%s5679_s29 + $0x1cc] ss:$16 sps:$4 sm:$0xff]  }
 0x529   : > { %3276 = vmatprep.mubr.bf16.mxu0 %v5195_v42  ;;  %v5224_v42 = vld [vmem:[%s5679_s29 + $0x1c8] ss:$16 sps:$4 sm:$0xff]  }
 0x530   : > { %3277 = vmatmul.mubr.bf16.gmra.mrb[20].mxu0 %v5197_v8  ;;  %v6157_v8 = vpop.permute.xlu0 %2043 }
 0x531   : > { %3286 = vmatprep.mubr.bf16.mxu0 %v5198_v54  ;;  %v5227_v54 = vld [vmem:[%s5679_s29 + $0x1e8] ss:$16 sps:$4 sm:$0xff]  }
 0x538   : > { %3287 = vmatmul.mubr.bf16.gmra.mrb[24].mxu0 %v5200_v14  ;;  %v6161_v14 = vpop.permute.xlu0 %2058 }
 0x539   : > { %3296 = vmatprep.mubr.bf16.mxu0 %v5201_v6  ;;  %v5230_v6 = vld [vmem:[%s5679_s29 + $0x208] ss:$16 sps:$4 sm:$0xff]  }
 0x540   : > { %3297 = vmatmul.mubr.bf16.gmra.mrb[28].mxu0 %v5203_v57  ;;  %v6165_v57 = vpop.permute.xlu0 %2068 }
 0x541   : > { %3306 = vmatprep.mubr.bf16.mxu0 %v5204_v61  ;;  %v5233_v61 = vld [vmem:[%s5679_s29 + $0x228] ss:$16 sps:$4 sm:$0xff]  }
 0x548   : > { %3307 = vmatmul.mubr.bf16.gmra.mrb[32].mxu0 %v5206_v2  ;;  %v6169_v2 = vpop.permute.xlu0 %2078 }
 0x549   : > { %3316 = vmatprep.mubr.bf16.mxu0 %v5207_v16 }
 0x54c   : > { %v6171_v16 = vpop.permute.xlu0 %2088 }
 0x550   : > { %3317 = vmatmul.mubr.bf16.gmra.mrb[36].mxu0 %v5209_v4  ;;  %v5237_v4 = vld [vmem:[%s5679_s29 + $0x26c] ss:$16 sps:$4 sm:$0xff]  }
 0x551   : > { %3326 = vmatprep.mubr.bf16.mxu0 %v5210_v15  ;;  %v6175_v15 = vpop.permute.xlu0 %2098 }
 0x558   : > { %3327 = vmatmul.mubr.bf16.gmra.mrb[40].mxu0 %v5212_v18  ;;  %v5240_v18 = vld [vmem:[%s5679_s29 + $0x28c] ss:$16 sps:$4 sm:$0xff]  }
 0x559   : > { %3336 = vmatprep.mubr.bf16.mxu0 %v5213_v22  ;;  %v6179_v22 = vpop.permute.xlu0 %2108 }
 0x560   : > { %3337 = vmatmul.mubr.bf16.gmra.mrb[44].mxu0 %v5215_v24  ;;  %v5242_v24 = vld [vmem:[%s5679_s29 + $0x288] ss:$16 sps:$4 sm:$0xff]  }
 0x561   : > { %3346 = vmatprep.mubr.bf16.mxu0 %v5216_v31  ;;  %v5243_v31 = vld [vmem:[%s5679_s29 + $0x2ac] ss:$16 sps:$4 sm:$0xff]  }
 0x568   : > { %3347 = vmatmul.mubr.bf16.gmra.mrb[48].mxu0 %v5218_v13  ;;  %v6183_v13 = vpop.permute.xlu0 %2118 }
 0x569   : > { %3356 = vmatprep.mubr.bf16.mxu0 %v5219_v34  ;;  %v5245_v34 = vld [vmem:[%s5679_s29 + $0x2a8] ss:$16 sps:$4 sm:$0xff]  }
 0x56c   : > { %v6185_v37 = vpop.permute.xlu0 %2128 }
 0x570   : > { %3357 = vmatmul.mubr.bf16.gmra.mrb[52].mxu0 %v5221_v40  ;;  %v5246_v40 = vld [vmem:[%s5679_s29 + $0x2cc] ss:$16 sps:$4 sm:$0xff]  }
 0x571   : > { %3366 = vmatprep.mubr.bf16.mxu0 %v5222_v50  ;;  %v6189_v50 = vpop.permute.xlu0 %2138 }
 0x578   : > { %3367 = vmatmul.mubr.bf16.gmra.mrb[56].mxu0 %v5224_v42  ;;  %v5248_v42 = vld [vmem:[%s5679_s29 + $0x2c8] ss:$16 sps:$4 sm:$0xff]  }
 0x579   : > { %3376 = vmatprep.mubr.bf16.mxu0 %v5225_v49  ;;  %v5249_v49 = vld [vmem:[%s5679_s29 + $0x2ec] ss:$16 sps:$4 sm:$0xff]  }
 0x580   : > { %3377 = vmatmul.mubr.bf16.gmra.mrb[60].mxu0 %v5227_v54  ;;  %v6193_v54 = vpop.permute.xlu0 %2148 }
 0x581   : > { %3386 = vmatprep.mubr.bf16.mxu0 %v5228_v47  ;;  %v5251_v47 = vld [vmem:[%s5679_s29 + $0x2e8] ss:$16 sps:$4 sm:$0xff]  }
 0x588   : > { %3387 = vmatmul.mubr.bf16.gmra.mrb[64].mxu0 %v5230_v6  ;;  %v5252_v6 = vld [vmem:[%s5679_s29 + $0x30c] ss:$16 sps:$4 sm:$0xff]  }
 0x589   : > { %3396 = vmatprep.mubr.bf16.mxu0 %v5231_v59  ;;  %v6197_v59 = vpop.permute.xlu0 %2158 }
 0x590   : > { %3397 = vmatmul.mubr.bf16.gmra.mrb[68].mxu0 %v5233_v61  ;;  %v6199_v61 = vpop.permute.xlu0 %2168 }
 0x591   : > { %3406 = vmatprep.mubr.bf16.mxu0 %v5234_v12  ;;  %6836 = vst [vmem:[#allocation24_spill] sm:$0xff] %v6199_v61  ;;  %v5254_v12 = vld [vmem:[%s5679_s29 + $0x308] ss:$16 sps:$4 sm:$0xff]  }
 0x598   : > { %3407 = vmatmul.mubr.bf16.gmra.mrb[72].mxu0 %v5236_v7  ;;  %v5255_v7 = vld [vmem:[%s5679_s29 + $0x32c] ss:$16 sps:$4 sm:$0xff]  }
 0x599   : > { %3416 = vmatprep.mubr.bf16.mxu0 %v5237_v4  ;;  %v6203_v4 = vpop.permute.xlu0 %2178 }
 0x59a   : > { %6837 = vst [vmem:[#allocation25_spill] sm:$0xff] %v6203_v4  ;;  %v5266_v4 = vld [vmem:[%s5679_s29 + $0x388] ss:$16 sps:$4 sm:$0xff]  }
 0x5a0   : > { %3417 = vmatmul.mubr.bf16.gmra.mrb[76].mxu0 %v5239_v29  ;;  %v5257_v29 = vld [vmem:[%s5679_s29 + $0x328] ss:$16 sps:$4 sm:$0xff]  }
 0x5a1   : > { %3426 = vmatprep.mubr.bf16.mxu0 %v5240_v18  ;;  %v5258_v18 = vld [vmem:[%s5679_s29 + $0x34c] ss:$16 sps:$4 sm:$0xff]  }
 0x5a8   : > { %3427 = vmatmul.mubr.bf16.gmra.mrb[80].mxu0 %v5242_v24  ;;  %v6207_v24 = vpop.permute.xlu0 %2188 }
 0x5a9   : > { %3436 = vmatprep.mubr.bf16.mxu0 %v5243_v31  ;;  %6838 = vst [vmem:[#allocation26_spill] sm:$0xff] %v6207_v24  ;;  %v5260_v31 = vld [vmem:[%s5679_s29 + $0x348] ss:$16 sps:$4 sm:$0xff]  }
 0x5b0   : > { %3437 = vmatmul.mubr.bf16.gmra.mrb[84].mxu0 %v5245_v34  ;;  %v6210_v34 = vpop.permute.xlu0 %2198 }
 0x5b1   : > { %3446 = vmatprep.mubr.bf16.mxu0 %v5246_v40  ;;  %6839 = vst [vmem:[#allocation27_spill] sm:$0xff] %v6210_v34  ;;  %v5261_v40 = vld [vmem:[%s5679_s29 + $0x36c] ss:$16 sps:$4 sm:$0xff]  }
 0x5b8   : > { %3447 = vmatmul.mubr.bf16.gmra.mrb[88].mxu0 %v5248_v42 }
 0x5b9   : > { %3456 = vmatprep.mubr.bf16.mxu0 %v5249_v49  ;;  %v1889_v49 = vpop.permute.xlu0 %1888 }
 0x5bd   : > { %v1899_v48 = vpop.permute.xlu0 %1898 }
 0x5c0   : > { %3457 = vmatmul.mubr.bf16.gmra.mrb[92].mxu0 %v5251_v47 }
 0x5c1   : > { %3466 = vmatprep.mubr.bf16.mxu0 %v5252_v6 }
 0x5c8   : > { %3467 = vmatmul.mubr.bf16.gmra.mrb[96].mxu0 %v5254_v12  ;;  %v5263_v12 = vld [vmem:[%s5679_s29 + $0x368] ss:$16 sps:$4 sm:$0xff]  }
 0x5c9   : > { %3476 = vmatprep.mubr.bf16.mxu0 %v5255_v7 }
 0x5d0   : > { %3477 = vmatmul.mubr.bf16.gmra.mrb[100].mxu0 %v5257_v29 }
 0x5d1   : > { %3486 = vmatprep.mubr.bf16.mxu0 %v5258_v18 }
 0x5d8   : > { %3487 = vmatmul.mubr.bf16.gmra.mrb[104].mxu0 %v5260_v31 }
 0x5d9   : > { %3496 = vmatprep.mubr.bf16.mxu0 %v5261_v40 }
 0x5db   : > { %v3228_v42 = vpop.f32.mrb[0].mxu0 }
 0x5dc   : > { %v4714_v47 = vadd.f32 %v3228_v42, %v5936_v55  ;;  %v3230_v6 = vpop.f32.mrb[1].mxu0 }
 0x5dd   : > { %v4715_v7 = vadd.f32 %v3230_v6, %v5936_v55  ;;  %v3232_v10 = vpop.f32.mrb[2].mxu0 }
 0x5de   : > { %v3547_v63 = vmul.f32 0.2, %v4714_v47  ;;  %v4716_v52 = vadd.f32 %v3232_v10, %v1889_v49  ;;  %v3234_v29 = vpop.f32.mrb[3].mxu0 }
 0x5df   : > { %v3548_v18 = vmul.f32 0.2, %v4715_v7  ;;  %v4717_v51 = vadd.f32 %v3234_v29, %v1889_v49 }
 0x5e0   : > { %v3549_v46 = vmul.f32 0.2, %v4716_v52  ;;  %3497 = vmatmul.mubr.bf16.gmra.mrb[108].mxu0 %v5263_v12  ;;  %v3675_v40 = vmax.f32 %v4714_v47, %v3547_v63  ;;  %v5267_v12 = vld [vmem:[%s5679_s29 + $0x3ac] ss:$16 sps:$4 sm:$0xff]  }
 0x5e1   : > { %v3550_v31 = vmul.f32 0.2, %v4717_v51  ;;  %3506 = vmatprep.mubr.bf16.mxu0 %v5264_v0  ;;  %v3676_v42 = vmax.f32 %v4715_v7, %v3548_v18  ;;  %v1909_v18 = vpop.permute.xlu0 %1908 }
 0x5e2   : > { %v3677_v34 = vmax.f32 %v4716_v52, %v3549_v46 }
 0x5e3   : > { %v3678_v53 = vmax.f32 %v4717_v51, %v3550_v31  ;;  %v3238_v24 = vpop.f32.mrb[4].mxu0 }
 0x5e4   : > { %v6217_v55 = vpack.c.bf16 %v3677_v34, %v3675_v40  ;;  %v4718_v6 = vadd.f32 %v3238_v24, %v5940_v56  ;;  %v3240_v10 = vpop.f32.mrb[5].mxu0 }
 0x5e5   : > { %v4719_v45 = vadd.f32 %v3240_v10, %v5940_v56  ;;  %v3242_v49 = vpop.f32.mrb[6].mxu0  ;;  %v6222_v29 = vpack.c.bf16 %v3678_v53, %v3676_v42  ;;  %v5269_v42 = vld [vmem:[%s5679_s29 + $0x3a8] ss:$16 sps:$4 sm:$0xff]  }
 0x5e6   : > { %6840 = vst [vmem:[#allocation28_spill] sm:$0xff] %v6217_v55  ;;  %v3551_v61 = vmul.f32 0.2, %v4718_v6  ;;  %v4720_v0 = vadd.f32 %v3242_v49, %v1899_v48  ;;  %v3244_v63 = vpop.f32.mrb[7].mxu0 }
 0x5e7   : > { %v3552_v46 = vmul.f32 0.2, %v4719_v45  ;;  %v4721_v52 = vadd.f32 %v3244_v63, %v1899_v48  ;;  %3891 = vmatprep.subr.bf16.mxu0 %v6222_v29  ;;  %v5270_v63 = vld [vmem:[%s5679_s29 + $0x3cc] ss:$16 sps:$4 sm:$0xff]  }
 0x5e8   : > { %v3553_v51 = vmul.f32 0.2, %v4720_v0  ;;  %3507 = vmatmul.mubr.bf16.gmra.mrb[112].mxu0 %v5266_v4  ;;  %v3679_v56 = vmax.f32 %v4718_v6, %v3551_v61 }
 0x5e9   : > { %v3554_v34 = vmul.f32 0.2, %v4721_v52  ;;  %3892 = vmatpush1.bf16.msra.mxu0 %v6217_v55  ;;  %3516 = vmatprep.mubr.bf16.mxu0 %v5267_v12  ;;  %v3680_v53 = vmax.f32 %v4719_v45, %v3552_v46 }
 0x5ea   : > { %v3681_v24 = vmax.f32 %v4720_v0, %v3553_v51 }
 0x5eb   : > { %v3682_v47 = vmax.f32 %v4721_v52, %v3554_v34  ;;  %v3248_v7 = vpop.f32.mrb[8].mxu0 }
 0x5ec   : > { %v6227_v31 = vpack.c.bf16 %v3681_v24, %v3679_v56  ;;  %v4722_v48 = vadd.f32 %v3248_v7, %v5945_v58  ;;  %v3250_v40 = vpop.f32.mrb[9].mxu0  ;;  %v1919_v24 = vpop.permute.xlu0 %1918 }
 0x5ed   : > { %v4723_v10 = vadd.f32 %v3250_v40, %v5945_v58  ;;  %v3252_v4 = vpop.f32.mrb[10].mxu0  ;;  %v6232_v49 = vpack.c.bf16 %v3682_v47, %v3680_v53 }
 0x5ee   : > { %6841 = vst [vmem:[#allocation29_spill] sm:$0xff] %v6227_v31  ;;  %v3555_v55 = vmul.f32 0.2, %v4722_v48  ;;  %v4724_v12 = vadd.f32 %v3252_v4, %v1909_v18  ;;  %v3254_v61 = vpop.f32.mrb[11].mxu0 }
 0x5ef   : > { %v3556_v6 = vmul.f32 0.2, %v4723_v10  ;;  %v4725_v45 = vadd.f32 %v3254_v61, %v1909_v18  ;;  %3893 = vmatprep.subr.bf16.mxu0 %v6232_v49  ;;  %v5272_v18 = vld [vmem:[%s5679_s29 + $0x3c8] ss:$16 sps:$4 sm:$0xff]   ;;  %v5273_v61 = vld [vmem:[%s5679_s29 + $0x3ec] ss:$16 sps:$4 sm:$0xff]  }
 0x5f0   : > { %v3557_v0 = vmul.f32 0.2, %v4724_v12  ;;  %3517 = vmatmul.mubr.bf16.gmra.mrb[116].mxu0 %v5269_v42  ;;  %v3683_v58 = vmax.f32 %v4722_v48, %v3555_v55 }
 0x5f1   : > { %v3558_v46 = vmul.f32 0.2, %v4725_v45  ;;  %3894 = vmatpush1.bf16.msra.mxu0 %v6227_v31  ;;  %3526 = vmatprep.mubr.bf16.mxu0 %v5270_v63  ;;  %v3684_v51 = vmax.f32 %v4723_v10, %v3556_v6 }
 0x5f2   : > { %v3685_v52 = vmax.f32 %v4724_v12, %v3557_v0 }
 0x5f3   : > { %v3686_v34 = vmax.f32 %v4725_v45, %v3558_v46  ;;  %v3258_v56 = vpop.f32.mrb[12].mxu0 }
 0x5f4   : > { %v6237_v53 = vpack.c.bf16 %v3685_v52, %v3683_v58  ;;  %v4726_v47 = vadd.f32 %v3258_v56, %v5948_v60  ;;  %v3260_v7 = vpop.f32.mrb[13].mxu0  ;;  %v1929_v52 = vpop.permute.xlu0 %1928 }
 0x5f5   : > { %v4727_v40 = vadd.f32 %v3260_v7, %v5948_v60  ;;  %v3262_v42 = vpop.f32.mrb[14].mxu0  ;;  %v6242_v4 = vpack.c.bf16 %v3686_v34, %v3684_v51 }
 0x5f6   : > { %6842 = vst [vmem:[#allocation30_spill] sm:$0xff] %v6237_v53  ;;  %v3559_v31 = vmul.f32 0.2, %v4726_v47  ;;  %v4728_v63 = vadd.f32 %v3262_v42, %v1919_v24  ;;  %v3264_v55 = vpop.f32.mrb[15].mxu0 }
 0x5f7   : > { %v3560_v48 = vmul.f32 0.2, %v4727_v40  ;;  %v4729_v10 = vadd.f32 %v3264_v55, %v1919_v24  ;;  %3895 = vmatprep.subr.bf16.mxu0 %v6242_v4  ;;  %v5275_v24 = vld [vmem:[%s5679_s29 + $0x3e8] ss:$16 sps:$4 sm:$0xff]  }
 0x5f8   : > { %v3561_v12 = vmul.f32 0.2, %v4728_v63  ;;  %3527 = vmatmul.mubr.bf16.gmra.mrb[120].mxu0 %v5272_v18  ;;  %v3687_v45 = vmax.f32 %v4726_v47, %v3559_v31 }
 0x5f9   : > { %v3562_v6 = vmul.f32 0.2, %v4729_v10  ;;  %3896 = vmatpush1.bf16.msra.mxu0 %v6237_v53  ;;  %3536 = vmatprep.mubr.bf16.mxu0 %v5273_v61  ;;  %v3688_v0 = vmax.f32 %v4727_v40, %v3560_v48 }
 0x5fa   : > { %v3689_v60 = vmax.f32 %v4728_v63, %v3561_v12 }
 0x5fb   : > { %v3690_v46 = vmax.f32 %v4729_v10, %v3562_v6  ;;  %v3268_v58 = vpop.f32.mrb[16].mxu0 }
 0x5fc   : > { %v6247_v51 = vpack.c.bf16 %v3689_v60, %v3687_v45  ;;  %v4730_v34 = vadd.f32 %v3268_v58, %v5953_v62  ;;  %v3270_v56 = vpop.f32.mrb[17].mxu0  ;;  %v1939_v45 = vpop.permute.xlu0 %1938 }
 0x5fd   : > { %v4731_v7 = vadd.f32 %v3270_v56, %v5953_v62  ;;  %v3272_v42 = vpop.f32.mrb[18].mxu0  ;;  %v6252_v18 = vpack.c.bf16 %v3690_v46, %v3688_v0 }
 0x5fe   : > { %6843 = vst [vmem:[#allocation31_spill] sm:$0xff] %v6247_v51  ;;  %v3563_v55 = vmul.f32 0.2, %v4730_v34  ;;  %v4732_v53 = vadd.f32 %v3272_v42, %v1929_v52  ;;  %v3274_v61 = vpop.f32.mrb[19].mxu0 }
 0x5ff   : > { %v3564_v31 = vmul.f32 0.2, %v4731_v7  ;;  %v4733_v47 = vadd.f32 %v3274_v61, %v1929_v52  ;;  %3897 = vmatprep.subr.bf16.mxu0 %v6252_v18 }
 0x600   : > { %v3565_v40 = vmul.f32 0.2, %v4732_v53  ;;  %3537 = vmatmul.mubr.bf16.gmra.mrb[124].mxu0 %v5275_v24  ;;  %v3691_v48 = vmax.f32 %v4730_v34, %v3563_v55 }
 0x601   : > { %v3566_v63 = vmul.f32 0.2, %v4733_v47  ;;  %3898 = vmatpush1.bf16.msra.mxu0 %v6247_v51  ;;  %v3692_v12 = vmax.f32 %v4731_v7, %v3564_v31 }
 0x602   : > { %v3693_v10 = vmax.f32 %v4732_v53, %v3565_v40 }
 0x603   : > { %v3694_v6 = vmax.f32 %v4733_v47, %v3566_v63  ;;  %v3278_v62 = vpop.f32.mrb[20].mxu0 }
 0x604   : > { %v6256_v60 = vpack.c.bf16 %v3693_v10, %v3691_v48  ;;  %v4734_v0 = vadd.f32 %v3278_v62, %v5957_v1  ;;  %v3280_v46 = vpop.f32.mrb[21].mxu0 }
 0x605   : > { %v4735_v58 = vadd.f32 %v3280_v46, %v5957_v1  ;;  %v3282_v52 = vpop.f32.mrb[22].mxu0  ;;  %v6260_v56 = vpack.c.bf16 %v3694_v6, %v3692_v12  ;;  %v1949_v1 = vpop.permute.xlu0 %1948 }
 0x606   : > { %6844 = vst [vmem:[#allocation32_spill] sm:$0xff] %v6256_v60  ;;  %v3567_v24 = vmul.f32 0.2, %v4734_v0  ;;  %v4736_v42 = vadd.f32 %v3282_v52, %v1939_v45  ;;  %v3284_v61 = vpop.f32.mrb[23].mxu0 }
 0x607   : > { %v3568_v51 = vmul.f32 0.2, %v4735_v58  ;;  %v4737_v34 = vadd.f32 %v3284_v61, %v1939_v45  ;;  %3899 = vmatprep.subr.bf16.mxu0 %v6260_v56 }
 0x608   : > { %v3569_v53 = vmul.f32 0.2, %v4736_v42  ;;  %3900 = vmatpush1.bf16.msra.mxu0 %v6256_v60  ;;  %v3695_v55 = vmax.f32 %v4734_v0, %v3567_v24 }
 0x609   : > { %v3570_v7 = vmul.f32 0.2, %v4737_v34  ;;  %v3696_v47 = vmax.f32 %v4735_v58, %v3568_v51 }
 0x60a   : > { %v3697_v31 = vmax.f32 %v4736_v42, %v3569_v53 }
 0x60b   : > { %v3698_v40 = vmax.f32 %v4737_v34, %v3570_v7  ;;  %v3288_v63 = vpop.f32.mrb[24].mxu0 }
 0x60c   : > { %v6264_v48 = vpack.c.bf16 %v3697_v31, %v3695_v55  ;;  %v4738_v10 = vadd.f32 %v3288_v63, %v5961_v3  ;;  %v3290_v12 = vpop.f32.mrb[25].mxu0 }
 0x60d   : > { %v4739_v6 = vadd.f32 %v3290_v12, %v5961_v3  ;;  %v3292_v62 = vpop.f32.mrb[26].mxu0  ;;  %v6268_v45 = vpack.c.bf16 %v3698_v40, %v3696_v47  ;;  %v1959_v3 = vpop.permute.xlu0 %1958 }
 0x60e   : > { %6845 = vst [vmem:[#allocation33_spill] sm:$0xff] %v6264_v48  ;;  %v3571_v46 = vmul.f32 0.2, %v4738_v10  ;;  %v4740_v52 = vadd.f32 %v3292_v62, %v1949_v1  ;;  %v3294_v61 = vpop.f32.mrb[27].mxu0 }
 0x60f   : > { %v3572_v60 = vmul.f32 0.2, %v4739_v6  ;;  %v4741_v0 = vadd.f32 %v3294_v61, %v1949_v1  ;;  %3901 = vmatprep.subr.bf16.mxu0 %v6268_v45 }
 0x610   : > { %v3573_v51 = vmul.f32 0.2, %v4740_v52  ;;  %3902 = vmatpush1.bf16.msra.mxu0 %v6264_v48  ;;  %v3699_v24 = vmax.f32 %v4738_v10, %v3571_v46 }
 0x611   : > { %v3574_v58 = vmul.f32 0.2, %v4741_v0  ;;  %v3700_v34 = vmax.f32 %v4739_v6, %v3572_v60 }
 0x612   : > { %v3701_v42 = vmax.f32 %v4740_v52, %v3573_v51 }
 0x613   : > { %v3702_v53 = vmax.f32 %v4741_v0, %v3574_v58  ;;  %v3298_v7 = vpop.f32.mrb[28].mxu0 }
 0x614   : > { %v6272_v55 = vpack.c.bf16 %v3701_v42, %v3699_v24  ;;  %v4742_v31 = vadd.f32 %v3298_v7, %v5965_v5  ;;  %v3300_v47 = vpop.f32.mrb[29].mxu0 }
 0x615   : > { %v4743_v40 = vadd.f32 %v3300_v47, %v5965_v5  ;;  %v3302_v63 = vpop.f32.mrb[30].mxu0  ;;  %v6276_v1 = vpack.c.bf16 %v3702_v53, %v3700_v34  ;;  %v1969_v5 = vpop.permute.xlu0 %1968 }
 0x616   : > { %6846 = vst [vmem:[#allocation34_spill] sm:$0xff] %v6272_v55  ;;  %v3575_v12 = vmul.f32 0.2, %v4742_v31  ;;  %v4744_v62 = vadd.f32 %v3302_v63, %v1959_v3  ;;  %v3304_v61 = vpop.f32.mrb[31].mxu0 }
 0x617   : > { %v3576_v48 = vmul.f32 0.2, %v4743_v40  ;;  %v4745_v10 = vadd.f32 %v3304_v61, %v1959_v3  ;;  %3903 = vmatprep.subr.bf16.mxu0 %v6276_v1 }
 0x618   : > { %v3577_v60 = vmul.f32 0.2, %v4744_v62  ;;  %3904 = vmatpush1.bf16.msra.mxu0 %v6272_v55  ;;  %v3703_v46 = vmax.f32 %v4742_v31, %v3575_v12 }
 0x619   : > { %v3578_v6 = vmul.f32 0.2, %v4745_v10  ;;  %v3704_v0 = vmax.f32 %v4743_v40, %v3576_v48 }
 0x61a   : > { %v3705_v52 = vmax.f32 %v4744_v62, %v3577_v60 }
 0x61b   : > { %v3706_v51 = vmax.f32 %v4745_v10, %v3578_v6  ;;  %v3308_v58 = vpop.f32.mrb[32].mxu0 }
 0x61c   : > { %v6280_v24 = vpack.c.bf16 %v3705_v52, %v3703_v46  ;;  %v4746_v42 = vadd.f32 %v3308_v58, %v5970_v9  ;;  %v3310_v34 = vpop.f32.mrb[33].mxu0 }
 0x61d   : > { %v4747_v53 = vadd.f32 %v3310_v34, %v5970_v9  ;;  %v3312_v7 = vpop.f32.mrb[34].mxu0  ;;  %v6284_v3 = vpack.c.bf16 %v3706_v51, %v3704_v0  ;;  %v1979_v9 = vpop.permute.xlu0 %1978 }
 0x61e   : > { %6847 = vst [vmem:[#allocation35_spill] sm:$0xff] %v6280_v24  ;;  %v3579_v47 = vmul.f32 0.2, %v4746_v42  ;;  %v4748_v63 = vadd.f32 %v3312_v7, %v1969_v5  ;;  %v3314_v61 = vpop.f32.mrb[35].mxu0 }
 0x61f   : > { %v3580_v55 = vmul.f32 0.2, %v4747_v53  ;;  %v4749_v31 = vadd.f32 %v3314_v61, %v1969_v5  ;;  %3905 = vmatprep.subr.bf16.mxu0 %v6284_v3 }
 0x620   : > { %v3581_v48 = vmul.f32 0.2, %v4748_v63  ;;  %3906 = vmatpush1.bf16.msra.mxu0 %v6280_v24  ;;  %v3707_v12 = vmax.f32 %v4746_v42, %v3579_v47 }
 0x621   : > { %v3582_v40 = vmul.f32 0.2, %v4749_v31  ;;  %v3708_v10 = vmax.f32 %v4747_v53, %v3580_v55 }
 0x622   : > { %v3709_v62 = vmax.f32 %v4748_v63, %v3581_v48 }
 0x623   : > { %v3710_v60 = vmax.f32 %v4749_v31, %v3582_v40  ;;  %v3318_v6 = vpop.f32.mrb[36].mxu0 }
 0x624   : > { %v6288_v46 = vpack.c.bf16 %v3709_v62, %v3707_v12  ;;  %v4750_v52 = vadd.f32 %v3318_v6, %v5974_v11  ;;  %v3320_v0 = vpop.f32.mrb[37].mxu0 }
 0x625   : > { %v4751_v51 = vadd.f32 %v3320_v0, %v5974_v11  ;;  %v3322_v58 = vpop.f32.mrb[38].mxu0  ;;  %v6292_v5 = vpack.c.bf16 %v3710_v60, %v3708_v10  ;;  %v1989_v11 = vpop.permute.xlu0 %1988 }
 0x626   : > { %6848 = vst [vmem:[#allocation36_spill] sm:$0xff] %v6288_v46  ;;  %v3583_v34 = vmul.f32 0.2, %v4750_v52  ;;  %v4752_v7 = vadd.f32 %v3322_v58, %v1979_v9  ;;  %v3324_v61 = vpop.f32.mrb[39].mxu0 }
 0x627   : > { %v3584_v24 = vmul.f32 0.2, %v4751_v51  ;;  %v4753_v42 = vadd.f32 %v3324_v61, %v1979_v9  ;;  %3907 = vmatprep.subr.bf16.mxu0 %v6292_v5 }
 0x628   : > { %v3585_v55 = vmul.f32 0.2, %v4752_v7  ;;  %3908 = vmatpush1.bf16.msra.mxu0 %v6288_v46  ;;  %v3711_v47 = vmax.f32 %v4750_v52, %v3583_v34 }
 0x629   : > { %v3586_v53 = vmul.f32 0.2, %v4753_v42  ;;  %v3712_v31 = vmax.f32 %v4751_v51, %v3584_v24 }
 0x62a   : > { %v3713_v63 = vmax.f32 %v4752_v7, %v3585_v55 }
 0x62b   : > { %v3714_v48 = vmax.f32 %v4753_v42, %v3586_v53  ;;  %v3328_v40 = vpop.f32.mrb[40].mxu0 }
 0x62c   : > { %v6296_v12 = vpack.c.bf16 %v3713_v63, %v3711_v47  ;;  %v4754_v62 = vadd.f32 %v3328_v40, %v5978_v17  ;;  %v3330_v10 = vpop.f32.mrb[41].mxu0 }
 0x62d   : > { %v4755_v60 = vadd.f32 %v3330_v10, %v5978_v17  ;;  %v3332_v6 = vpop.f32.mrb[42].mxu0  ;;  %v6300_v9 = vpack.c.bf16 %v3714_v48, %v3712_v31  ;;  %v1999_v17 = vpop.permute.xlu0 %1998 }
 0x62e   : > { %6849 = vst [vmem:[#allocation37_spill] sm:$0xff] %v6296_v12  ;;  %v3587_v0 = vmul.f32 0.2, %v4754_v62  ;;  %v4756_v58 = vadd.f32 %v3332_v6, %v1989_v11  ;;  %v3334_v61 = vpop.f32.mrb[43].mxu0 }
 0x62f   : > { %v3588_v46 = vmul.f32 0.2, %v4755_v60  ;;  %v4757_v52 = vadd.f32 %v3334_v61, %v1989_v11  ;;  %3909 = vmatprep.subr.bf16.mxu0 %v6300_v9 }
 0x630   : > { %v3589_v24 = vmul.f32 0.2, %v4756_v58  ;;  %3910 = vmatpush1.bf16.msra.mxu0 %v6296_v12  ;;  %v3715_v34 = vmax.f32 %v4754_v62, %v3587_v0 }
 0x631   : > { %v3590_v51 = vmul.f32 0.2, %v4757_v52  ;;  %v3716_v42 = vmax.f32 %v4755_v60, %v3588_v46 }
 0x632   : > { %v3717_v7 = vmax.f32 %v4756_v58, %v3589_v24 }
 0x633   : > { %v3718_v55 = vmax.f32 %v4757_v52, %v3590_v51  ;;  %v3338_v53 = vpop.f32.mrb[44].mxu0 }
 0x634   : > { %v6304_v47 = vpack.c.bf16 %v3717_v7, %v3715_v34  ;;  %v4758_v63 = vadd.f32 %v3338_v53, %v5982_v19  ;;  %v3340_v31 = vpop.f32.mrb[45].mxu0 }
 0x635   : > { %v4759_v48 = vadd.f32 %v3340_v31, %v5982_v19  ;;  %v3342_v40 = vpop.f32.mrb[46].mxu0  ;;  %v6308_v11 = vpack.c.bf16 %v3718_v55, %v3716_v42  ;;  %v2009_v19 = vpop.permute.xlu0 %2008 }
 0x636   : > { %6850 = vst [vmem:[#allocation38_spill] sm:$0xff] %v6304_v47  ;;  %v3591_v10 = vmul.f32 0.2, %v4758_v63  ;;  %v4760_v6 = vadd.f32 %v3342_v40, %v1999_v17  ;;  %v3344_v61 = vpop.f32.mrb[47].mxu0 }
 0x637   : > { %v3592_v12 = vmul.f32 0.2, %v4759_v48  ;;  %v4761_v62 = vadd.f32 %v3344_v61, %v1999_v17  ;;  %3911 = vmatprep.subr.bf16.mxu0 %v6308_v11 }
 0x638   : > { %v3593_v46 = vmul.f32 0.2, %v4760_v6  ;;  %3912 = vmatpush1.bf16.msra.mxu0 %v6304_v47  ;;  %v3719_v0 = vmax.f32 %v4758_v63, %v3591_v10 }
 0x639   : > { %v3594_v60 = vmul.f32 0.2, %v4761_v62  ;;  %v3720_v52 = vmax.f32 %v4759_v48, %v3592_v12 }
 0x63a   : > { %v3721_v58 = vmax.f32 %v4760_v6, %v3593_v46 }
 0x63b   : > { %v3722_v24 = vmax.f32 %v4761_v62, %v3594_v60  ;;  %v3348_v51 = vpop.f32.mrb[48].mxu0 }
 0x63c   : > { %v6312_v34 = vpack.c.bf16 %v3721_v58, %v3719_v0  ;;  %v4762_v7 = vadd.f32 %v3348_v51, %v5987_v20  ;;  %v3350_v42 = vpop.f32.mrb[49].mxu0 }
 0x63d   : > { %v4763_v55 = vadd.f32 %v3350_v42, %v5987_v20  ;;  %v3352_v53 = vpop.f32.mrb[50].mxu0  ;;  %v6316_v17 = vpack.c.bf16 %v3722_v24, %v3720_v52  ;;  %v2019_v20 = vpop.permute.xlu0 %2018 }
 0x63e   : > { %6851 = vst [vmem:[#allocation39_spill] sm:$0xff] %v6312_v34  ;;  %v3595_v31 = vmul.f32 0.2, %v4762_v7  ;;  %v4764_v40 = vadd.f32 %v3352_v53, %v2009_v19  ;;  %v3354_v61 = vpop.f32.mrb[51].mxu0 }
 0x63f   : > { %v3596_v47 = vmul.f32 0.2, %v4763_v55  ;;  %v4765_v63 = vadd.f32 %v3354_v61, %v2009_v19  ;;  %3913 = vmatprep.subr.bf16.mxu0 %v6316_v17 }
 0x640   : > { %v3597_v12 = vmul.f32 0.2, %v4764_v40  ;;  %3914 = vmatpush1.bf16.msra.mxu0 %v6312_v34  ;;  %v3723_v10 = vmax.f32 %v4762_v7, %v3595_v31 }
 0x641   : > { %v3598_v48 = vmul.f32 0.2, %v4765_v63  ;;  %v3724_v62 = vmax.f32 %v4763_v55, %v3596_v47 }
 0x642   : > { %v3725_v6 = vmax.f32 %v4764_v40, %v3597_v12 }
 0x643   : > { %v3726_v46 = vmax.f32 %v4765_v63, %v3598_v48  ;;  %v3358_v60 = vpop.f32.mrb[52].mxu0 }
 0x644   : > { %v6320_v0 = vpack.c.bf16 %v3725_v6, %v3723_v10  ;;  %v4766_v58 = vadd.f32 %v3358_v60, %v5991_v21  ;;  %v3360_v52 = vpop.f32.mrb[53].mxu0 }
 0x645   : > { %v4767_v24 = vadd.f32 %v3360_v52, %v5991_v21  ;;  %v3362_v51 = vpop.f32.mrb[54].mxu0  ;;  %v6324_v19 = vpack.c.bf16 %v3726_v46, %v3724_v62  ;;  %v2029_v21 = vpop.permute.xlu0 %2028 }
 0x646   : > { %6852 = vst [vmem:[#allocation40_spill] sm:$0xff] %v6320_v0  ;;  %v3599_v42 = vmul.f32 0.2, %v4766_v58  ;;  %v4768_v53 = vadd.f32 %v3362_v51, %v2019_v20  ;;  %v3364_v61 = vpop.f32.mrb[55].mxu0 }
 0x647   : > { %v3600_v34 = vmul.f32 0.2, %v4767_v24  ;;  %v4769_v7 = vadd.f32 %v3364_v61, %v2019_v20  ;;  %3915 = vmatprep.subr.bf16.mxu0 %v6324_v19 }
 0x648   : > { %v3601_v47 = vmul.f32 0.2, %v4768_v53  ;;  %3916 = vmatpush1.bf16.msra.mxu0 %v6320_v0  ;;  %v3727_v31 = vmax.f32 %v4766_v58, %v3599_v42 }
 0x649   : > { %v3602_v55 = vmul.f32 0.2, %v4769_v7  ;;  %v3728_v63 = vmax.f32 %v4767_v24, %v3600_v34 }
 0x64a   : > { %v3729_v40 = vmax.f32 %v4768_v53, %v3601_v47 }
 0x64b   : > { %v3730_v12 = vmax.f32 %v4769_v7, %v3602_v55  ;;  %v3368_v48 = vpop.f32.mrb[56].mxu0 }
 0x64c   : > { %v6328_v10 = vpack.c.bf16 %v3729_v40, %v3727_v31  ;;  %v4770_v6 = vadd.f32 %v3368_v48, %v5995_v23  ;;  %v3370_v62 = vpop.f32.mrb[57].mxu0 }
 0x64d   : > { %v4771_v46 = vadd.f32 %v3370_v62, %v5995_v23  ;;  %v3372_v60 = vpop.f32.mrb[58].mxu0  ;;  %v6332_v20 = vpack.c.bf16 %v3730_v12, %v3728_v63  ;;  %v2039_v23 = vpop.permute.xlu0 %2038 }
 0x64e   : > { %6853 = vst [vmem:[#allocation41_spill] sm:$0xff] %v6328_v10  ;;  %v3603_v52 = vmul.f32 0.2, %v4770_v6  ;;  %v4772_v51 = vadd.f32 %v3372_v60, %v2029_v21  ;;  %v3374_v61 = vpop.f32.mrb[59].mxu0 }
 0x64f   : > { %v3604_v0 = vmul.f32 0.2, %v4771_v46  ;;  %v4773_v58 = vadd.f32 %v3374_v61, %v2029_v21  ;;  %3917 = vmatprep.subr.bf16.mxu0 %v6332_v20 }
 0x650   : > { %v3605_v34 = vmul.f32 0.2, %v4772_v51  ;;  %3918 = vmatpush1.bf16.msra.mxu0 %v6328_v10  ;;  %v3731_v42 = vmax.f32 %v4770_v6, %v3603_v52 }
 0x651   : > { %v3606_v24 = vmul.f32 0.2, %v4773_v58  ;;  %v3732_v7 = vmax.f32 %v4771_v46, %v3604_v0 }
 0x652   : > { %v3733_v53 = vmax.f32 %v4772_v51, %v3605_v34 }
 0x653   : > { %v3734_v47 = vmax.f32 %v4773_v58, %v3606_v24  ;;  %v3378_v55 = vpop.f32.mrb[60].mxu0 }
 0x654   : > { %v6336_v31 = vpack.c.bf16 %v3733_v53, %v3731_v42  ;;  %v4774_v40 = vadd.f32 %v3378_v55, %v5999_v27  ;;  %v3380_v63 = vpop.f32.mrb[61].mxu0 }
 0x655   : > { %v4775_v12 = vadd.f32 %v3380_v63, %v5999_v27  ;;  %v3382_v48 = vpop.f32.mrb[62].mxu0  ;;  %v6340_v21 = vpack.c.bf16 %v3734_v47, %v3732_v7 }
 0x656   : > { %v3607_v62 = vmul.f32 0.2, %v4774_v40  ;;  %v4776_v60 = vadd.f32 %v3382_v48, %v2039_v23  ;;  %v3384_v61 = vpop.f32.mrb[63].mxu0 }
 0x657   : > { %v3608_v10 = vmul.f32 0.2, %v4775_v12  ;;  %v4777_v6 = vadd.f32 %v3384_v61, %v2039_v23  ;;  %3919 = vmatprep.subr.bf16.mxu0 %v6340_v21 }
 0x658   : > { %v3609_v0 = vmul.f32 0.2, %v4776_v60  ;;  %3920 = vmatpush1.bf16.msra.mxu0 %v6336_v31  ;;  %v3735_v52 = vmax.f32 %v4774_v40, %v3607_v62 }
 0x659   : > { %v3610_v46 = vmul.f32 0.2, %v4777_v6  ;;  %v3736_v58 = vmax.f32 %v4775_v12, %v3608_v10 }
 0x65a   : > { %v3737_v51 = vmax.f32 %v4776_v60, %v3609_v0  ;;  %v5278_v60 = vld [vmem:[%s5702_s15 + $0xc] ss:$16 sps:$4 sm:$0xff]   ;;  %v5284_v0 = vld [vmem:[%s5702_s15 + $0x4] ss:$16 sps:$4 sm:$0xff]  }
 0x65b   : > { %v3738_v34 = vmax.f32 %v4777_v6, %v3610_v46  ;;  %v3388_v24 = vpop.f32.mrb[64].mxu0  ;;  %v5282_v6 = vld [vmem:[%s5702_s15] ss:$16 sps:$4 sm:$0xff]   ;;  %3966 = vmatprep.mubr.bf16.mxu1 %v5278_v60  ;;  %3923 = vmatprep.mubr.bf16.mxu0 %v5284_v0 }
 0x65c   : > { %v6344_v27 = vpack.c.bf16 %v3737_v51, %v3735_v52  ;;  %v4778_v42 = vadd.f32 %v3388_v24, %v6157_v8  ;;  %v3390_v53 = vpop.f32.mrb[65].mxu0 }
 0x65d   : > { %v4779_v7 = vadd.f32 %v3390_v53, %v6157_v8  ;;  %v3392_v47 = vpop.f32.mrb[66].mxu0  ;;  %v6348_v55 = vpack.c.bf16 %v3738_v34, %v3736_v58 }
 0x65e   : > { %v3611_v23 = vmul.f32 0.2, %v4778_v42  ;;  %v4780_v40 = vadd.f32 %v3392_v47, %v5873_v25  ;;  %v3394_v63 = vpop.f32.mrb[67].mxu0 }
 0x65f   : > { %v3612_v10 = vmul.f32 0.2, %v4779_v7  ;;  %v4781_v12 = vadd.f32 %v3394_v63, %v5873_v25  ;;  %3921 = vmatprep.subr.bf16.mxu0 %v6348_v55 }
 0x660   : > { %v3613_v48 = vmul.f32 0.2, %v4780_v40  ;;  %3922 = vmatpush1.bf16.msra.mxu0 %v6344_v27  ;;  %v3739_v61 = vmax.f32 %v4778_v42, %v3611_v23 }
 0x661   : > { %v3614_v62 = vmul.f32 0.2, %v4781_v12  ;;  %v3740_v46 = vmax.f32 %v4779_v7, %v3612_v10 }
 0x662   : > { %v3741_v8 = vmax.f32 %v4780_v40, %v3613_v48 }
 0x663   : > { %v3742_v52 = vmax.f32 %v4781_v12, %v3614_v62  ;;  %v3398_v51 = vpop.f32.mrb[68].mxu0  ;;  %3924 = vmatmul.mubr.bf16.vlgmr.msra.gmra.mrb[128].mxu0 %v5282_v6 }
 0x664   : > { %v6357_v58 = vpack.c.bf16 %v3741_v8, %v3739_v61  ;;  %v4782_v34 = vadd.f32 %v3398_v51, %v5877_v26  ;;  %v3400_v25 = vpop.f32.mrb[69].mxu0 }
 0x665   : > { %v4783_v24 = vadd.f32 %v3400_v25, %v5877_v26  ;;  %v3402_v53 = vpop.f32.mrb[70].mxu0  ;;  %v6361_v47 = vpack.c.bf16 %v3742_v52, %v3740_v46 }
 0x666   : > { %v3615_v42 = vmul.f32 0.2, %v4782_v34  ;;  %v4784_v23 = vadd.f32 %v3402_v53, %v6161_v14  ;;  %v3404_v40 = vpop.f32.mrb[71].mxu0 }
 0x667   : > { %v3616_v7 = vmul.f32 0.2, %v4783_v24  ;;  %v4785_v63 = vadd.f32 %v3404_v40, %v6161_v14  ;;  %3934 = vmatprep.subr.bf16.mxu1 %v6361_v47 }
 0x668   : > { %v3617_v10 = vmul.f32 0.2, %v4784_v23  ;;  %3935 = vmatpush1.bf16.msra.mxu1 %v6357_v58  ;;  %v3743_v48 = vmax.f32 %v4782_v34, %v3615_v42 }
 0x669   : > { %v3618_v12 = vmul.f32 0.2, %v4785_v63  ;;  %v3744_v26 = vmax.f32 %v4783_v24, %v3616_v7 }
 0x66a   : > { %v3745_v62 = vmax.f32 %v4784_v23, %v3617_v10 }
 0x66b   : > { %v3746_v60 = vmax.f32 %v4785_v63, %v3618_v12  ;;  %v3408_v61 = vpop.f32.mrb[72].mxu0 }
 0x66c   : > { %v6367_v8 = vpack.c.bf16 %v3745_v62, %v3743_v48  ;;  %v4786_v6 = vadd.f32 %v3408_v61, %v5880_v28  ;;  %v3410_v0 = vpop.f32.mrb[73].mxu0 }
 0x66d   : > { %v4787_v46 = vadd.f32 %v3410_v0, %v5880_v28  ;;  %v3412_v52 = vpop.f32.mrb[74].mxu0  ;;  %v6371_v14 = vpack.c.bf16 %v3746_v60, %v3744_v26 }
 0x66e   : > { %v3619_v51 = vmul.f32 0.2, %v4786_v6  ;;  %v4788_v25 = vadd.f32 %v3412_v52, %v6165_v57  ;;  %v3414_v53 = vpop.f32.mrb[75].mxu0 }
 0x66f   : > { %v3620_v40 = vmul.f32 0.2, %v4787_v46  ;;  %v4789_v34 = vadd.f32 %v3414_v53, %v6165_v57  ;;  %3936 = vmatprep.subr.bf16.mxu1 %v6371_v14 }
 0x670   : > { %v3621_v24 = vmul.f32 0.2, %v4788_v25  ;;  %3937 = vmatpush1.bf16.msra.mxu1 %v6367_v8  ;;  %v3747_v23 = vmax.f32 %v4786_v6, %v3619_v51 }
 0x671   : > { %v3622_v42 = vmul.f32 0.2, %v4789_v34  ;;  %v3748_v63 = vmax.f32 %v4787_v46, %v3620_v40 }
 0x672   : > { %v3749_v7 = vmax.f32 %v4788_v25, %v3621_v24 }
 0x673   : > { %v3750_v28 = vmax.f32 %v4789_v34, %v3622_v42  ;;  %v3418_v10 = vpop.f32.mrb[76].mxu0 }
 0x674   : > { %v6377_v12 = vpack.c.bf16 %v3749_v7, %v3747_v23  ;;  %v4790_v48 = vadd.f32 %v3418_v10, %v5884_v30  ;;  %v3420_v62 = vpop.f32.mrb[77].mxu0 }
 0x675   : > { %v4791_v26 = vadd.f32 %v3420_v62, %v5884_v30  ;;  %v3422_v60 = vpop.f32.mrb[78].mxu0  ;;  %v6381_v57 = vpack.c.bf16 %v3750_v28, %v3748_v63 }
 0x676   : > { %v3623_v61 = vmul.f32 0.2, %v4790_v48  ;;  %v4792_v0 = vadd.f32 %v3422_v60, %v6169_v2  ;;  %v3424_v52 = vpop.f32.mrb[79].mxu0 }
 0x677   : > { %v3624_v53 = vmul.f32 0.2, %v4791_v26  ;;  %v4793_v6 = vadd.f32 %v3424_v52, %v6169_v2  ;;  %3938 = vmatprep.subr.bf16.mxu1 %v6381_v57 }
 0x678   : > { %v3625_v46 = vmul.f32 0.2, %v4792_v0  ;;  %3939 = vmatpush1.bf16.msra.mxu1 %v6377_v12  ;;  %v3751_v25 = vmax.f32 %v4790_v48, %v3623_v61 }
 0x679   : > { %v3626_v51 = vmul.f32 0.2, %v4793_v6  ;;  %v3752_v34 = vmax.f32 %v4791_v26, %v3624_v53 }
 0x67a   : > { %v3753_v40 = vmax.f32 %v4792_v0, %v3625_v46 }
 0x67b   : > { %v3754_v30 = vmax.f32 %v4793_v6, %v3626_v51  ;;  %v3428_v24 = vpop.f32.mrb[80].mxu0 }
 0x67c   : > { %v6387_v42 = vpack.c.bf16 %v3753_v40, %v3751_v25  ;;  %v4794_v23 = vadd.f32 %v3428_v24, %v5887_v32  ;;  %v3430_v7 = vpop.f32.mrb[81].mxu0 }
 0x67d   : > { %v4795_v63 = vadd.f32 %v3430_v7, %v5887_v32  ;;  %v3432_v28 = vpop.f32.mrb[82].mxu0  ;;  %v6391_v2 = vpack.c.bf16 %v3754_v30, %v3752_v34 }
 0x67e   : > { %v3627_v10 = vmul.f32 0.2, %v4794_v23  ;;  %v4796_v62 = vadd.f32 %v3432_v28, %v6171_v16  ;;  %v3434_v60 = vpop.f32.mrb[83].mxu0 }
 0x67f   : > { %v3628_v52 = vmul.f32 0.2, %v4795_v63  ;;  %v4797_v48 = vadd.f32 %v3434_v60, %v6171_v16  ;;  %3940 = vmatprep.subr.bf16.mxu1 %v6391_v2 }
 0x680   : > { %v3629_v26 = vmul.f32 0.2, %v4796_v62  ;;  %3941 = vmatpush1.bf16.msra.mxu1 %v6387_v42  ;;  %v3755_v0 = vmax.f32 %v4794_v23, %v3627_v10 }
 0x681   : > { %v3630_v61 = vmul.f32 0.2, %v4797_v48  ;;  %v3756_v6 = vmax.f32 %v4795_v63, %v3628_v52 }
 0x682   : > { %v3757_v53 = vmax.f32 %v4796_v62, %v3629_v26 }
 0x683   : > { %v3758_v32 = vmax.f32 %v4797_v48, %v3630_v61  ;;  %v3438_v46 = vpop.f32.mrb[84].mxu0 }
 0x684   : > { %v6397_v51 = vpack.c.bf16 %v3757_v53, %v3755_v0  ;;  %v4798_v25 = vadd.f32 %v3438_v46, %v5891_v33  ;;  %v3440_v40 = vpop.f32.mrb[85].mxu0 }
 0x685   : > { %v4799_v34 = vadd.f32 %v3440_v40, %v5891_v33  ;;  %v3442_v30 = vpop.f32.mrb[86].mxu0  ;;  %v6401_v16 = vpack.c.bf16 %v3758_v32, %v3756_v6 }
 0x686   : > { %v3631_v24 = vmul.f32 0.2, %v4798_v25  ;;  %v4800_v7 = vadd.f32 %v3442_v30, %v6175_v15  ;;  %v3444_v28 = vpop.f32.mrb[87].mxu0 }
 0x687   : > { %v3632_v60 = vmul.f32 0.2, %v4799_v34  ;;  %v4801_v23 = vadd.f32 %v3444_v28, %v6175_v15  ;;  %3942 = vmatprep.subr.bf16.mxu1 %v6401_v16 }
 0x688   : > { %v3633_v63 = vmul.f32 0.2, %v4800_v7  ;;  %3943 = vmatpush1.bf16.msra.mxu1 %v6397_v51  ;;  %v3759_v62 = vmax.f32 %v4798_v25, %v3631_v24 }
 0x689   : > { %v3634_v10 = vmul.f32 0.2, %v4801_v23  ;;  %v3760_v48 = vmax.f32 %v4799_v34, %v3632_v60 }
 0x68a   : > { %v3761_v52 = vmax.f32 %v4800_v7, %v3633_v63 }
 0x68b   : > { %v3762_v33 = vmax.f32 %v4801_v23, %v3634_v10  ;;  %v3448_v26 = vpop.f32.mrb[88].mxu0 }
 0x68c   : > { %v6407_v61 = vpack.c.bf16 %v3761_v52, %v3759_v62  ;;  %v4802_v0 = vadd.f32 %v3448_v26, %v5894_v35  ;;  %v3450_v53 = vpop.f32.mrb[89].mxu0 }
 0x68d   : > { %v4803_v6 = vadd.f32 %v3450_v53, %v5894_v35  ;;  %v3452_v32 = vpop.f32.mrb[90].mxu0  ;;  %v6411_v15 = vpack.c.bf16 %v3762_v33, %v3760_v48 }
 0x68e   : > { %v3635_v46 = vmul.f32 0.2, %v4802_v0  ;;  %v4804_v40 = vadd.f32 %v3452_v32, %v6179_v22  ;;  %v3454_v30 = vpop.f32.mrb[91].mxu0 }
 0x68f   : > { %v3636_v28 = vmul.f32 0.2, %v4803_v6  ;;  %v4805_v25 = vadd.f32 %v3454_v30, %v6179_v22  ;;  %3944 = vmatprep.subr.bf16.mxu1 %v6411_v15 }
 0x690   : > { %v3637_v34 = vmul.f32 0.2, %v4804_v40  ;;  %3945 = vmatpush1.bf16.msra.mxu1 %v6407_v61  ;;  %v3763_v7 = vmax.f32 %v4802_v0, %v3635_v46 }
 0x691   : > { %v3638_v24 = vmul.f32 0.2, %v4805_v25  ;;  %v3764_v23 = vmax.f32 %v4803_v6, %v3636_v28 }
 0x692   : > { %v3765_v60 = vmax.f32 %v4804_v40, %v3637_v34 }
 0x693   : > { %v3766_v35 = vmax.f32 %v4805_v25, %v3638_v24  ;;  %v3458_v63 = vpop.f32.mrb[92].mxu0 }
 0x694   : > { %v6417_v10 = vpack.c.bf16 %v3765_v60, %v3763_v7  ;;  %v4806_v62 = vadd.f32 %v3458_v63, %v5898_v36  ;;  %v3460_v52 = vpop.f32.mrb[93].mxu0 }
 0x695   : > { %v4807_v48 = vadd.f32 %v3460_v52, %v5898_v36  ;;  %v3462_v33 = vpop.f32.mrb[94].mxu0  ;;  %v6421_v22 = vpack.c.bf16 %v3766_v35, %v3764_v23 }
 0x696   : > { %6854 = vst [vmem:[#allocation42_spill] sm:$0xff] %v6417_v10  ;;  %v3639_v26 = vmul.f32 0.2, %v4806_v62  ;;  %v4808_v53 = vadd.f32 %v3462_v33, %v6183_v13  ;;  %v3464_v32 = vpop.f32.mrb[95].mxu0 }
 0x697   : > { %v3640_v30 = vmul.f32 0.2, %v4807_v48  ;;  %v4809_v0 = vadd.f32 %v3464_v32, %v6183_v13  ;;  %3946 = vmatprep.subr.bf16.mxu1 %v6421_v22 }
 0x698   : > { %v3641_v6 = vmul.f32 0.2, %v4808_v53  ;;  %3947 = vmatpush1.bf16.msra.mxu1 %v6417_v10  ;;  %v3767_v40 = vmax.f32 %v4806_v62, %v3639_v26 }
 0x699   : > { %v3642_v46 = vmul.f32 0.2, %v4809_v0  ;;  %v3768_v25 = vmax.f32 %v4807_v48, %v3640_v30 }
 0x69a   : > { %v3769_v28 = vmax.f32 %v4808_v53, %v3641_v6 }
 0x69b   : > { %v3770_v36 = vmax.f32 %v4809_v0, %v3642_v46  ;;  %v3468_v34 = vpop.f32.mrb[96].mxu0 }
 0x69c   : > { %v6427_v24 = vpack.c.bf16 %v3769_v28, %v3767_v40  ;;  %v4810_v7 = vadd.f32 %v3468_v34, %v5901_v38  ;;  %v3470_v60 = vpop.f32.mrb[97].mxu0 }
 0x69d   : > { %v4811_v23 = vadd.f32 %v3470_v60, %v5901_v38  ;;  %v3472_v35 = vpop.f32.mrb[98].mxu0  ;;  %v6431_v13 = vpack.c.bf16 %v3770_v36, %v3768_v25 }
 0x69e   : > { %6855 = vst [vmem:[#allocation43_spill] sm:$0xff] %v6427_v24  ;;  %v3643_v63 = vmul.f32 0.2, %v4810_v7  ;;  %v4812_v52 = vadd.f32 %v3472_v35, %v6185_v37  ;;  %v3474_v33 = vpop.f32.mrb[99].mxu0 }
 0x69f   : > { %6856 = vst [vmem:[#allocation44_spill] sm:$0xff] %v6431_v13  ;;  %v3644_v32 = vmul.f32 0.2, %v4811_v23  ;;  %v4813_v62 = vadd.f32 %v3474_v33, %v6185_v37  ;;  %3948 = vmatprep.subr.bf16.mxu1 %v6431_v13 }
 0x6a0   : > { %v3645_v48 = vmul.f32 0.2, %v4812_v52  ;;  %3949 = vmatpush1.bf16.msra.mxu1 %v6427_v24  ;;  %v3771_v53 = vmax.f32 %v4810_v7, %v3643_v63 }
 0x6a1   : > { %v3646_v26 = vmul.f32 0.2, %v4813_v62  ;;  %v3772_v0 = vmax.f32 %v4811_v23, %v3644_v32 }
 0x6a2   : > { %v3773_v30 = vmax.f32 %v4812_v52, %v3645_v48 }
 0x6a3   : > { %v3774_v38 = vmax.f32 %v4813_v62, %v3646_v26  ;;  %v3478_v6 = vpop.f32.mrb[100].mxu0 }
 0x6a4   : > { %v6437_v46 = vpack.c.bf16 %v3773_v30, %v3771_v53  ;;  %v4814_v40 = vadd.f32 %v3478_v6, %v5906_v39  ;;  %v3480_v28 = vpop.f32.mrb[101].mxu0 }
 0x6a5   : > { %v4815_v25 = vadd.f32 %v3480_v28, %v5906_v39  ;;  %v3482_v36 = vpop.f32.mrb[102].mxu0  ;;  %v6441_v37 = vpack.c.bf16 %v3774_v38, %v3772_v0 }
 0x6a6   : > { %6857 = vst [vmem:[#allocation45_spill] sm:$0xff] %v6437_v46  ;;  %v3647_v34 = vmul.f32 0.2, %v4814_v40  ;;  %v4816_v60 = vadd.f32 %v3482_v36, %v6189_v50  ;;  %v3484_v35 = vpop.f32.mrb[103].mxu0 }
 0x6a7   : > { %v3648_v33 = vmul.f32 0.2, %v4815_v25  ;;  %v4817_v7 = vadd.f32 %v3484_v35, %v6189_v50  ;;  %3950 = vmatprep.subr.bf16.mxu1 %v6441_v37 }
 0x6a8   : > { %v3649_v23 = vmul.f32 0.2, %v4816_v60  ;;  %3951 = vmatpush1.bf16.msra.mxu1 %v6437_v46  ;;  %v3775_v52 = vmax.f32 %v4814_v40, %v3647_v34 }
 0x6a9   : > { %v3650_v63 = vmul.f32 0.2, %v4817_v7  ;;  %v3776_v62 = vmax.f32 %v4815_v25, %v3648_v33 }
 0x6aa   : > { %v3777_v32 = vmax.f32 %v4816_v60, %v3649_v23 }
 0x6ab   : > { %v3778_v39 = vmax.f32 %v4817_v7, %v3650_v63  ;;  %v3488_v48 = vpop.f32.mrb[104].mxu0 }
 0x6ac   : > { %v6447_v26 = vpack.c.bf16 %v3777_v32, %v3775_v52  ;;  %v4818_v53 = vadd.f32 %v3488_v48, %v5911_v41  ;;  %v3490_v30 = vpop.f32.mrb[105].mxu0 }
 0x6ad   : > { %v4819_v0 = vadd.f32 %v3490_v30, %v5911_v41  ;;  %v3492_v38 = vpop.f32.mrb[106].mxu0  ;;  %v6451_v50 = vpack.c.bf16 %v3778_v39, %v3776_v62 }
 0x6ae   : > { %v3651_v6 = vmul.f32 0.2, %v4818_v53  ;;  %v4820_v28 = vadd.f32 %v3492_v38, %v6193_v54  ;;  %v3494_v36 = vpop.f32.mrb[107].mxu0 }
 0x6af   : > { %v3652_v35 = vmul.f32 0.2, %v4819_v0  ;;  %v4821_v40 = vadd.f32 %v3494_v36, %v6193_v54  ;;  %3952 = vmatprep.subr.bf16.mxu1 %v6451_v50 }
 0x6b0   : > { %v3653_v25 = vmul.f32 0.2, %v4820_v28  ;;  %3953 = vmatpush1.bf16.msra.mxu1 %v6447_v26  ;;  %v3779_v60 = vmax.f32 %v4818_v53, %v3651_v6 }
 0x6b1   : > { %v3654_v34 = vmul.f32 0.2, %v4821_v40  ;;  %v3780_v7 = vmax.f32 %v4819_v0, %v3652_v35 }
 0x6b2   : > { %v3781_v33 = vmax.f32 %v4820_v28, %v3653_v25 }
 0x6b3   : > { %v3782_v41 = vmax.f32 %v4821_v40, %v3654_v34  ;;  %v3498_v23 = vpop.f32.mrb[108].mxu0 }
 0x6b4   : > { %v6457_v63 = vpack.c.bf16 %v3781_v33, %v3779_v60  ;;  %v4822_v52 = vadd.f32 %v3498_v23, %v5914_v43  ;;  %v3500_v32 = vpop.f32.mrb[109].mxu0 }
 0x6b5   : > { %v4823_v62 = vadd.f32 %v3500_v32, %v5914_v43  ;;  %v3502_v39 = vpop.f32.mrb[110].mxu0  ;;  %v6461_v54 = vpack.c.bf16 %v3782_v41, %v3780_v7  ;;  %v6862_v32 = vld [vmem:[#allocation24_spill] sm:$0xff] }
 0x6b6   : > { %6858 = vst [vmem:[#allocation46_spill] sm:$0xff] %v6457_v63  ;;  %v3655_v48 = vmul.f32 0.2, %v4822_v52  ;;  %v4824_v30 = vadd.f32 %v3502_v39, %v6197_v59  ;;  %v3504_v38 = vpop.f32.mrb[111].mxu0 }
 0x6b7   : > { %6859 = vst [vmem:[#allocation47_spill] sm:$0xff] %v6461_v54  ;;  %v3656_v36 = vmul.f32 0.2, %v4823_v62  ;;  %v4825_v53 = vadd.f32 %v3504_v38, %v6197_v59  ;;  %3954 = vmatprep.subr.bf16.mxu1 %v6461_v54 }
 0x6b8   : > { %v3657_v0 = vmul.f32 0.2, %v4824_v30  ;;  %3955 = vmatpush1.bf16.msra.mxu1 %v6457_v63  ;;  %v3783_v28 = vmax.f32 %v4822_v52, %v3655_v48 }
 0x6b9   : > { %v3658_v6 = vmul.f32 0.2, %v4825_v53  ;;  %v3784_v40 = vmax.f32 %v4823_v62, %v3656_v36 }
 0x6ba   : > { %v3785_v35 = vmax.f32 %v4824_v30, %v3657_v0 }
 0x6bb   : > { %v3786_v43 = vmax.f32 %v4825_v53, %v3658_v6  ;;  %v3508_v25 = vpop.f32.mrb[112].mxu0 }
 0x6bc   : > { %v6467_v34 = vpack.c.bf16 %v3785_v35, %v3783_v28  ;;  %v4826_v60 = vadd.f32 %v3508_v25, %v5919_v44  ;;  %v3510_v33 = vpop.f32.mrb[113].mxu0  ;;  %v6864_v28 = vld [vmem:[#allocation21_spill] sm:$0xff] }
 0x6bd   : > { %v4827_v7 = vadd.f32 %v3510_v33, %v5919_v44  ;;  %v3512_v41 = vpop.f32.mrb[114].mxu0  ;;  %v6471_v59 = vpack.c.bf16 %v3786_v43, %v3784_v40 }
 0x6be   : > { %6860 = vst [vmem:[#allocation48_spill] sm:$0xff] %v6467_v34  ;;  %v3659_v23 = vmul.f32 0.2, %v4826_v60  ;;  %v4828_v39 = vadd.f32 %v3512_v41, %v6862_v32  ;;  %v3514_v38 = vpop.f32.mrb[115].mxu0 }
 0x6bf   : > { %6861 = vst [vmem:[#allocation49_spill] sm:$0xff] %v6471_v59  ;;  %v3660_v63 = vmul.f32 0.2, %v4827_v7  ;;  %v4829_v52 = vadd.f32 %v3514_v38, %v6862_v32  ;;  %3956 = vmatprep.subr.bf16.mxu1 %v6471_v59  ;;  %v6866_v32 = vld [vmem:[#allocation25_spill] sm:$0xff] }
 0x6c0   : > { %v3661_v62 = vmul.f32 0.2, %v4828_v39  ;;  %3957 = vmatpush1.bf16.msra.mxu1 %v6467_v34  ;;  %v3787_v30 = vmax.f32 %v4826_v60, %v3659_v23 }
 0x6c1   : > { %v3662_v48 = vmul.f32 0.2, %v4829_v52  ;;  %v3788_v53 = vmax.f32 %v4827_v7, %v3660_v63 }
 0x6c2   : > { %v3789_v36 = vmax.f32 %v4828_v39, %v3661_v62 }
 0x6c3   : > { %v3790_v44 = vmax.f32 %v4829_v52, %v3662_v48  ;;  %v3518_v0 = vpop.f32.mrb[116].mxu0 }
 0x6c4   : > { %v6477_v6 = vpack.c.bf16 %v3789_v36, %v3787_v30  ;;  %v4830_v35 = vadd.f32 %v3518_v0, %v6864_v28  ;;  %v3520_v40 = vpop.f32.mrb[117].mxu0  ;;  %v6868_v36 = vld [vmem:[#allocation22_spill] sm:$0xff] }
 0x6c5   : > { %v4831_v43 = vadd.f32 %v3520_v40, %v6864_v28  ;;  %v3522_v25 = vpop.f32.mrb[118].mxu0  ;;  %v6481_v33 = vpack.c.bf16 %v3790_v44, %v3788_v53 }
 0x6c6   : > { %6863 = vst [vmem:[#allocation24_spill] sm:$0xff] %v6477_v6  ;;  %v3663_v41 = vmul.f32 0.2, %v4830_v35  ;;  %v4832_v38 = vadd.f32 %v3522_v25, %v6866_v32  ;;  %v3524_v34 = vpop.f32.mrb[119].mxu0  ;;  %v6869_v25 = vld [vmem:[#allocation26_spill] sm:$0xff] }
 0x6c7   : > { %6865 = vst [vmem:[#allocation21_spill] sm:$0xff] %v6481_v33  ;;  %v3664_v59 = vmul.f32 0.2, %v4831_v43  ;;  %v4833_v60 = vadd.f32 %v3524_v34, %v6866_v32  ;;  %3958 = vmatprep.subr.bf16.mxu1 %v6481_v33 }
 0x6c8   : > { %v3665_v63 = vmul.f32 0.2, %v4832_v38  ;;  %3959 = vmatpush1.bf16.msra.mxu1 %v6477_v6  ;;  %v3791_v23 = vmax.f32 %v4830_v35, %v3663_v41 }
 0x6c9   : > { %v3666_v7 = vmul.f32 0.2, %v4833_v60  ;;  %v3792_v52 = vmax.f32 %v4831_v43, %v3664_v59 }
 0x6ca   : > { %v3793_v39 = vmax.f32 %v4832_v38, %v3665_v63 }
 0x6cb   : > { %v3794_v62 = vmax.f32 %v4833_v60, %v3666_v7  ;;  %v3528_v48 = vpop.f32.mrb[120].mxu0 }
 0x6cc   : > { %v6487_v30 = vpack.c.bf16 %v3793_v39, %v3791_v23  ;;  %v4834_v53 = vadd.f32 %v3528_v48, %v6868_v36  ;;  %v3530_v44 = vpop.f32.mrb[121].mxu0  ;;  %v6870_v39 = vld [vmem:[#allocation23_spill] sm:$0xff] }
 0x6cd   : > { %v4835_v0 = vadd.f32 %v3530_v44, %v6868_v36  ;;  %v3532_v28 = vpop.f32.mrb[122].mxu0  ;;  %v6491_v34 = vpack.c.bf16 %v3794_v62, %v3792_v52 }
 0x6ce   : > { %6867 = vst [vmem:[#allocation25_spill] sm:$0xff] %v6487_v30  ;;  %v3667_v40 = vmul.f32 0.2, %v4834_v53  ;;  %v4836_v32 = vadd.f32 %v3532_v28, %v6869_v25  ;;  %v3534_v6 = vpop.f32.mrb[123].mxu0  ;;  %v6871_v28 = vld [vmem:[#allocation27_spill] sm:$0xff] }
 0x6cf   : > { %v3668_v33 = vmul.f32 0.2, %v4835_v0  ;;  %v4837_v35 = vadd.f32 %v3534_v6, %v6869_v25  ;;  %3960 = vmatprep.subr.bf16.mxu1 %v6491_v34 }
 0x6d0   : > { %v3669_v59 = vmul.f32 0.2, %v4836_v32  ;;  %3961 = vmatpush1.bf16.msra.mxu1 %v6487_v30  ;;  %v3795_v41 = vmax.f32 %v4834_v53, %v3667_v40 }
 0x6d1   : > { %v3670_v43 = vmul.f32 0.2, %v4837_v35  ;;  %v3796_v60 = vmax.f32 %v4835_v0, %v3668_v33 }
 0x6d2   : > { %v3797_v38 = vmax.f32 %v4836_v32, %v3669_v59 }
 0x6d3   : > { %v3798_v63 = vmax.f32 %v4837_v35, %v3670_v43  ;;  %v3538_v7 = vpop.f32.mrb[124].mxu0 }
 0x6d4   : > { %v6497_v23 = vpack.c.bf16 %v3797_v38, %v3795_v41  ;;  %v4838_v52 = vadd.f32 %v3538_v7, %v6870_v39  ;;  %v3540_v62 = vpop.f32.mrb[125].mxu0  ;;  %v6873_v7 = vld [vmem:[#allocation29_spill] sm:$0xff] }
 0x6d5   : > { %v4839_v48 = vadd.f32 %v3540_v62, %v6870_v39  ;;  %v3542_v36 = vpop.f32.mrb[126].mxu0  ;;  %v6501_v6 = vpack.c.bf16 %v3798_v63, %v3796_v60  ;;  %v5276_v60 = vld [vmem:[%s5702_s15 + $0x8] ss:$16 sps:$4 sm:$0xff]  }
 0x6d6   : > { %v3671_v44 = vmul.f32 0.2, %v4838_v52  ;;  %v4840_v25 = vadd.f32 %v3542_v36, %v6871_v28  ;;  %v3544_v30 = vpop.f32.mrb[127].mxu0  ;;  %v6872_v63 = vld [vmem:[#allocation28_spill] sm:$0xff]  ;;  %v6874_v39 = vld [vmem:[#allocation30_spill] sm:$0xff] }
 0x6d7   : > { %v3672_v53 = vmul.f32 0.2, %v4839_v48  ;;  %v4841_v33 = vadd.f32 %v3544_v30, %v6871_v28  ;;  %3962 = vmatprep.subr.bf16.mxu1 %v6501_v6  ;;  %v5281_v30 = vld [vmem:[%s5702_s15 + $0x44] ss:$16 sps:$4 sm:$0xff]   ;;  %v6876_v62 = vld [vmem:[#allocation32_spill] sm:$0xff]  ;;  %v6878_v36 = vld [vmem:[#allocation34_spill] sm:$0xff] }
 0x6d8   : > { %v3673_v0 = vmul.f32 0.2, %v4840_v25  ;;  %3963 = vmatpush1.bf16.msra.mxu1 %v6497_v23  ;;  %v3799_v32 = vmax.f32 %v4838_v52, %v3671_v44  ;;  %v6875_v52 = vld [vmem:[#allocation31_spill] sm:$0xff]  ;;  %v6880_v28 = vld [vmem:[#allocation36_spill] sm:$0xff] }
 0x6d9   : > { %v3674_v40 = vmul.f32 0.2, %v4841_v33  ;;  %v3800_v59 = vmax.f32 %v4839_v48, %v3672_v53  ;;  %v6877_v48 = vld [vmem:[#allocation33_spill] sm:$0xff]  ;;  %v6879_v44 = vld [vmem:[#allocation35_spill] sm:$0xff]  ;;  %v6882_v53 = vld [vmem:[#allocation38_spill] sm:$0xff] }
 0x6da   : > { %v3801_v35 = vmax.f32 %v4840_v25, %v3673_v0  ;;  %v6881_v25 = vld [vmem:[#allocation37_spill] sm:$0xff]  ;;  %v6884_v0 = vld [vmem:[#allocation40_spill] sm:$0xff] }
 0x6db   : > { %v3802_v43 = vmax.f32 %v4841_v33, %v3674_v40  ;;  %v6883_v33 = vld [vmem:[#allocation39_spill] sm:$0xff]  ;;  %v6885_v40 = vld [vmem:[#allocation41_spill] sm:$0xff] }
 0x6dc   : > { %v6507_v41 = vpack.c.bf16 %v3801_v35, %v3799_v32  ;;  %v5279_v32 = vld [vmem:[%s5702_s15 + $0x40] ss:$16 sps:$4 sm:$0xff]   ;;  %v5287_v35 = vld [vmem:[%s5702_s15 + $0x4c] ss:$16 sps:$4 sm:$0xff]  }
 0x6dd   : > { %v6509_v38 = vpack.c.bf16 %v3802_v43, %v3800_v59 }
 0x6df   : > { %3964 = vmatprep.subr.bf16.mxu1 %v6509_v38 }
 0x6e0   : > { %3965 = vmatpush1.bf16.msra.mxu1 %v6507_v41 }
 0x6e1   : > { %4007 = vmatprep.subr.bf16.mxu1 %v6222_v29 }
 0x6e3   : > { %3967 = vmatmul.mubr.bf16.vlgmr.msra.gmra.mrb[132].mxu1 %v5276_v60 }
 0x6e4   : > { %4008 = vmatpush1.bf16.msra.mxu1 %v6872_v63  ;;  %4039 = vmatprep.mubr.bf16.mxu1 %v5281_v30 }
 0x6e5   : > { %4009 = vmatprep.subr.bf16.mxu1 %v6232_v49 }
 0x6e8   : > { %4010 = vmatpush1.bf16.msra.mxu1 %v6873_v7 }
 0x6e9   : > { %4011 = vmatprep.subr.bf16.mxu1 %v6242_v4 }
 0x6ec   : > { %4012 = vmatpush1.bf16.msra.mxu1 %v6874_v39 }
 0x6ed   : > { %4013 = vmatprep.subr.bf16.mxu1 %v6252_v18 }
 0x6f0   : > { %4014 = vmatpush1.bf16.msra.mxu1 %v6875_v52 }
 0x6f1   : > { %4015 = vmatprep.subr.bf16.mxu1 %v6260_v56 }
 0x6f4   : > { %4016 = vmatpush1.bf16.msra.mxu1 %v6876_v62 }
 0x6f5   : > { %4017 = vmatprep.subr.bf16.mxu1 %v6268_v45 }
 0x6f8   : > { %4018 = vmatpush1.bf16.msra.mxu1 %v6877_v48 }
 0x6f9   : > { %4019 = vmatprep.subr.bf16.mxu1 %v6276_v1 }
 0x6fc   : > { %4020 = vmatpush1.bf16.msra.mxu1 %v6878_v36 }
 0x6fd   : > { %4021 = vmatprep.subr.bf16.mxu1 %v6284_v3 }
 0x700   : > { %4022 = vmatpush1.bf16.msra.mxu1 %v6879_v44 }
 0x701   : > { %4023 = vmatprep.subr.bf16.mxu1 %v6292_v5 }
 0x704   : > { %4024 = vmatpush1.bf16.msra.mxu1 %v6880_v28 }
 0x705   : > { %4025 = vmatprep.subr.bf16.mxu1 %v6300_v9 }
 0x708   : > { %4026 = vmatpush1.bf16.msra.mxu1 %v6881_v25 }
 0x709   : > { %4027 = vmatprep.subr.bf16.mxu1 %v6308_v11 }
 0x70c   : > { %4028 = vmatpush1.bf16.msra.mxu1 %v6882_v53 }
 0x70d   : > { %4029 = vmatprep.subr.bf16.mxu1 %v6316_v17 }
 0x710   : > { %4030 = vmatpush1.bf16.msra.mxu1 %v6883_v33 }
 0x711   : > { %4031 = vmatprep.subr.bf16.mxu1 %v6324_v19 }
 0x714   : > { %4032 = vmatpush1.bf16.msra.mxu1 %v6884_v0 }
 0x715   : > { %4033 = vmatprep.subr.bf16.mxu1 %v6332_v20 }
 0x718   : > { %4034 = vmatpush1.bf16.msra.mxu1 %v6885_v40 }
 0x719   : > { %4035 = vmatprep.subr.bf16.mxu1 %v6340_v21 }
 0x71c   : > { %4036 = vmatpush1.bf16.msra.mxu1 %v6336_v31 }
 0x71d   : > { %4037 = vmatprep.subr.bf16.mxu1 %v6348_v55 }
 0x720   : > { %4038 = vmatpush1.bf16.msra.mxu1 %v6344_v27 }
 0x721   : > { %4050 = vmatprep.subr.bf16.mxu1 %v6361_v47 }
 0x723   : > { %4040 = vmatmul.mubr.bf16.vlgmr.msra.gmra.mrb[136].mxu1 %v5279_v32  ;;  %v6886_v32 = vld [vmem:[#allocation46_spill] sm:$0xff] }
 0x724   : > { %4051 = vmatpush1.bf16.msra.mxu1 %v6357_v58  ;;  %4082 = vmatprep.mubr.bf16.mxu1 %v5287_v35  ;;  %v6887_v35 = vld [vmem:[#allocation49_spill] sm:$0xff] }
 0x725   : > { %4052 = vmatprep.subr.bf16.mxu1 %v6371_v14 }
 0x728   : > { %4053 = vmatpush1.bf16.msra.mxu1 %v6367_v8 }
 0x729   : > { %4054 = vmatprep.subr.bf16.mxu1 %v6381_v57 }
 0x72c   : > { %4055 = vmatpush1.bf16.msra.mxu1 %v6377_v12 }
 0x72d   : > { %4056 = vmatprep.subr.bf16.mxu1 %v6391_v2 }
 0x730   : > { %4057 = vmatpush1.bf16.msra.mxu1 %v6387_v42 }
 0x731   : > { %4058 = vmatprep.subr.bf16.mxu1 %v6401_v16 }
 0x734   : > { %4059 = vmatpush1.bf16.msra.mxu1 %v6397_v51 }
 0x735   : > { %4060 = vmatprep.subr.bf16.mxu1 %v6411_v15 }
 0x736   : > { %v6561_v59 = vpop.f32.mrb[128].mxu0 }
 0x737   : > { %v6564_v43 = vpop.f32.mrb[129].mxu0 }
 0x738   : > { %4061 = vmatpush1.bf16.msra.mxu1 %v6407_v61  ;;  %v6566_v60 = vpop.f32.mrb[130].mxu0 }
 0x739   : > { %4062 = vmatprep.subr.bf16.mxu1 %v6421_v22  ;;  %v6568_v30 = vpop.f32.mrb[131].mxu0 }
 0x73c   : > { %4063 = vmatpush1.bf16.msra.mxu1 %v6417_v10  ;;  %v6888_v10 = vld [vmem:[#allocation48_spill] sm:$0xff] }
 0x73d   : > { %4064 = vmatprep.subr.bf16.mxu1 %v6431_v13  ;;  %v6889_v13 = vld [vmem:[#allocation21_spill] sm:$0xff] }
 0x740   : > { %4065 = vmatpush1.bf16.msra.mxu1 %v6427_v24  ;;  %v6890_v24 = vld [vmem:[#allocation24_spill] sm:$0xff] }
 0x741   : > { %4066 = vmatprep.subr.bf16.mxu1 %v6441_v37 }
 0x744   : > { %4067 = vmatpush1.bf16.msra.mxu1 %v6437_v46  ;;  %v6891_v46 = vld [vmem:[#allocation25_spill] sm:$0xff] }
 0x745   : > { %4068 = vmatprep.subr.bf16.mxu1 %v6451_v50 }
 0x748   : > { %4069 = vmatpush1.bf16.msra.mxu1 %v6447_v26 }
 0x749   : > { %4070 = vmatprep.subr.bf16.mxu1 %v6461_v54  ;;  %v5285_v54 = vld [vmem:[%s5702_s15 + $0x48] ss:$16 sps:$4 sm:$0xff]  }
 0x74c   : > { %4071 = vmatpush1.bf16.msra.mxu1 %v6886_v32 }
 0x74d   : > { %4072 = vmatprep.subr.bf16.mxu1 %v6887_v35  ;;  %v5290_v35 = vld [vmem:[%s5702_s15 + $0x24] ss:$16 sps:$4 sm:$0xff]  }
 0x750   : > { %4073 = vmatpush1.bf16.msra.mxu1 %v6888_v10 }
 0x751   : > { %4074 = vmatprep.subr.bf16.mxu1 %v6889_v13 }
 0x754   : > { %4075 = vmatpush1.bf16.msra.mxu1 %v6890_v24 }
 0x755   : > { %4076 = vmatprep.subr.bf16.mxu1 %v6491_v34 }
 0x758   : > { %4077 = vmatpush1.bf16.msra.mxu1 %v6891_v46 }
 0x759   : > { %4078 = vmatprep.subr.bf16.mxu1 %v6501_v6 }
 0x75c   : > { %4079 = vmatpush1.bf16.msra.mxu1 %v6497_v23 }
 0x75d   : > { %4080 = vmatprep.subr.bf16.mxu1 %v6509_v38 }
 0x760   : > { %4081 = vmatpush1.bf16.msra.mxu1 %v6507_v41 }
 0x761   : > { %4129 = vmatprep.subr.bf16.mxu1 %v6222_v29  ;;  %v5288_v29 = vld [vmem:[%s5702_s15 + $0x20] ss:$16 sps:$4 sm:$0xff]  }
 0x763   : > { %4083 = vmatmul.mubr.bf16.vlgmr.msra.gmra.mrb[136].mxu1 %v5285_v54 }
 0x764   : > { %4130 = vmatpush1.bf16.msra.mxu1 %v6872_v63  ;;  %4161 = vmatprep.mubr.bf16.mxu1 %v5290_v35 }
 0x765   : > { %4131 = vmatprep.subr.bf16.mxu1 %v6232_v49  ;;  %v5293_v49 = vld [vmem:[%s5702_s15 + $0x2c] ss:$16 sps:$4 sm:$0xff]  }
 0x768   : > { %4132 = vmatpush1.bf16.msra.mxu1 %v6873_v7 }
 0x769   : > { %4133 = vmatprep.subr.bf16.mxu1 %v6242_v4 }
 0x76c   : > { %4134 = vmatpush1.bf16.msra.mxu1 %v6874_v39 }
 0x76d   : > { %4135 = vmatprep.subr.bf16.mxu1 %v6252_v18 }
 0x770   : > { %4136 = vmatpush1.bf16.msra.mxu1 %v6875_v52 }
 0x771   : > { %4137 = vmatprep.subr.bf16.mxu1 %v6260_v56 }
 0x774   : > { %4138 = vmatpush1.bf16.msra.mxu1 %v6876_v62 }
 0x775   : > { %4139 = vmatprep.subr.bf16.mxu1 %v6268_v45 }
 0x778   : > { %4140 = vmatpush1.bf16.msra.mxu1 %v6877_v48 }
 0x779   : > { %4141 = vmatprep.subr.bf16.mxu1 %v6276_v1 }
 0x77c   : > { %4142 = vmatpush1.bf16.msra.mxu1 %v6878_v36 }
 0x77d   : > { %4143 = vmatprep.subr.bf16.mxu1 %v6284_v3 }
 0x780   : > { %4144 = vmatpush1.bf16.msra.mxu1 %v6879_v44 }
 0x781   : > { %4145 = vmatprep.subr.bf16.mxu1 %v6292_v5 }
 0x784   : > { %4146 = vmatpush1.bf16.msra.mxu1 %v6880_v28 }
 0x785   : > { %4147 = vmatprep.subr.bf16.mxu1 %v6300_v9 }
 0x788   : > { %4148 = vmatpush1.bf16.msra.mxu1 %v6881_v25 }
 0x789   : > { %4149 = vmatprep.subr.bf16.mxu1 %v6308_v11  ;;  %v6892_v11 = vld [vmem:[#allocation42_spill] sm:$0xff] }
 0x78c   : > { %4150 = vmatpush1.bf16.msra.mxu1 %v6882_v53 }
 0x78d   : > { %4151 = vmatprep.subr.bf16.mxu1 %v6316_v17  ;;  %v6893_v17 = vld [vmem:[#allocation44_spill] sm:$0xff] }
 0x790   : > { %4152 = vmatpush1.bf16.msra.mxu1 %v6883_v33 }
 0x791   : > { %4153 = vmatprep.subr.bf16.mxu1 %v6324_v19  ;;  %v6894_v19 = vld [vmem:[#allocation43_spill] sm:$0xff] }
 0x794   : > { %4154 = vmatpush1.bf16.msra.mxu1 %v6884_v0 }
 0x795   : > { %4155 = vmatprep.subr.bf16.mxu1 %v6332_v20  ;;  %v6895_v20 = vld [vmem:[#allocation45_spill] sm:$0xff] }
 0x798   : > { %4156 = vmatpush1.bf16.msra.mxu1 %v6885_v40 }
 0x799   : > { %4157 = vmatprep.subr.bf16.mxu1 %v6340_v21  ;;  %v6897_v21 = vld [vmem:[#allocation49_spill] sm:$0xff] }
 0x79c   : > { %4158 = vmatpush1.bf16.msra.mxu1 %v6336_v31  ;;  %v6896_v31 = vld [vmem:[#allocation47_spill] sm:$0xff] }
 0x79d   : > { %4159 = vmatprep.subr.bf16.mxu1 %v6348_v55 }
 0x7a0   : > { %4160 = vmatpush1.bf16.msra.mxu1 %v6344_v27  ;;  %v5291_v27 = vld [vmem:[%s5702_s15 + $0x28] ss:$16 sps:$4 sm:$0xff]   ;;  %s4990_s15 = spop %4989 }
 0x7a1   : > { %4172 = vmatprep.subr.bf16.mxu1 %v6361_v47 }
 0x7a3   : > { %4162 = vmatmul.mubr.bf16.vlgmr.msra.gmra.mrb[140].mxu1 %v5288_v29 }
 0x7a4   : > { %4173 = vmatpush1.bf16.msra.mxu1 %v6357_v58  ;;  %4204 = vmatprep.mubr.bf16.mxu1 %v5293_v49 }
 0x7a5   : > { %4174 = vmatprep.subr.bf16.mxu1 %v6371_v14  ;;  %v4236_v14 = vld [vmem:[%s5700_s23 + $0x8] sm:$0xff] }
 0x7a8   : > { %4175 = vmatpush1.bf16.msra.mxu1 %v6367_v8 }
 0x7a9   : > { %4176 = vmatprep.subr.bf16.mxu1 %v6381_v57 }
 0x7ac   : > { %4177 = vmatpush1.bf16.msra.mxu1 %v6377_v12  ;;  %v4240_v12 = vpop.permute.xlu0 %4239 }
 0x7ad   : > { %4178 = vmatprep.subr.bf16.mxu1 %v6391_v2 }
 0x7b0   : > { %4179 = vmatpush1.bf16.msra.mxu1 %v6387_v42 }
 0x7b1   : > { %4180 = vmatprep.subr.bf16.mxu1 %v6401_v16 }
 0x7b4   : > { %4181 = vmatpush1.bf16.msra.mxu1 %v6397_v51 }
 0x7b5   : > { %4182 = vmatprep.subr.bf16.mxu1 %v6411_v15 }
 0x7b6   : > { %v3968_v4 = vpop.f32.mrb[132].mxu1 }
 0x7b7   : > { %v3969_v18 = vadd.f32 %v3968_v4, %v6561_v59  ;;  %v3970_v56 = vpop.f32.mrb[133].mxu1 }
 0x7b8   : > { %4183 = vmatpush1.bf16.msra.mxu1 %v6407_v61  ;;  %v3971_v45 = vadd.f32 %v3970_v56, %v6564_v43  ;;  %v3972_v1 = vpop.f32.mrb[134].mxu1 }
 0x7b9   : > { %4184 = vmatprep.subr.bf16.mxu1 %v6421_v22  ;;  %4093 = vrot.lane.b32.xlu0 %v3969_v18, %s5454_s2  ;;  %v3974_v3 = vpop.f32.mrb[135].mxu1  ;;  %v3973_v5 = vadd.f32 %v3972_v1, %v6566_v60 }
 0x7ba   : > { %v3975_v9 = vadd.f32 %v3974_v3, %v6568_v30 }
 0x7bc   : > { %4185 = vmatpush1.bf16.msra.mxu1 %v6892_v11 }
 0x7bd   : > { %4186 = vmatprep.subr.bf16.mxu1 %v6893_v17  ;;  %4097 = vrot.lane.b32.xlu0 %v3971_v45, %s5454_s2 }
 0x7c0   : > { %4187 = vmatpush1.bf16.msra.mxu1 %v6894_v19 }
 0x7c1   : > { %4188 = vmatprep.subr.bf16.mxu1 %v6441_v37  ;;  %v6900_v37 = vld [vmem:[#allocation18_spill] sm:$0xff] }
 0x7c4   : > { %4189 = vmatpush1.bf16.msra.mxu1 %v6895_v20  ;;  %v6903_v20 = vld [vmem:[#allocation14_spill] sm:$0xff] }
 0x7c5   : > { %4190 = vmatprep.subr.bf16.mxu1 %v6451_v50  ;;  %v6901_v50 = vld [vmem:[#allocation19_spill] sm:$0xff] }
 0x7c8   : > { %4191 = vmatpush1.bf16.msra.mxu1 %v6447_v26 }
 0x7c9   : > { %4192 = vmatprep.subr.bf16.mxu1 %v6896_v31 }
 0x7cc   : > { %4193 = vmatpush1.bf16.msra.mxu1 %v6886_v32 }
 0x7cd   : > { %4194 = vmatprep.subr.bf16.mxu1 %v6897_v21 }
 0x7d0   : > { %4195 = vmatpush1.bf16.msra.mxu1 %v6888_v10 }
 0x7d1   : > { %4196 = vmatprep.subr.bf16.mxu1 %v6889_v13 }
 0x7d4   : > { %4197 = vmatpush1.bf16.msra.mxu1 %v6890_v24  ;;  %v6899_v24 = vld [vmem:[#allocation17_spill] sm:$0xff] }
 0x7d5   : > { %4198 = vmatprep.subr.bf16.mxu1 %v6491_v34 }
 0x7d8   : > { %4199 = vmatpush1.bf16.msra.mxu1 %v6891_v46 }
 0x7d9   : > { %4200 = vmatprep.subr.bf16.mxu1 %v6501_v6  ;;  %v6902_v6 = vld [vmem:[#allocation20_spill] sm:$0xff] }
 0x7dc   : > { %4201 = vmatpush1.bf16.msra.mxu1 %v6497_v23 }
 0x7dd   : > { %4202 = vmatprep.subr.bf16.mxu1 %v6509_v38 }
 0x7e0   : > { %4203 = vmatpush1.bf16.msra.mxu1 %v6507_v41 }
 0x7e3   : > { %4205 = vmatmul.mubr.bf16.vlgmr.msra.gmra.mrb[140].mxu1 %v5291_v27  ;;  %v6904_v27 = vld [vmem:[#allocation15_spill] sm:$0xff] }
 0x82b   : > { %v4094_v57 = vpop.permute.xlu0 %4093 }
 0x82f   : > { %v4098_v42 = vpop.permute.xlu0 %4097 }
 0x830   : > { %v4103_v61 = vsel %vm642_vm3, %v4098_v42, %v4094_v57  ;;  %v4101_v15 = vsel %vm642_vm3, %v4094_v57, %v4098_v42 }
 0x831   : > { %v4105_v13 = vmul.f32 %v4103_v61, %v6899_v24  ;;  %v4106_v26 = vmul.f32 %v4101_v15, %v6900_v37  ;;  %v495_v61 = vld [vmem:[%s6730_s1] ss:$8 sm:$0x3]  ;;  %v4303_v15 = vstv %s4990_s15 }
 0x836   : > { %v4084_v55 = vpop.f32.mrb[136].mxu1 }
 0x837   : > { %4215 = vrot.lane.b32.xlu0 %v4084_v55, %s5453_s12  ;;  %v4086_v58 = vpop.f32.mrb[137].mxu1 }
 0x838   : > { %v4088_v47 = vpop.f32.mrb[138].mxu1 }
 0x839   : > { %v4090_v8 = vpop.f32.mrb[139].mxu1 }
 0x83a   : > { %4221 = vrot.lane.b32.xlu1 %v4090_v8, %s5453_s12 }
 0x83b   : > { %4219 = vrot.lane.b32.xlu0 %v4086_v58, %s5453_s12 }
 0x83f   : > { %4095 = vrot.lane.b32.xlu0 %v3973_v5, %s5454_s2 }
 0x843   : > { %4099 = vrot.lane.b32.xlu0 %v3975_v9, %s5454_s2 }
 0x847   : > { %4244 = vperm.xlu0 %5049, %v4236_v14  }
 0x84b   : > { %4217 = vrot.lane.b32.xlu0 %v4088_v47, %s5453_s12 }
 0x8a9   : > { %v4216_v2 = vpop.permute.xlu0 %4215 }
 0x8ac   : > { %v4222_v29 = vpop.permute.xlu1 %4221 }
 0x8ad   : > { %v4220_v51 = vpop.permute.xlu0 %4219 }
 0x8ae   : > { %v4223_v10 = vsel %vm662_vm4, %v4216_v2, %v4220_v51  ;;  %v4225_v22 = vsel %vm662_vm4, %v4220_v51, %v4216_v2 }
 0x8af   : > { %v4227_v54 = vmul.f32 %v4223_v10, %v6901_v50  ;;  %v4228_v41 = vmul.f32 %v4225_v22, %v6902_v6 }
 0x8b1   : > { %v4096_v48 = vpop.permute.xlu0 %4095 }
 0x8b5   : > { %v4100_v33 = vpop.permute.xlu0 %4099 }
 0x8b6   : > { %v4206_v46 = vpop.f32.mrb[140].mxu1  ;;  %v4104_v60 = vsel %vm642_vm3, %v4100_v33, %v4096_v48  ;;  %v4102_v32 = vsel %vm642_vm3, %v4096_v48, %v4100_v33  ;;  %v6908_v33 = vlaneseq }
 0x8b7   : > { %v4846_v34 = vadd.f32 %v4206_v46, %v4105_v13  ;;  %v4208_v23 = vpop.f32.mrb[141].mxu1  ;;  %v4107_v4 = vmul.f32 %v4104_v60, %v6899_v24  ;;  %v4108_v56 = vmul.f32 %v4102_v32, %v6900_v37  ;;  %v5455_v24 = vmov 1966171168  }
 0x8b8   : > { %v4847_v38 = vadd.f32 %v4208_v23, %v4106_v26  ;;  %v4210_v63 = vpop.f32.mrb[142].mxu1  ;;  %v4322_v13 = vunpack.c.l.s4 %v5455_v24  ;;  %v4304_v37 = vmul.f32 %v4303_v15, %v495_v61  ;;  %vm4339_vm7 = vcmp.lt.s32.totalorder %v6908_v33, 256 }
 0x8b9   : > { %v4231_v7 = vadd.f32 %v4846_v34, %v4227_v54  ;;  %v4212_v39 = vpop.f32.mrb[143].mxu1  ;;  %v4848_v3 = vadd.f32 %v4210_v63, %v4107_v4  ;;  %v6906_v63 = vld [vmem:[#allocation13_spill] sm:$0xff] }
 0x8ba   : > { %v4232_v52 = vadd.f32 %v4847_v38, %v4228_v41  ;;  %v4849_v5 = vadd.f32 %v4212_v39, %v4108_v56  ;;  %v4323_v34 = vunpack.c.0.s8 %v4322_v13 }
 0x8bb   : > { %v4247_v62 = vadd.f32 %v4240_v12, %v4231_v7  ;;  %v4313_v7 = vrot.slane %v4304_v37, %v6906_v63 }
 0x8bc   : > { %v4248_v36 = vadd.f32 %v4240_v12, %v4232_v52 }
 0x8bd   : > { %v4251_v44 = vadd.f32 2.0, %v4247_v62  ;;  %v6907_v62 = vld [vmem:[#allocation11_spill] sm:$0xff] }
 0x8be   : > { %v4252_v28 = vadd.f32 2.0, %v4248_v36  ;;  %v4326_v48 = vsub.s32 %v4323_v34, %v6907_v62 }
 0x8bf   : > { %v4705_v25 = vmul.f32 -1.442695, %v4251_v44 }
 0x8c0   : > { %v4706_v53 = vmul.f32 -1.442695, %v4252_v28 }
 0x8c1   : > { %5302 = vpow2.f32 %v4705_v25  ;;  %v4273_v25 = vld [vmem:[%s6738_s9] sm:$0x3] }
 0x8c2   : > { %5304 = vpow2.f32 %v4706_v53 }
 0x8c6   : > { %v4245_v0 = vpop.permute.xlu0 %4244 }
 0x8ca   : > { %v4218_v59 = vpop.permute.xlu0 %4217 }
 0x8cb   : > { %v5303_v40 = vpop.eup %5302  ;;  %v4224_v49 = vsel %vm662_vm4, %v4218_v59, %v4222_v29  ;;  %v4226_v18 = vsel %vm662_vm4, %v4222_v29, %v4218_v59 }
 0x8cc   : > { %v5305_v43 = vpop.eup %5304  ;;  %v4259_v30 = vadd.f32 1.0, %v5303_v40  ;;  %v4229_v45 = vmul.f32 %v4224_v49, %v6901_v50  ;;  %v4230_v1 = vmul.f32 %v4226_v18, %v6902_v6  ;;  %v6905_v6 = vld [vmem:[#allocation12_spill] sm:$0xff] }
 0x8cd   : > { %v4260_v35 = vadd.f32 1.0, %v5305_v43  ;;  %v4309_v41 = vrot.slane %v4304_v37, %v6905_v6 }
 0x8ce   : > { %5306 = vrcp.f32 %v4259_v30  ;;  %v4233_v9 = vadd.f32 %v4848_v3, %v4229_v45  ;;  %v4234_v11 = vadd.f32 %v4849_v5, %v4230_v1 }
 0x8cf   : > { %5308 = vrcp.f32 %v4260_v35 }
 0x8d0   : > { %v4249_v21 = vadd.f32 %v4245_v0, %v4233_v9  ;;  %v4250_v58 = vadd.f32 %v4245_v0, %v4234_v11 }
 0x8d8   : > { %v5307_v17 = vpop.eup %5306 }
 0x8d9   : > { %v5309_v19 = vpop.eup %5308  ;;  %5310 = vlog2.f32 %v5307_v17  ;;  %v4265_v31 = vmul.f32 %v5307_v17, %v6903_v20 }
 0x8da   : > { %5312 = vlog2.f32 %v5309_v19  ;;  %v4266_v55 = vmul.f32 %v5309_v19, %v6904_v27 }
 0x8db   : > { %v4267_v47 = vadd.f32 %v4265_v31, %v4249_v21 }
 0x8dc   : > { %v4268_v8 = vadd.f32 %v4266_v55, %v4250_v58 }
 0x8dd   : > { %4269 = vst [vmem:[%s6737_s8] sm:$0xff] %v4267_v47 }
 0x8de   : > { %4270 = vst [vmem:[%s6737_s8 + $0x8] sm:$0xff] %v4268_v8 }
 0x8e3   : > { %v5311_v14 = vpop.eup %5310 }
 0x8e4   : > { %v5313_v12 = vpop.eup %5312  ;;  %v4275_v57 = vmul.f32 0.6931472, %v5311_v14 }
 0x8e5   : > { %v4277_v42 = vmul.f32 0.6931472, %v5313_v12 }
 0x8e6   : > { %v4278_v2 = vrot.slane %v4275_v57, 4 }
 0x8e7   : > { %v4284_v51 = vrot.slane %v4277_v42, 4 }
 0x8e8   : > { %v4279_v16 = vadd.f32 %v4278_v2, %v4275_v57 }
 0x8e9   : > { %v4285_v10 = vadd.f32 %v4284_v51, %v4277_v42 }
 0x8ea   : > { %v4280_v22 = vrot.slane %v4279_v16, 2 }
 0x8eb   : > { %v4286_v46 = vrot.slane %v4285_v10, 2 }
 0x8ec   : > { %v4281_v26 = vadd.f32 %v4280_v22, %v4279_v16 }
 0x8ed   : > { %v4287_v50 = vadd.f32 %v4286_v46, %v4285_v10 }
 0x8ee   : > { %v4282_v54 = vrot.slane %v4281_v26, 1 }
 0x8ef   : > { %v4288_v23 = vrot.slane %v4287_v50, 1 }
 0x8f0   : > { %v4283_v38 = vadd.f32 %v4282_v54, %v4281_v26 }
 0x8f1   : > { %v4289_v39 = vadd.f32 %v4288_v23, %v4287_v50 }
 0x8f2   : > { %v4316_v52 = vadd.f32 %v4309_v41, %v4283_v38 }
 0x8f3   : > { %v4317_v36 = vadd.f32 %v4313_v7, %v4289_v39 }
 0x8f5   : > { %v4320_v44 = vcombine.low %v4316_v52, %v4317_v36 }
 0x8f7   : > { %v4327_v28 = vrot.slane %v4320_v44, %v4326_v48 }
 0x8f9   : > { %v4334_v53 = vrot.slane %v4327_v28, %v4326_v48 }
 0x8fb   : > { %v4336_v0 = vadd.f32 %v4334_v53, %v4273_v25 }
 0x8fd   : > { %4341 = vst.msk [vmem:[%s6738_s9] sm:$0x3] %vm4339_vm7, %v4336_v0 }
 0x8fe PF: > { %s6909_s19 = sld [smem:[#allocation9_spill]]  ;;  %s6910_s11 = sld [smem:[#allocation10_spill]] }
 0x8ff   : > { %p23_p7 = scmp.ge.s32.totalorder %s5528_s14, 6   ;;  %s6911_s30 = smov %s5434_s10 }
 0x900   : > { %s6913_s12 = smov %s5528_s14 }
 0x901   :  { %25 = sbr.rel (!%p23_p7) target bundleno = 8 (0x8), region = 139 }
 0x904   : > { %s6912_s10 = smov %s6909_s19 }
 0x908   :  { %4359 = vsyncpa [#allocation3], 1 }
 0x909   :  { %4361 = vsyncpa [#allocation3 + $0x1], 1 }
 0x90a   :  { %4362 = vsyncpa [#allocation5], 1 }
 0x90b   :  { %4364 = vsyncpa [#allocation5 + $0x1], 1 }

</bundles_post_ra>
